<compile_context>
chip_gen: v7x
topology: tpu7x:2x2x1
jax: 0.10.0
libtpu: 0.0.40
codegen_flags: <defaults>
</compile_context>

<pallas_src>
import functools
import jax
import jax.numpy as jnp
from jax.experimental import pallas as pl
from jax.experimental.pallas import tpu as pltpu

K = 7                     # Conv1d kernel size of all three conv layers
OUT_PAD = 128             # lane-padded logits width (real logits live in [:, :2])
FC_PAD = 128              # lane-padded fc1 width (real features live in [:, :32])
MM_DTYPE = jnp.bfloat16   # conv matmul-input dtype (f32 accumulate on the MXU);
                          # keep bf16 even on v5e -- casts are cheaper than 3x MXU passes


def _resident_spec(shape):
    # full-array block whose block index never changes -> stays VMEM-resident.
    # TODO(synk): pipeline_mode=pl.Buffered(1) would drop the second buffer of
    # each resident weight if Mosaic does not already elide it (small VMEM win).
    nd = len(shape)
    return pl.BlockSpec(shape, lambda i, _nd=nd: (0,) * _nd)


def _default_conv_mode():
    """'taps' on v5e (128-deep MXU), wide im2col elsewhere (256-deep MXU)."""
    try:
        kind = jax.devices()[0].device_kind.lower()
    except Exception:
        return "wide"
    if "v5e" in kind or "v5 lite" in kind or "v5lite" in kind:
        return "taps"
    return "wide"


def _vmem_limit_bytes():
    # ~100 MiB on v5e/v6e (128 MiB physical VMEM/TC), 56 MiB on v7x (64 MiB);
    # conservative fallback for anything unrecognized.
    try:
        kind = jax.devices()[0].device_kind.lower()
    except Exception:
        return 48 * 1024 * 1024
    if "v7" in kind:
        return 56 * 1024 * 1024
    if "v5" in kind or "v6" in kind:
        return 100 * 1024 * 1024
    return 48 * 1024 * 1024


def _pick_batch_tile(n, n_tile):
    # Aim for >= 2 grid steps (megacore on v7x via the "parallel" axis) while
    # keeping the batch tile sublane-aligned; cap at n_tile for VMEM.
    half = -(-n // 2)                       # ceil(n / 2)
    target = max(8, (half // 8) * 8)
    return min(n_tile, target)


def _make_kernel(conv_mode):
    def mm(a, w):
        # Contract last dim of `a` with first dim of `w`, f32 accumulate.
        # When the (nt, l) merge is sublane-aligned (l % 8 == 0), flatten to a
        # single big-M 2-D matmul so the MXU sees M = nt*l, not per-sample l.
        if a.ndim == 3 and a.shape[1] % 8 == 0:
            y = jax.lax.dot_general(
                a.reshape(a.shape[0] * a.shape[1], a.shape[2]), w,
                dimension_numbers=(((1,), (0,)), ((), ())),
                preferred_element_type=jnp.float32)
            return y.reshape(a.shape[0], a.shape[1], w.shape[-1])
        return jax.lax.dot_general(
            a, w, dimension_numbers=(((a.ndim - 1,), (0,)), ((), ())),
            preferred_element_type=jnp.float32)

    def kernel(x1_ref,
               w1_ref, t1_ref,
               w2_ref, t2_ref,
               w3_ref, t3_ref,
               wf1_ref, bf1_ref,
               wf2_ref, bf2_ref,
               out_ref):
        # conv1 (+folded BN scale): layer-1 im2col was done in the wrapper.
        h = jnp.maximum(mm(x1_ref[...], w1_ref[...]) + t1_ref[...][None], 0.0)

        def conv_bn_relu(h, w_ref, t_ref, cin):
            l_out = h.shape[1] - (K - 1)
            hq = h.astype(w_ref.dtype)
            if conv_mode == "wide":
                # one K*Cin-deep contraction (fills the 256-deep MXU on v6e/v7x)
                # TODO(synk): k>0 window slices are sublane-unaligned; a
                # pltpu.roll-based cols build would shift that work to the XLU
                # slot if xprof shows it on the critical path.
                cols = jnp.concatenate(
                    [hq[:, k:k + l_out, :] for k in range(K)], axis=-1)
                y = mm(cols, w_ref[...])
            else:
                # "taps": K accumulated Cin-deep matmuls (v5e, 128-deep MXU);
                # avoids materializing the 7x-wide cols buffer.
                y = mm(hq[:, 0:l_out, :], w_ref[0:cin, :])
                for k in range(1, K):
                    y = y + mm(hq[:, k:k + l_out, :],
                               w_ref[k * cin:(k + 1) * cin, :])
            return jnp.maximum(y + t_ref[...][None], 0.0)

        h = conv_bn_relu(h, w2_ref, t2_ref, 64)      # (nt, L-12, 128)
        h = conv_bn_relu(h, w3_ref, t3_ref, 128)     # (nt, L-18, 128)

        pooled = jnp.max(h, axis=1)                  # AdaptiveMaxPool1d(1)+flatten
        # fc1 -> relu -> fc2 as a lane-dense f32 128x128x128 chain; padded fc1
        # lanes are exactly zero, so the real logits are unchanged.
        f1 = jnp.maximum(mm(pooled, wf1_ref[...]) + bf1_ref[...], 0.0)
        out_ref[...] = mm(f1, wf2_ref[...]) + bf2_ref[...]        # (nt, 128)

    return kernel


@functools.partial(jax.jit, static_argnames=("n_tile", "conv_mode"))
def _dqn_forward(s_ncl, params, *, n_tile, conv_mode):
    """s_ncl: (N, img_height, L) PyTorch NCL layout. Returns padded (N+pad, 128)."""
    n, c_in, L = s_ncl.shape
    l1, l2, l3 = L - (K - 1), L - 2 * (K - 1), L - 3 * (K - 1)

    # channels-last + layer-1 im2col in the wrapper (28-deep contraction);
    # x1 intentionally stays 28 lanes wide (padding to 128 would 4.6x its DMA).
    x = jnp.transpose(s_ncl, (0, 2, 1)).astype(jnp.float32)          # (N, L, C_in)
    x1 = jnp.concatenate([x[:, k:k + l1, :] for k in range(K)],
                         axis=-1).astype(MM_DTYPE)                   # (N, l1, K*C_in)

    nt = _pick_batch_tile(n, n_tile)
    n_pad = (-n) % nt
    if n_pad:
        x1 = jnp.pad(x1, ((0, n_pad), (0, 0), (0, 0)))
    grid = ((n + n_pad) // nt,)

    # fold BN scale into the conv weights (f32 fold, then bf16 cast)
    w1p = (params["w1"] * params["s1"].reshape(1, 1, -1)
           ).reshape(K * c_in, 64).astype(MM_DTYPE)
    w2p = (params["w2"] * params["s2"].reshape(1, 1, -1)
           ).reshape(K * 64, 128).astype(MM_DTYPE)
    w3p = (params["w3"] * params["s3"].reshape(1, 1, -1)
           ).reshape(K * 128, 128).astype(MM_DTYPE)
    # lane-dense f32 FC chain: fc1 padded to 128 outputs, fc2 to 128x128
    wf1 = jnp.zeros((128, FC_PAD), jnp.float32).at[:, :32].set(params["wf1"])
    bf1 = jnp.zeros((1, FC_PAD), jnp.float32).at[:, :32].set(params["bf1"])
    wf2 = jnp.zeros((FC_PAD, OUT_PAD), jnp.float32).at[:32, :2].set(params["wf2"])
    bf2 = jnp.zeros((1, OUT_PAD), jnp.float32).at[:, :2].set(params["bf2"])

    args = (x1,
            w1p, params["t1"],
            w2p, params["t2"],
            w3p, params["t3"],
            wf1, bf1, wf2, bf2)

    in_specs = [pl.BlockSpec((nt, l1, K * c_in), lambda i: (i, 0, 0))]
    in_specs += [_resident_spec(a.shape) for a in args[1:]]

    flops = 2 * (n + n_pad) * (l1 * K * c_in * 64 + l2 * K * 64 * 128
                               + l3 * K * 128 * 128
                               + 128 * FC_PAD + FC_PAD * OUT_PAD)
    bytes_accessed = (x1.size * x1.dtype.itemsize
                      + sum(a.size * a.dtype.itemsize for a in args[1:])
                      + (n + n_pad) * OUT_PAD * 4)

    return pl.pallas_call(
        _make_kernel(conv_mode),
        out_shape=jax.ShapeDtypeStruct((n + n_pad, OUT_PAD), jnp.float32),
        grid=grid,
        in_specs=in_specs,
        out_specs=pl.BlockSpec((nt, OUT_PAD), lambda i: (i, 0)),
        compiler_params=pltpu.CompilerParams(
            dimension_semantics=("parallel",),
            vmem_limit_bytes=_vmem_limit_bytes()),
        cost_estimate=pl.CostEstimate(flops=flops, transcendentals=0,
                                      bytes_accessed=bytes_accessed),
    )(*args)


def dqn_forward(s_ncl, params, *, n_tile=128, conv_mode=None):
    """Returns (N, 2) Q-values."""
    if conv_mode is None:
        conv_mode = _default_conv_mode()
    n = s_ncl.shape[0]
    out = _dqn_forward(s_ncl, params, n_tile=n_tile, conv_mode=conv_mode)
    # Padded batch rows / padded logit lanes carry garbage (BN shifts on zero
    # input) -- this slice is load-bearing, do not remove.
    return out[:n, :2]


def init_params(key, img_height):
    ks = jax.random.split(key, 16)

    def conv_w(k, cin, cout):
        scale = 1.0 / jnp.sqrt(cin * K)
        return jax.random.normal(k, (K, cin, cout), jnp.float32) * scale

    def bn(kg, kb, km, kv, c, eps=1e-5):
        gamma = 0.5 + jax.random.uniform(kg, (1, c), jnp.float32)
        beta = 0.1 * jax.random.normal(kb, (1, c), jnp.float32)
        mean = 0.1 * jax.random.normal(km, (1, c), jnp.float32)
        var = 0.5 + jax.random.uniform(kv, (1, c), jnp.float32)
        scale = gamma / jnp.sqrt(var + eps)
        shift = beta - mean * scale
        return scale, shift

    s1, t1 = bn(ks[3], ks[4], ks[5], ks[6], 64)
    s2, t2 = bn(ks[7], ks[8], ks[9], ks[10], 128)
    s3, t3 = bn(ks[11], ks[12], ks[13], ks[14], 128)
    return {
        "w1": conv_w(ks[0], img_height, 64),
        "w2": conv_w(ks[1], 64, 128),
        "w3": conv_w(ks[2], 128, 128),
        "s1": s1, "t1": t1,
        "s2": s2, "t2": t2,
        "s3": s3, "t3": t3,
        "wf1": jax.random.normal(ks[15], (128, 32), jnp.float32) / jnp.sqrt(128.0),
        "bf1": jnp.zeros((1, 32), jnp.float32) + 0.01,
        "wf2": jax.random.normal(jax.random.fold_in(key, 99), (32, 2), jnp.float32) / jnp.sqrt(32.0),
        "bf2": jnp.zeros((1, 2), jnp.float32) + 0.01,
    }


def ref_forward(s_ncl, p, mm_dtype=MM_DTYPE):
    # pure-JAX reference mirroring the kernel's quantization (BN scale folded
    # into bf16 conv weights, f32 FC matmuls).
    x = jnp.transpose(s_ncl, (0, 2, 1)).astype(jnp.float32)

    def conv(h, w, sc, sh):
        lo = h.shape[1] - (K - 1)
        cols = jnp.concatenate([h[:, k:k + lo, :] for k in range(K)], axis=-1)
        wf = (w * sc.reshape(1, 1, -1)).reshape(-1, w.shape[-1])
        y = jnp.einsum("nlc,cd->nld",
                       cols.astype(mm_dtype), wf.astype(mm_dtype),
                       preferred_element_type=jnp.float32)
        return jnp.maximum(y + sh[None], 0.0)

    h = conv(x, p["w1"], p["s1"], p["t1"])
    h = conv(h, p["w2"], p["s2"], p["t2"])
    h = conv(h, p["w3"], p["s3"], p["t3"])
    pooled = jnp.max(h, axis=1)
    f1 = jnp.maximum(jnp.dot(pooled, p["wf1"],
                             preferred_element_type=jnp.float32) + p["bf1"], 0.0)
    return jnp.dot(f1, p["wf2"], preferred_element_type=jnp.float32) + p["bf2"]


if __name__ == "__main__":
    key = jax.random.PRNGKey(0)
    N, IMG_H, L = 2, 4, 32          # small shapes: batch=2, img_height=4 channels, length=32
    k_in, k_par = jax.random.split(key)
    s = jax.random.normal(k_in, (N, IMG_H, L), jnp.float32)   # PyTorch NCL input
    params = init_params(k_par, IMG_H)

    out = dqn_forward(s, params)
    out = jax.block_until_ready(out)

    ref = ref_forward(s, params)
    assert out.shape == (N, 2)
    assert jnp.allclose(out, ref, atol=1e-2, rtol=1e-2), (out, ref)

    print("KERNEL_OK")
</pallas_src>

<mosaic_0001>
module attributes {stable_mosaic.version = 11 : i64} {
  func.func @kernel(%arg0: i32, %arg1: memref<8x26x28xbf16, #tpu.memory_space<vmem>>, %arg2: memref<28x64xbf16, #tpu.memory_space<vmem>>, %arg3: memref<1x64xf32, #tpu.memory_space<vmem>>, %arg4: memref<448x128xbf16, #tpu.memory_space<vmem>>, %arg5: memref<1x128xf32, #tpu.memory_space<vmem>>, %arg6: memref<896x128xbf16, #tpu.memory_space<vmem>>, %arg7: memref<1x128xf32, #tpu.memory_space<vmem>>, %arg8: memref<128x128xf32, #tpu.memory_space<vmem>>, %arg9: memref<1x128xf32, #tpu.memory_space<vmem>>, %arg10: memref<128x128xf32, #tpu.memory_space<vmem>>, %arg11: memref<1x128xf32, #tpu.memory_space<vmem>>, %arg12: memref<8x128xf32, #tpu.memory_space<vmem>>) attributes {dimension_semantics = [#tpu.dimension_semantics<parallel>], iteration_bounds = array<i64: 1>, scalar_prefetch = 0 : i64, scratch_operands = 0 : i64, tpu.core_type = #tpu.core_type<tc>, window_params = [{transform_indices = @transform_0, window_bounds = array<i64: 8, 26, 28>}, {pipeline_mode = #tpu.pipeline_mode<synchronous>, transform_indices = @transform_1, window_bounds = array<i64: 28, 64>}, {pipeline_mode = #tpu.pipeline_mode<synchronous>, transform_indices = @transform_2, window_bounds = array<i64: 1, 64>}, {pipeline_mode = #tpu.pipeline_mode<synchronous>, transform_indices = @transform_3, window_bounds = array<i64: 448, 128>}, {pipeline_mode = #tpu.pipeline_mode<synchronous>, transform_indices = @transform_4, window_bounds = array<i64: 1, 128>}, {pipeline_mode = #tpu.pipeline_mode<synchronous>, transform_indices = @transform_5, window_bounds = array<i64: 896, 128>}, {pipeline_mode = #tpu.pipeline_mode<synchronous>, transform_indices = @transform_6, window_bounds = array<i64: 1, 128>}, {pipeline_mode = #tpu.pipeline_mode<synchronous>, transform_indices = @transform_7, window_bounds = array<i64: 128, 128>}, {pipeline_mode = #tpu.pipeline_mode<synchronous>, transform_indices = @transform_8, window_bounds = array<i64: 1, 128>}, {pipeline_mode = #tpu.pipeline_mode<synchronous>, transform_indices = @transform_9, window_bounds = array<i64: 128, 128>}, {pipeline_mode = #tpu.pipeline_mode<synchronous>, transform_indices = @transform_10, window_bounds = array<i64: 1, 128>}, {transform_indices = @transform_11, window_bounds = array<i64: 8, 128>}]} {
    %c0 = arith.constant 0 : index
    %c0_0 = arith.constant 0 : index
    %c0_1 = arith.constant 0 : index
    %0 = vector.load %arg1[%c0, %c0_0, %c0_1] : memref<8x26x28xbf16, #tpu.memory_space<vmem>>, vector<8x26x28xbf16>
    %c0_2 = arith.constant 0 : index
    %c0_3 = arith.constant 0 : index
    %1 = vector.load %arg2[%c0_2, %c0_3] : memref<28x64xbf16, #tpu.memory_space<vmem>>, vector<28x64xbf16>
    %cst = arith.constant dense<0.000000e+00> : vector<8x26x64xf32>
    %2 = tpu.matmul %0, %1, %cst {dimension_numbers = #tpu.dot_dimension_numbers<[2], [0], [0, 1], [1], [0, 0, 0, 1, 1, 1], [], []>} : vector<8x26x28xbf16>, vector<28x64xbf16>, vector<8x26x64xf32> -> vector<8x26x64xf32>
    %c0_4 = arith.constant 0 : index
    %c0_5 = arith.constant 0 : index
    %3 = vector.load %arg3[%c0_4, %c0_5] : memref<1x64xf32, #tpu.memory_space<vmem>>, vector<1x64xf32>
    %4 = vector.shape_cast %3 : vector<1x64xf32> to vector<1x1x64xf32>
    %5 = vector.broadcast %4 : vector<1x1x64xf32> to vector<8x26x64xf32>
    %6 = arith.addf %2, %5 : vector<8x26x64xf32>
    %cst_6 = arith.constant 0.000000e+00 : f32
    %7 = vector.broadcast %cst_6 : f32 to vector<8x26x64xf32>
    %8 = arith.maximumf %6, %7 : vector<8x26x64xf32>
    %9 = arith.truncf %8 : vector<8x26x64xf32> to vector<8x26x64xbf16>
    %10 = vector.extract_strided_slice %9 {offsets = [0, 0, 0], sizes = [8, 20, 64], strides = [1, 1, 1]} : vector<8x26x64xbf16> to vector<8x20x64xbf16>
    %11 = vector.extract_strided_slice %9 {offsets = [0, 1, 0], sizes = [8, 20, 64], strides = [1, 1, 1]} : vector<8x26x64xbf16> to vector<8x20x64xbf16>
    %12 = vector.extract_strided_slice %9 {offsets = [0, 2, 0], sizes = [8, 20, 64], strides = [1, 1, 1]} : vector<8x26x64xbf16> to vector<8x20x64xbf16>
    %13 = vector.extract_strided_slice %9 {offsets = [0, 3, 0], sizes = [8, 20, 64], strides = [1, 1, 1]} : vector<8x26x64xbf16> to vector<8x20x64xbf16>
    %14 = vector.extract_strided_slice %9 {offsets = [0, 4, 0], sizes = [8, 20, 64], strides = [1, 1, 1]} : vector<8x26x64xbf16> to vector<8x20x64xbf16>
    %15 = vector.extract_strided_slice %9 {offsets = [0, 5, 0], sizes = [8, 20, 64], strides = [1, 1, 1]} : vector<8x26x64xbf16> to vector<8x20x64xbf16>
    %16 = vector.extract_strided_slice %9 {offsets = [0, 6, 0], sizes = [8, 20, 64], strides = [1, 1, 1]} : vector<8x26x64xbf16> to vector<8x20x64xbf16>
    %17 = tpu.concatenate %10, %11, %12, %13, %14, %15, %16 in 2 : vector<8x20x64xbf16>, vector<8x20x64xbf16>, vector<8x20x64xbf16>, vector<8x20x64xbf16>, vector<8x20x64xbf16>, vector<8x20x64xbf16>, vector<8x20x64xbf16> -> vector<8x20x448xbf16>
    %c0_7 = arith.constant 0 : index
    %c0_8 = arith.constant 0 : index
    %18 = vector.load %arg4[%c0_7, %c0_8] : memref<448x128xbf16, #tpu.memory_space<vmem>>, vector<448x128xbf16>
    %cst_9 = arith.constant dense<0.000000e+00> : vector<8x20x128xf32>
    %19 = tpu.matmul %17, %18, %cst_9 {dimension_numbers = #tpu.dot_dimension_numbers<[2], [0], [0, 1], [1], [0, 0, 0, 1, 1, 1], [], []>} : vector<8x20x448xbf16>, vector<448x128xbf16>, vector<8x20x128xf32> -> vector<8x20x128xf32>
    %c0_10 = arith.constant 0 : index
    %c0_11 = arith.constant 0 : index
    %20 = vector.load %arg5[%c0_10, %c0_11] : memref<1x128xf32, #tpu.memory_space<vmem>>, vector<1x128xf32>
    %21 = vector.shape_cast %20 : vector<1x128xf32> to vector<1x1x128xf32>
    %22 = vector.broadcast %21 : vector<1x1x128xf32> to vector<8x20x128xf32>
    %23 = arith.addf %19, %22 : vector<8x20x128xf32>
    %cst_12 = arith.constant 0.000000e+00 : f32
    %24 = vector.broadcast %cst_12 : f32 to vector<8x20x128xf32>
    %25 = arith.maximumf %23, %24 : vector<8x20x128xf32>
    %26 = arith.truncf %25 : vector<8x20x128xf32> to vector<8x20x128xbf16>
    %27 = vector.extract_strided_slice %26 {offsets = [0, 0, 0], sizes = [8, 14, 128], strides = [1, 1, 1]} : vector<8x20x128xbf16> to vector<8x14x128xbf16>
    %28 = vector.extract_strided_slice %26 {offsets = [0, 1, 0], sizes = [8, 14, 128], strides = [1, 1, 1]} : vector<8x20x128xbf16> to vector<8x14x128xbf16>
    %29 = vector.extract_strided_slice %26 {offsets = [0, 2, 0], sizes = [8, 14, 128], strides = [1, 1, 1]} : vector<8x20x128xbf16> to vector<8x14x128xbf16>
    %30 = vector.extract_strided_slice %26 {offsets = [0, 3, 0], sizes = [8, 14, 128], strides = [1, 1, 1]} : vector<8x20x128xbf16> to vector<8x14x128xbf16>
    %31 = vector.extract_strided_slice %26 {offsets = [0, 4, 0], sizes = [8, 14, 128], strides = [1, 1, 1]} : vector<8x20x128xbf16> to vector<8x14x128xbf16>
    %32 = vector.extract_strided_slice %26 {offsets = [0, 5, 0], sizes = [8, 14, 128], strides = [1, 1, 1]} : vector<8x20x128xbf16> to vector<8x14x128xbf16>
    %33 = vector.extract_strided_slice %26 {offsets = [0, 6, 0], sizes = [8, 14, 128], strides = [1, 1, 1]} : vector<8x20x128xbf16> to vector<8x14x128xbf16>
    %34 = tpu.concatenate %27, %28, %29, %30, %31, %32, %33 in 2 : vector<8x14x128xbf16>, vector<8x14x128xbf16>, vector<8x14x128xbf16>, vector<8x14x128xbf16>, vector<8x14x128xbf16>, vector<8x14x128xbf16>, vector<8x14x128xbf16> -> vector<8x14x896xbf16>
    %c0_13 = arith.constant 0 : index
    %c0_14 = arith.constant 0 : index
    %35 = vector.load %arg6[%c0_13, %c0_14] : memref<896x128xbf16, #tpu.memory_space<vmem>>, vector<896x128xbf16>
    %cst_15 = arith.constant dense<0.000000e+00> : vector<8x14x128xf32>
    %36 = tpu.matmul %34, %35, %cst_15 {dimension_numbers = #tpu.dot_dimension_numbers<[2], [0], [0, 1], [1], [0, 0, 0, 1, 1, 1], [], []>} : vector<8x14x896xbf16>, vector<896x128xbf16>, vector<8x14x128xf32> -> vector<8x14x128xf32>
    %c0_16 = arith.constant 0 : index
    %c0_17 = arith.constant 0 : index
    %37 = vector.load %arg7[%c0_16, %c0_17] : memref<1x128xf32, #tpu.memory_space<vmem>>, vector<1x128xf32>
    %38 = vector.shape_cast %37 : vector<1x128xf32> to vector<1x1x128xf32>
    %39 = vector.broadcast %38 : vector<1x1x128xf32> to vector<8x14x128xf32>
    %40 = arith.addf %36, %39 : vector<8x14x128xf32>
    %cst_18 = arith.constant 0.000000e+00 : f32
    %41 = vector.broadcast %cst_18 : f32 to vector<8x14x128xf32>
    %42 = arith.maximumf %40, %41 : vector<8x14x128xf32>
    %cst_19 = arith.constant dense<0xFF800000> : vector<8x128xf32>
    %43 = vector.multi_reduction <maximumf>, %42, %cst_19 [1] : vector<8x14x128xf32> to vector<8x128xf32>
    %c0_20 = arith.constant 0 : index
    %c0_21 = arith.constant 0 : index
    %44 = vector.load %arg8[%c0_20, %c0_21] : memref<128x128xf32, #tpu.memory_space<vmem>>, vector<128x128xf32>
    %cst_22 = arith.constant dense<0.000000e+00> : vector<8x128xf32>
    %45 = tpu.matmul %43, %44, %cst_22 {dimension_numbers = #tpu.dot_dimension_numbers<[1], [0], [0], [1], [0, 0, 1, 1], [], []>} : vector<8x128xf32>, vector<128x128xf32>, vector<8x128xf32> -> vector<8x128xf32>
    %c0_23 = arith.constant 0 : index
    %c0_24 = arith.constant 0 : index
    %46 = vector.load %arg9[%c0_23, %c0_24] : memref<1x128xf32, #tpu.memory_space<vmem>>, vector<1x128xf32>
    %47 = vector.broadcast %46 : vector<1x128xf32> to vector<8x128xf32>
    %48 = arith.addf %45, %47 : vector<8x128xf32>
    %cst_25 = arith.constant 0.000000e+00 : f32
    %49 = vector.broadcast %cst_25 : f32 to vector<8x128xf32>
    %50 = arith.maximumf %48, %49 : vector<8x128xf32>
    %c0_26 = arith.constant 0 : index
    %c0_27 = arith.constant 0 : index
    %51 = vector.load %arg10[%c0_26, %c0_27] : memref<128x128xf32, #tpu.memory_space<vmem>>, vector<128x128xf32>
    %cst_28 = arith.constant dense<0.000000e+00> : vector<8x128xf32>
    %52 = tpu.matmul %50, %51, %cst_28 {dimension_numbers = #tpu.dot_dimension_numbers<[1], [0], [0], [1], [0, 0, 1, 1], [], []>} : vector<8x128xf32>, vector<128x128xf32>, vector<8x128xf32> -> vector<8x128xf32>
    %c0_29 = arith.constant 0 : index
    %c0_30 = arith.constant 0 : index
    %53 = vector.load %arg11[%c0_29, %c0_30] : memref<1x128xf32, #tpu.memory_space<vmem>>, vector<1x128xf32>
    %54 = vector.broadcast %53 : vector<1x128xf32> to vector<8x128xf32>
    %55 = arith.addf %52, %54 : vector<8x128xf32>
    %c0_31 = arith.constant 0 : index
    %c0_32 = arith.constant 0 : index
    %56 = vector.load %arg12[%c0_31, %c0_32] : memref<8x128xf32, #tpu.memory_space<vmem>>, vector<8x128xf32>
    tpu.vector_store %arg12[%c0_31, %c0_32], %55 {strides = array<i32>} : memref<8x128xf32, #tpu.memory_space<vmem>>, vector<8x128xf32>,
    return
  }
  func.func @transform_0(%arg0: i32) -> (i32, i32, i32) {
    %c0_i32 = arith.constant 0 : i32
    %c0_i32_0 = arith.constant 0 : i32
    %c0_i32_1 = arith.constant 0 : i32
    return %arg0, %c0_i32, %c0_i32_0 : i32, i32, i32
  }
  func.func @transform_1(%arg0: i32) -> (i32, i32) {
    %c0_i32 = arith.constant 0 : i32
    %c0_i32_0 = arith.constant 0 : i32
    %c0_i32_1 = arith.constant 0 : i32
    return %c0_i32, %c0_i32_0 : i32, i32
  }
  func.func @transform_2(%arg0: i32) -> (i32, i32) {
    %c0_i32 = arith.constant 0 : i32
    %c0_i32_0 = arith.constant 0 : i32
    %c0_i32_1 = arith.constant 0 : i32
    return %c0_i32, %c0_i32_0 : i32, i32
  }
  func.func @transform_3(%arg0: i32) -> (i32, i32) {
    %c0_i32 = arith.constant 0 : i32
    %c0_i32_0 = arith.constant 0 : i32
    %c0_i32_1 = arith.constant 0 : i32
    return %c0_i32, %c0_i32_0 : i32, i32
  }
  func.func @transform_4(%arg0: i32) -> (i32, i32) {
    %c0_i32 = arith.constant 0 : i32
    %c0_i32_0 = arith.constant 0 : i32
    %c0_i32_1 = arith.constant 0 : i32
    return %c0_i32, %c0_i32_0 : i32, i32
  }
  func.func @transform_5(%arg0: i32) -> (i32, i32) {
    %c0_i32 = arith.constant 0 : i32
    %c0_i32_0 = arith.constant 0 : i32
    %c0_i32_1 = arith.constant 0 : i32
    return %c0_i32, %c0_i32_0 : i32, i32
  }
  func.func @transform_6(%arg0: i32) -> (i32, i32) {
    %c0_i32 = arith.constant 0 : i32
    %c0_i32_0 = arith.constant 0 : i32
    %c0_i32_1 = arith.constant 0 : i32
    return %c0_i32, %c0_i32_0 : i32, i32
  }
  func.func @transform_7(%arg0: i32) -> (i32, i32) {
    %c0_i32 = arith.constant 0 : i32
    %c0_i32_0 = arith.constant 0 : i32
    %c0_i32_1 = arith.constant 0 : i32
    return %c0_i32, %c0_i32_0 : i32, i32
  }
  func.func @transform_8(%arg0: i32) -> (i32, i32) {
    %c0_i32 = arith.constant 0 : i32
    %c0_i32_0 = arith.constant 0 : i32
    %c0_i32_1 = arith.constant 0 : i32
    return %c0_i32, %c0_i32_0 : i32, i32
  }
  func.func @transform_9(%arg0: i32) -> (i32, i32) {
    %c0_i32 = arith.constant 0 : i32
    %c0_i32_0 = arith.constant 0 : i32
    %c0_i32_1 = arith.constant 0 : i32
    return %c0_i32, %c0_i32_0 : i32, i32
  }
  func.func @transform_10(%arg0: i32) -> (i32, i32) {
    %c0_i32 = arith.constant 0 : i32
    %c0_i32_0 = arith.constant 0 : i32
    %c0_i32_1 = arith.constant 0 : i32
    return %c0_i32, %c0_i32_0 : i32, i32
  }
  func.func @transform_11(%arg0: i32) -> (i32, i32) {
    %c0_i32 = arith.constant 0 : i32
    %c0_i32_0 = arith.constant 0 : i32
    return %arg0, %c0_i32 : i32, i32
  }
}

</mosaic_0001>

<bundles_post_ra>
// kernel: _dqn_forward.1
= control target key start
LH: loop header
LB: loop body
LE: loop exit
PB: predicated region body
PF: predicated region fallthrough
CT: control target
= control target key end

     0   :  { %v12936_v1 = vmov 0.0   ;;  %v125_v3 = vlaneseq  ;;  %vm1561_vm0 = vcmask 1045504   ;;  %vm10169_vm1 = vmmov 0   ;;  %s12924_s0 = inlined_call_operand.vmem [shape: bf16[8,26,28], index: 0, kind: input, shape index: {}]   ;;  %s12925_s1 = inlined_call_operand.vmem [shape: bf16[28,64], index: 1, kind: input, shape index: {}]   ;;  %s12926_s2 = inlined_call_operand.vmem [shape: f32[1,64], index: 2, kind: input, shape index: {}]   ;;  %s12927_s3 = inlined_call_operand.vmem [shape: bf16[448,128], index: 3, kind: input, shape index: {}]   ;;  %s12928_s4 = inlined_call_operand.vmem [shape: f32[1,128], index: 4, kind: input, shape index: {}]   ;;  %s12929_s5 = inlined_call_operand.vmem [shape: bf16[896,128], index: 5, kind: input, shape index: {}]   ;;  %s12930_s6 = inlined_call_operand.vmem [shape: f32[1,128], index: 6, kind: input, shape index: {}]   ;;  %s12931_s7 = inlined_call_operand.vmem [shape: f32[128,128], index: 7, kind: input, shape index: {}]   ;;  %s12932_s8 = inlined_call_operand.vmem [shape: f32[1,128], index: 8, kind: input, shape index: {}]   ;;  %s12933_s9 = inlined_call_operand.vmem [shape: f32[128,128], index: 9, kind: input, shape index: {}]   ;;  %s12934_s10 = inlined_call_operand.vmem [shape: f32[1,128], index: 10, kind: input, shape index: {}]   ;;  %s12935_s11 = inlined_call_operand.hbm [shape: f32[8,128], index: 11, kind: output, shape index: {}]  }
   0x1   :  { %v10058_v0 = vld [vmem:[%s12925_s1] sm:$0xff]   ;;  %9832 = vmatprep.subr.bf16.mxu0 %v12936_v1  ;;  %v10059_v2 = vld [vmem:[%s12925_s1 + $0x8] sm:$0x3f]   ;;  %9836 = vmatprep.mubr.msk.bf16.mxu0 %vm10169_vm1, %v12936_v1  ;;  %v10170_v7 = vmov 1966171168   ;;  %vm1521_vm2 = vcmask 228352  }
   0x2   :  { %9833 = vmatpush3.bf16.msra.mxu0 %v10058_v0  ;;  %v1563_v4 = vsel %vm1561_vm0, %v10059_v2, 0  ;;  %v9281_v5 = vld.sshfl [vmem:[%s12924_s0] sm:$0x33 pattern:$0x75316420]  ;;  %v123_v8 = vunpack.c.l.s4 %v10170_v7  ;;  %v10253_v9 = vshrl.u32 %v125_v3, 7 }
   0x3   :  { %9834 = vmatprep.subr.bf16.mxu0 %v12936_v1  ;;  %v9282_v6 = vld.sshfl [vmem:[%s12924_s0 + $0x4] sm:$0x33 pattern:$0x75316420]  ;;  %v121_v11 = vcombine.high %v9281_v5, %v9281_v5 }
   0x4   :  { %v9283_v10 = vld.sshfl [vmem:[%s12924_s0 + $0x8] sm:$0x33 pattern:$0x75316420]  ;;  %v124_v12 = vunpack.c.0.s8 %v123_v8  ;;  %v145_v13 = vcombine.high %v9282_v6, %v9282_v6 }
   0x5   :  { %v9284_v14 = vld.sshfl [vmem:[%s12924_s0 + $0xc] sm:$0x1 pattern:$0x75316420]  ;;  %v169_v16 = vcombine.high %v9283_v10, %v9283_v10 }
   0x6   :  { %9835 = vmatpush3.bf16.msra.mxu0 %v1563_v4  ;;  %v9285_v15 = vld.sshfl [vmem:[%s12924_s0 + $0x10] sm:$0x33 pattern:$0x75316420]  ;;  %v10268_v18 = vsub.s32 %v124_v12, %v10253_v9 }
   0x7   :  { %v9286_v17 = vld.sshfl [vmem:[%s12924_s0 + $0x14] sm:$0x33 pattern:$0x75316420]  ;;  %v207_v20 = vcombine.high %v9285_v15, %v9285_v15 }
   0x8   :  { %v9287_v19 = vld.sshfl [vmem:[%s12924_s0 + $0x18] sm:$0x33 pattern:$0x75316420]  ;;  %v231_v21 = vcombine.high %v9286_v17, %v9286_v17  ;;  %v128_v23 = vrot.slane %v9281_v5, %v10268_v18  ;;  %v135_v24 = vrot.slane %v121_v11, %v10268_v18  ;;  %v152_v25 = vrot.slane %v9282_v6, %v10268_v18 }
   0x9   :  { %v255_v22 = vcombine.high %v9287_v19, %v9287_v19  ;;  %v159_v26 = vrot.slane %v145_v13, %v10268_v18  ;;  %v176_v27 = vrot.slane %v9283_v10, %v10268_v18  ;;  %v183_v28 = vrot.slane %v169_v16, %v10268_v18  ;;  %v9288_v59 = vld.sshfl [vmem:[%s12924_s0 + $0x1c] sm:$0x1 pattern:$0x75316420] }
   0xa   :  { %v199_v29 = vrot.slane %v9284_v14, %v10268_v18  ;;  %v214_v30 = vrot.slane %v9285_v15, %v10268_v18  ;;  %v819_v31 = vcombine.low %v128_v23, %v135_v24  ;;  %v9313_v32 = vcombine.high %v128_v23, %v135_v24  ;;  %v9289_v0 = vld.sshfl [vmem:[%s12924_s0 + $0x20] sm:$0x33 pattern:$0x75316420] }
   0xb   :  { %v821_v33 = vcombine.low %v152_v25, %v159_v26  ;;  %v9314_v34 = vcombine.high %v152_v25, %v159_v26  ;;  %v221_v35 = vrot.slane %v207_v20, %v10268_v18  ;;  %v868_v37 = vcombine.low %v176_v27, %v183_v28  ;;  %v9290_v6 = vld.sshfl [vmem:[%s12924_s0 + $0x24] sm:$0x33 pattern:$0x75316420] }
   0xc   :  { %v222_v36 = vcombine.high %v214_v30, %v214_v30  ;;  %v9315_v38 = vcombine.high %v176_v27, %v183_v28  ;;  %v829_v39 = vrot.slane %v819_v31, %v10268_v18  ;;  %v836_v40 = vrot.slane %v9313_v32, %v10268_v18  ;;  %v9291_v16 = vld.sshfl [vmem:[%s12924_s0 + $0x28] sm:$0x33 pattern:$0x75316420] }
   0xd   :  { %v843_v41 = vrot.slane %v821_v33, %v10268_v18  ;;  %v850_v42 = vrot.slane %v9314_v34, %v10268_v18  ;;  %v870_v43 = vcombine.low %v199_v29, %v214_v30  ;;  %v878_v45 = vrot.slane %v868_v37, %v10268_v18  ;;  %v9292_v24 = vld.sshfl [vmem:[%s12924_s0 + $0x2c] sm:$0x1 pattern:$0x75316420] }
   0xe   :  { %v871_v44 = vcombine.low %v221_v35, %v222_v36  ;;  %v885_v46 = vrot.slane %v9315_v38, %v10268_v18  ;;  %v851_v47 = vcombine.low %v829_v39, %v836_v40  ;;  %v223_v49 = vcombine.high %v221_v35, %v221_v35  ;;  %v9293_v28 = vld.sshfl [vmem:[%s12924_s0 + $0x30] sm:$0x33 pattern:$0x75316420] }
   0xf   :  { %v852_v48 = vcombine.low %v843_v41, %v850_v42  ;;  %v238_v50 = vrot.slane %v9286_v17, %v10268_v18  ;;  %v892_v51 = vrot.slane %v870_v43, %v10268_v18  ;;  %v245_v54 = vrot.slane %v231_v21, %v10268_v18 }
  0x10   :  { %v899_v52 = vrot.slane %v871_v44, %v10268_v18  ;;  %v900_v53 = vcombine.low %v878_v45, %v885_v46  ;;  %v859_v55 = vrot.slane %v851_v47, %v10268_v18  ;;  %v262_v58 = vrot.slane %v9287_v19, %v10268_v18  ;;  %v9294_v45 = vld.sshfl [vmem:[%s12924_s0 + $0x34] sm:$0x33 pattern:$0x75316420] }
  0x11   :  { %v866_v56 = vrot.slane %v852_v48, %v10268_v18  ;;  %v246_v57 = vcombine.high %v238_v50, %v238_v50  ;;  %v247_v62 = vcombine.high %v245_v54, %v245_v54  ;;  %v269_v63 = vrot.slane %v255_v22, %v10268_v18 }
  0x12   :  { %v901_v60 = vcombine.low %v892_v51, %v899_v52  ;;  %v908_v61 = vrot.slane %v900_v53, %v10268_v18  ;;  %v270_v3 = vcombine.high %v262_v58, %v262_v58  ;;  %v917_v4 = vcombine.low %v223_v49, %v238_v50  ;;  %v9295_v52 = vld.sshfl [vmem:[%s12924_s0 + $0x38] sm:$0x33 pattern:$0x75316420] }
  0x13   :  { %v867_v2 = vcombine.low %v859_v55, %v866_v56  ;;  %v918_v5 = vcombine.low %v245_v54, %v246_v57  ;;  %v919_v8 = vcombine.low %v247_v62, %v262_v58  ;;  %v271_v10 = vcombine.high %v269_v63, %v269_v63 }
  0x14   :  { %v915_v7 = vrot.slane %v901_v60, %v10268_v18  ;;  %v285_v11 = vrot.slane %v9288_v59, %v10268_v18  ;;  %v920_v12 = vcombine.low %v269_v63, %v270_v3  ;;  %v927_v13 = vrot.slane %v917_v4, %v10268_v18  ;;  %v9297_v3 = vld.sshfl [vmem:[%s12924_s0 + $0x40] sm:$0x33 pattern:$0x75316420] }
  0x15   :  { %9837 = vmatmul.mubr.msk.bf16.vlgmr.msra.gmra.mrb[0].mxu0 %vm1521_vm2, %v867_v2  ;;  %v934_v14 = vrot.slane %v918_v5, %v10268_v18  ;;  %v293_v15 = vcombine.high %v9289_v0, %v9289_v0  ;;  %v941_v17 = vrot.slane %v919_v8, %v10268_v18  ;;  %v300_v19 = vrot.slane %v9289_v0, %v10268_v18 }
  0x16   :  { %9840 = vmatprep.mubr.msk.bf16.mxu0 %vm10169_vm1, %v12936_v1  ;;  %v317_v20 = vcombine.high %v9290_v6, %v9290_v6  ;;  %v948_v21 = vrot.slane %v920_v12, %v10268_v18  ;;  %v324_v23 = vrot.slane %v9290_v6, %v10268_v18  ;;  %v966_v27 = vcombine.low %v271_v10, %v285_v11 }
  0x17   :  { %v307_v22 = vrot.slane %v293_v15, %v10268_v18  ;;  %v949_v25 = vcombine.low %v927_v13, %v934_v14  ;;  %v341_v29 = vcombine.high %v9291_v16, %v9291_v16  ;;  %v916_v30 = vcombine.low %v908_v61, %v915_v7  ;;  %v9296_v13 = vld.sshfl [vmem:[%s12924_s0 + $0x3c] sm:$0x1 pattern:$0x75316420] }
  0x18   :  { %v331_v26 = vrot.slane %v317_v20, %v10268_v18  ;;  %v950_v31 = vcombine.low %v941_v17, %v948_v21  ;;  %v348_v35 = vrot.slane %v9291_v16, %v10268_v18  ;;  %v371_v37 = vrot.slane %v9292_v24, %v10268_v18  ;;  %v9298_v21 = vld.sshfl [vmem:[%s12924_s0 + $0x44] sm:$0x33 pattern:$0x75316420] }
  0x19   :  { %v967_v32 = vcombine.low %v300_v19, %v307_v22  ;;  %v9316_v33 = vcombine.high %v300_v19, %v307_v22  ;;  %v355_v36 = vrot.slane %v341_v29, %v10268_v18  ;;  %v386_v38 = vrot.slane %v9293_v28, %v10268_v18  ;;  %v9299_v22 = vld.sshfl [vmem:[%s12924_s0 + $0x48] sm:$0x33 pattern:$0x75316420] }
  0x1a   :  { %v969_v34 = vcombine.low %v324_v23, %v331_v26  ;;  %v957_v39 = vrot.slane %v949_v25, %v10268_v18  ;;  %v976_v40 = vrot.slane %v966_v27, %v10268_v18  ;;  %v964_v42 = vrot.slane %v950_v31, %v10268_v18 }
  0x1b   :  { %v983_v41 = vrot.slane %v967_v32, %v10268_v18  ;;  %v990_v43 = vrot.slane %v9316_v33, %v10268_v18  ;;  %v379_v46 = vcombine.high %v9293_v28, %v9293_v28  ;;  %v9317_v47 = vcombine.high %v324_v23, %v331_v26 }
  0x1c   :  { %v997_v44 = vrot.slane %v969_v34, %v10268_v18  ;;  %v1016_v48 = vcombine.low %v348_v35, %v355_v36  ;;  %v9318_v49 = vcombine.high %v348_v35, %v355_v36  ;;  %v1018_v50 = vcombine.low %v371_v37, %v386_v38 }
  0x1d   :  { %9841 = vmatmul.mubr.msk.bf16.gmra.mrb[4].mxu0 %vm1521_vm2, %v916_v30  ;;  %v998_v51 = vcombine.low %v976_v40, %v983_v41  ;;  %v393_v53 = vrot.slane %v379_v46, %v10268_v18  ;;  %v403_v54 = vcombine.high %v9294_v45, %v9294_v45  ;;  %v965_v55 = vcombine.low %v957_v39, %v964_v42  ;;  %v9301_v39 = vld.sshfl [vmem:[%s12924_s0 + $0x50] sm:$0x33 pattern:$0x75316420] }
  0x1e   :  { %9844 = vmatprep.mubr.msk.bf16.mxu0 %vm10169_vm1, %v12936_v1  ;;  %v999_v56 = vcombine.low %v990_v43, %v997_v44  ;;  %v410_v57 = vrot.slane %v9294_v45, %v10268_v18  ;;  %v1025_v58 = vrot.slane %v9317_v47, %v10268_v18  ;;  %v1032_v60 = vrot.slane %v1016_v48, %v10268_v18  ;;  %v9302_v48 = vld.sshfl [vmem:[%s12924_s0 + $0x54] sm:$0x33 pattern:$0x75316420] }
  0x1f   :  { %v417_v59 = vrot.slane %v403_v54, %v10268_v18  ;;  %v1039_v61 = vrot.slane %v9318_v49, %v10268_v18  ;;  %v1046_v62 = vrot.slane %v1018_v50, %v10268_v18  ;;  %v394_v63 = vcombine.high %v386_v38, %v386_v38 }
  0x20   :  { %v1006_v0 = vrot.slane %v998_v51, %v10268_v18  ;;  %v395_v2 = vcombine.high %v393_v53, %v393_v53  ;;  %v427_v4 = vcombine.high %v9295_v52, %v9295_v52  ;;  %v1013_v5 = vrot.slane %v999_v56, %v10268_v18 }
  0x21   :  { %v418_v6 = vcombine.high %v410_v57, %v410_v57  ;;  %v419_v7 = vcombine.high %v417_v59, %v417_v59  ;;  %v434_v8 = vrot.slane %v9295_v52, %v10268_v18  ;;  %v1047_v10 = vcombine.low %v1025_v58, %v1032_v60  ;;  %v9300_v60 = vld.sshfl [vmem:[%s12924_s0 + $0x4c] sm:$0x1 pattern:$0x75316420] }
  0x22   :  { %v1048_v11 = vcombine.low %v1039_v61, %v1046_v62  ;;  %v1064_v12 = vcombine.low %v393_v53, %v394_v63  ;;  %v1065_v14 = vcombine.low %v395_v2, %v410_v57  ;;  %v441_v15 = vrot.slane %v427_v4, %v10268_v18 }
  0x23   :  { %v1014_v16 = vcombine.low %v1006_v0, %v1013_v5  ;;  %v1066_v17 = vcombine.low %v417_v59, %v418_v6  ;;  %v1067_v19 = vcombine.low %v419_v7, %v434_v8  ;;  %v465_v20 = vcombine.high %v9297_v3, %v9297_v3  ;;  %v9303_v0 = vld.sshfl [vmem:[%s12924_s0 + $0x58] sm:$0x33 pattern:$0x75316420] }
  0x24   :  { %v1055_v23 = vrot.slane %v1047_v10, %v10268_v18  ;;  %v1062_v24 = vrot.slane %v1048_v11, %v10268_v18  ;;  %v1074_v25 = vrot.slane %v1064_v12, %v10268_v18  ;;  %v1081_v26 = vrot.slane %v1065_v14, %v10268_v18 }
  0x25   :  { %9845 = vmatmul.mubr.msk.bf16.gmra.mrb[8].mxu0 %vm1521_vm2, %v965_v55  ;;  %v442_v27 = vcombine.high %v434_v8, %v434_v8  ;;  %v443_v28 = vcombine.high %v441_v15, %v441_v15  ;;  %v457_v29 = vrot.slane %v9296_v13, %v10268_v18  ;;  %v1088_v30 = vrot.slane %v1066_v17, %v10268_v18 }
  0x26   :  { %9848 = vmatprep.mubr.msk.bf16.mxu0 %vm10169_vm1, %v12936_v1  ;;  %v1095_v31 = vrot.slane %v1067_v19, %v10268_v18  ;;  %v472_v32 = vrot.slane %v9297_v3, %v10268_v18  ;;  %v479_v33 = vrot.slane %v465_v20, %v10268_v18  ;;  %v489_v34 = vcombine.high %v9298_v21, %v9298_v21 }
  0x27   :  { %v513_v35 = vcombine.high %v9299_v22, %v9299_v22  ;;  %v1096_v36 = vcombine.low %v1074_v25, %v1081_v26  ;;  %v1113_v37 = vcombine.low %v441_v15, %v442_v27  ;;  %v1114_v38 = vcombine.low %v443_v28, %v457_v29  ;;  %v9305_v15 = vld.sshfl [vmem:[%s12924_s0 + $0x60] sm:$0x33 pattern:$0x75316420] }
  0x28   :  { %v1063_v40 = vcombine.low %v1055_v23, %v1062_v24  ;;  %v1097_v41 = vcombine.low %v1088_v30, %v1095_v31  ;;  %v1115_v42 = vcombine.low %v472_v32, %v479_v33  ;;  %v9319_v43 = vcombine.high %v472_v32, %v479_v33  ;;  %v9304_v23 = vld.sshfl [vmem:[%s12924_s0 + $0x5c] sm:$0x1 pattern:$0x75316420] }
  0x29   :  { %v496_v44 = vrot.slane %v9298_v21, %v10268_v18  ;;  %v503_v45 = vrot.slane %v489_v34, %v10268_v18  ;;  %v520_v46 = vrot.slane %v9299_v22, %v10268_v18  ;;  %v527_v47 = vrot.slane %v513_v35, %v10268_v18  ;;  %v9306_v32 = vld.sshfl [vmem:[%s12924_s0 + $0x64] sm:$0x33 pattern:$0x75316420] }
  0x2a   :  { %v1104_v49 = vrot.slane %v1096_v36, %v10268_v18  ;;  %v1123_v50 = vrot.slane %v1113_v37, %v10268_v18  ;;  %v1130_v51 = vrot.slane %v1114_v38, %v10268_v18  ;;  %v1111_v52 = vrot.slane %v1097_v41, %v10268_v18  ;;  %v9307_v37 = vld.sshfl [vmem:[%s12924_s0 + $0x68] sm:$0x33 pattern:$0x75316420] }
  0x2b   :  { %v1137_v53 = vrot.slane %v1115_v42, %v10268_v18  ;;  %v1144_v54 = vrot.slane %v9319_v43, %v10268_v18  ;;  %v551_v55 = vcombine.high %v9301_v39, %v9301_v39  ;;  %v1162_v56 = vcombine.low %v496_v44, %v503_v45 }
  0x2c   :  { %v9320_v57 = vcombine.high %v496_v44, %v503_v45  ;;  %v1164_v58 = vcombine.low %v520_v46, %v527_v47  ;;  %v9321_v59 = vcombine.high %v520_v46, %v527_v47  ;;  %v558_v61 = vrot.slane %v9301_v39, %v10268_v18 }
  0x2d   :  { %9849 = vmatmul.mubr.msk.bf16.gmra.mrb[12].mxu0 %vm1521_vm2, %v1014_v16  ;;  %v575_v62 = vcombine.high %v9302_v48, %v9302_v48  ;;  %v582_v63 = vrot.slane %v9302_v48, %v10268_v18  ;;  %v1112_v2 = vcombine.low %v1104_v49, %v1111_v52  ;;  %v1145_v3 = vcombine.low %v1123_v50, %v1130_v51  ;;  %v9309_v51 = vld.sshfl [vmem:[%s12924_s0 + $0x70] sm:$0x33 pattern:$0x75316420] }
  0x2e   :  { %9852 = vmatprep.mubr.msk.bf16.mxu0 %vm10169_vm1, %v12936_v1  ;;  %v1146_v4 = vcombine.low %v1137_v53, %v1144_v54  ;;  %v565_v5 = vrot.slane %v551_v55, %v10268_v18  ;;  %v1172_v6 = vrot.slane %v1162_v56, %v10268_v18  ;;  %v1179_v7 = vrot.slane %v9320_v57, %v10268_v18 }
  0x2f   :  { %v1186_v8 = vrot.slane %v1164_v58, %v10268_v18  ;;  %v1193_v10 = vrot.slane %v9321_v59, %v10268_v18  ;;  %v543_v11 = vrot.slane %v9300_v60, %v10268_v18  ;;  %v566_v12 = vcombine.high %v558_v61, %v558_v61 }
  0x30   :  { %v589_v13 = vrot.slane %v575_v62, %v10268_v18  ;;  %v590_v14 = vcombine.high %v582_v63, %v582_v63  ;;  %v1153_v16 = vrot.slane %v1145_v3, %v10268_v18  ;;  %v1160_v17 = vrot.slane %v1146_v4, %v10268_v18 }
  0x31   :  { %v567_v19 = vcombine.high %v565_v5, %v565_v5  ;;  %v599_v20 = vcombine.high %v9303_v0, %v9303_v0  ;;  %v1194_v21 = vcombine.low %v1172_v6, %v1179_v7  ;;  %v1195_v22 = vcombine.low %v1186_v8, %v1193_v10 }
  0x32   :  { %v606_v24 = vrot.slane %v9303_v0, %v10268_v18  ;;  %v1211_v25 = vcombine.low %v543_v11, %v558_v61  ;;  %v1212_v26 = vcombine.low %v565_v5, %v566_v12  ;;  %v1214_v27 = vcombine.low %v589_v13, %v590_v14 }
  0x33   :  { %v1161_v28 = vcombine.low %v1153_v16, %v1160_v17  ;;  %v1213_v29 = vcombine.low %v567_v19, %v582_v63  ;;  %v613_v30 = vrot.slane %v599_v20, %v10268_v18  ;;  %v637_v31 = vcombine.high %v9305_v15, %v9305_v15 }
  0x34   :  { %v1202_v33 = vrot.slane %v1194_v21, %v10268_v18  ;;  %v1209_v34 = vrot.slane %v1195_v22, %v10268_v18  ;;  %v591_v35 = vcombine.high %v589_v13, %v589_v13  ;;  %v614_v36 = vcombine.high %v606_v24, %v606_v24 }
  0x35   :  { %9853 = vmatmul.mubr.msk.bf16.gmra.mrb[16].mxu0 %vm1521_vm2, %v1063_v40  ;;  %v1221_v38 = vrot.slane %v1211_v25, %v10268_v18  ;;  %v1228_v39 = vrot.slane %v1212_v26, %v10268_v18  ;;  %v1242_v40 = vrot.slane %v1214_v27, %v10268_v18  ;;  %v629_v41 = vrot.slane %v9304_v23, %v10268_v18 }
  0x36   :  { %9856 = vmatprep.mubr.msk.bf16.mxu0 %vm10169_vm1, %v12936_v1  ;;  %v1235_v42 = vrot.slane %v1213_v29, %v10268_v18  ;;  %v615_v43 = vcombine.high %v613_v30, %v613_v30  ;;  %v644_v44 = vrot.slane %v9305_v15, %v10268_v18  ;;  %v651_v45 = vrot.slane %v637_v31, %v10268_v18 }
  0x37   :  { %v1260_v46 = vcombine.low %v591_v35, %v606_v24  ;;  %v1261_v47 = vcombine.low %v613_v30, %v614_v36  ;;  %v661_v48 = vcombine.high %v9306_v32, %v9306_v32  ;;  %v1243_v49 = vcombine.low %v1221_v38, %v1228_v39 }
  0x38   :  { %v685_v50 = vcombine.high %v9307_v37, %v9307_v37  ;;  %v1210_v52 = vcombine.low %v1202_v33, %v1209_v34  ;;  %v1244_v53 = vcombine.low %v1235_v42, %v1242_v40  ;;  %v1262_v54 = vcombine.low %v615_v43, %v629_v41 }
  0x39   :  { %v1263_v55 = vcombine.low %v644_v44, %v651_v45  ;;  %v1270_v56 = vrot.slane %v1260_v46, %v10268_v18  ;;  %v1277_v57 = vrot.slane %v1261_v47, %v10268_v18  ;;  %v668_v58 = vrot.slane %v9306_v32, %v10268_v18 }
  0x3a   :  { %v675_v59 = vrot.slane %v661_v48, %v10268_v18  ;;  %v1251_v60 = vrot.slane %v1243_v49, %v10268_v18  ;;  %v692_v61 = vrot.slane %v9307_v37, %v10268_v18  ;;  %v699_v62 = vrot.slane %v685_v50, %v10268_v18 }
  0x3b   :  { %v1258_v63 = vrot.slane %v1244_v53, %v10268_v18  ;;  %v1284_v0 = vrot.slane %v1262_v54, %v10268_v18  ;;  %v723_v3 = vcombine.high %v9309_v51, %v9309_v51  ;;  %v1292_v4 = vcombine.low %v1270_v56, %v1277_v57 }
  0x3c   :  { %v9322_v5 = vcombine.high %v644_v44, %v651_v45  ;;  %v1310_v6 = vcombine.low %v668_v58, %v675_v59 }
  0x3d   :  { %9857 = vmatmul.mubr.msk.bf16.gmra.mrb[20].mxu0 %vm1521_vm2, %v1112_v2  ;;  %v1291_v2 = vrot.slane %v1263_v55, %v10268_v18 }
  0x3e   :  { %9860 = vmatprep.mubr.msk.bf16.mxu0 %vm10169_vm1, %v12936_v1 }
  0x45   :  { %9861 = vmatmul.mubr.msk.bf16.gmra.mrb[24].mxu0 %vm1521_vm2, %v1161_v28 }
  0x46   :  { %9864 = vmatprep.mubr.msk.bf16.mxu0 %vm10169_vm1, %v12936_v1 }
  0x4d   :  { %9865 = vmatmul.mubr.msk.bf16.gmra.mrb[28].mxu0 %vm1521_vm2, %v1210_v52 }
  0x4e   :  { %9868 = vmatprep.mubr.msk.bf16.mxu0 %vm10169_vm1, %v12936_v1 }
  0x4f   :  { %16 = vsyncpa [#allocation3], 0  ;;  %v9323_v7 = vcombine.high %v668_v58, %v675_v59  ;;  %v1312_v8 = vcombine.low %v692_v61, %v699_v62  ;;  %v9308_v10 = vld.sshfl [vmem:[%s12924_s0 + $0x6c] sm:$0x1 pattern:$0x75316420]  ;;  %v730_v11 = vrot.slane %v9309_v51, %v10268_v18  ;;  %v1259_v12 = vcombine.low %v1251_v60, %v1258_v63 }
  0x50   :  { %v1293_v13 = vcombine.low %v1284_v0, %v1291_v2  ;;  %v9310_v14 = vld.sshfl [vmem:[%s12924_s0 + $0x74] sm:$0x33 pattern:$0x75316420]  ;;  %v737_v15 = vrot.slane %v723_v3, %v10268_v18  ;;  %v1300_v17 = vrot.slane %v1292_v4, %v10268_v18  ;;  %v1319_v19 = vrot.slane %v9322_v5, %v10268_v18  ;;  %s10173_s15 = smov 64   ;;  %s10175_s26 = smov [#allocation2]  }
  0x51   :  { %v9311_v16 = vld.sshfl [vmem:[%s12924_s0 + $0x78] sm:$0x33 pattern:$0x75316420]  ;;  %v1326_v20 = vrot.slane %v1310_v6, %v10268_v18  ;;  %v715_v21 = vrot.slane %v9308_v10, %v10268_v18  ;;  %v1333_v22 = vrot.slane %v9323_v7, %v10268_v18  ;;  %v1340_v23 = vrot.slane %v1312_v8, %v10268_v18 }
  0x52   :  { %v738_v24 = vcombine.high %v730_v11, %v730_v11  ;;  %v747_v25 = vcombine.high %v9310_v14, %v9310_v14  ;;  %v1307_v26 = vrot.slane %v1293_v13, %v10268_v18  ;;  %v739_v27 = vcombine.high %v737_v15, %v737_v15  ;;  %v9312_v40 = vld.sshfl [vmem:[%s12924_s0 + $0x7c] sm:$0x1 pattern:$0x75316420] }
  0x53   :  { %v754_v28 = vrot.slane %v9310_v14, %v10268_v18  ;;  %v771_v29 = vcombine.high %v9311_v16, %v9311_v16  ;;  %v1341_v30 = vcombine.low %v1319_v19, %v1326_v20  ;;  %v9324_v31 = vcombine.high %v692_v61, %v699_v62 }
  0x54   :  { %v1359_v32 = vcombine.low %v715_v21, %v730_v11  ;;  %v1342_v33 = vcombine.low %v1333_v22, %v1340_v23  ;;  %v1360_v34 = vcombine.low %v737_v15, %v738_v24  ;;  %v761_v35 = vrot.slane %v747_v25, %v10268_v18  ;;  %v10060_v22 = vld [vmem:[%s12927_s3 + $0x80] sm:$0xff]  }
  0x55   :  { %9869 = vmatmul.mubr.msk.bf16.gmra.mrb[32].mxu0 %vm1521_vm2, %v1259_v12  ;;  %v1308_v36 = vcombine.low %v1300_v17, %v1307_v26  ;;  %v1361_v37 = vcombine.low %v739_v27, %v754_v28  ;;  %v778_v38 = vrot.slane %v9311_v16, %v10268_v18  ;;  %v785_v39 = vrot.slane %v771_v29, %v10268_v18  ;;  %v9280_v12 = vld [vmem:[%s12926_s2] ss:$0 sm:$0xff]  ;;  %s9272_s2 = sshll.u32 %s10175_s26, 4  ;;  %s9273_s2 = int_to_ptr.vmem [resolvable:$true] %s9272_s2 }
  0x56   :  { %9872 = vmatprep.mubr.msk.bf16.mxu0 %vm10169_vm1, %v12936_v1  ;;  %v1349_v41 = vrot.slane %v1341_v30, %v10268_v18  ;;  %v1368_v42 = vrot.slane %v9324_v31, %v10268_v18  ;;  %v1375_v43 = vrot.slane %v1359_v32, %v10268_v18  ;;  %v1356_v44 = vrot.slane %v1342_v33, %v10268_v18  ;;  %p10149_p1 = scmp.lt.s32.totalorder %s9273_s2, %s9273_s2 }
  0x57   :  { %v1382_v45 = vrot.slane %v1360_v34, %v10268_v18  ;;  %v762_v46 = vcombine.high %v754_v28, %v754_v28  ;;  %v763_v47 = vcombine.high %v761_v35, %v761_v35  ;;  %v1389_v48 = vrot.slane %v1361_v37, %v10268_v18 }
  0x58   :  { %v786_v49 = vcombine.high %v778_v38, %v778_v38  ;;  %v787_v50 = vcombine.high %v785_v39, %v785_v39  ;;  %v801_v51 = vrot.slane %v9312_v40, %v10268_v18  ;;  %v1357_v52 = vcombine.low %v1349_v41, %v1356_v44 }
  0x59   :  { %v1390_v53 = vcombine.low %v1368_v42, %v1375_v43  ;;  %v1407_v54 = vcombine.low %v761_v35, %v762_v46  ;;  %v1391_v55 = vcombine.low %v1382_v45, %v1389_v48  ;;  %v1408_v56 = vcombine.low %v763_v47, %v778_v38 }
  0x5a   :  { %v1409_v57 = vcombine.low %v785_v39, %v786_v49  ;;  %v1410_v58 = vcombine.low %v787_v50, %v801_v51  ;;  %v10171_v8 = vmov 1983009808   ;;  %v802_v13 = vcombine.high %v9280_v12, %v9280_v12 }
  0x5b   :  { %v1398_v59 = vrot.slane %v1390_v53, %v10268_v18  ;;  %v1417_v60 = vrot.slane %v1407_v54, %v10268_v18  ;;  %v1405_v61 = vrot.slane %v1391_v55, %v10268_v18  ;;  %v1424_v62 = vrot.slane %v1408_v56, %v10268_v18 }
  0x5c   :  { %v1431_v63 = vrot.slane %v1409_v57, %v10268_v18  ;;  %v1438_v0 = vrot.slane %v1410_v58, %v10268_v18  ;;  %v804_v10 = vunpack.c.l.s4 %v10171_v8  ;;  %v10172_v25 = vmov 0  }
  0x5d   :  { %9873 = vmatmul.mubr.msk.bf16.gmra.mrb[36].mxu0 %vm1521_vm2, %v1308_v36  ;;  %v1406_v2 = vcombine.low %v1398_v59, %v1405_v61  ;;  %v1439_v3 = vcombine.low %v1417_v60, %v1424_v62  ;;  %4787 = vmatprep.subr.bf16.mxu0 %v10172_v25  ;;  %vm2994_vm3 = vsmask.f32 7424  ;;  %vm3302_vm4 = vsmask.f32 5376 }
  0x5e   :  { %9876 = vmatprep.mubr.msk.bf16.mxu0 %vm10169_vm1, %v12936_v1  ;;  %v1440_v4 = vcombine.low %v1431_v63, %v1438_v0  ;;  %v805_v11 = vunpack.c.0.s8 %v804_v10  ;;  %4788 = vmatpush1.bf16.msra.mxu0 %v10060_v22  ;;  %vm3188_vm5 = vsmask.f32 6400  ;;  %vm3391_vm6 = vcmask 1044480  }
  0x5f   :  { %v1447_v5 = vrot.slane %v1439_v3, %v10268_v18  ;;  %4789 = vmatprep.subr.bf16.mxu0 %v10172_v25  ;;  %vm3416_vm7 = vcmask 523264   ;;  %vm3163_vm8 = vcmask 1046528   ;;  %vm9086_vm9 = vcmask 1041409  }
  0x60   :  { %v1454_v6 = vrot.slane %v1440_v4, %v10268_v18  ;;  %v10523_v14 = vsub.s32 %v805_v11, %v10253_v9  ;;  %vm9088_vm10 = vcmask 1042434   ;;  %vm9090_vm11 = vcmask 1043459  }
  0x61   :  { %vm9092_vm12 = vcmask 1044484   ;;  %vm9094_vm13 = vcmask 1045509   ;;  %vm9096_vm14 = vcmask 1046534   ;;  %vm9098_vm15 = vcmask 1047559  }
  0x62   :  { %v1455_v7 = vcombine.low %v1447_v5, %v1454_v6  ;;  %12968 = vst [vmem:[#allocation5_spill] sm:$0xff] %v10523_v14  ;;  %v809_v15 = vrot.slane %v9280_v12, %v10523_v14  ;;  %v816_v16 = vrot.slane %v802_v13, %v10523_v14 }
  0x64   :  { %v817_v17 = vcombine.high %v809_v15, %v809_v15  ;;  %v818_v19 = vcombine.high %v816_v16, %v816_v16  ;;  %v1484_v26 = vcombine.low %v809_v15, %v809_v15 }
  0x65   :  { %9877 = vmatmul.mubr.msk.bf16.gmra.mrb[40].mxu0 %vm1521_vm2, %v1357_v52 }
  0x66   :  { %9880 = vmatprep.mubr.msk.bf16.mxu0 %vm10169_vm1, %v12936_v1  ;;  %v1467_v20 = vcombine.low %v809_v15, %v817_v17  ;;  %v1468_v21 = vcombine.low %v816_v16, %v818_v19  ;;  %v1485_v27 = vcombine.low %v817_v17, %v816_v16  ;;  %v1501_v28 = vcombine.low %v818_v19, %v809_v15 }
  0x67   :  { %v1492_v33 = vrot.slane %v1484_v26, %v10523_v14 }
  0x68   :  { %v1475_v23 = vrot.slane %v1467_v20, %v10523_v14  ;;  %v1482_v24 = vrot.slane %v1468_v21, %v10523_v14  ;;  %v1499_v34 = vrot.slane %v1485_v27, %v10523_v14  ;;  %v1508_v35 = vrot.slane %v1501_v28, %v10523_v14 }
  0x6a   :  { %v10534_v9 = vcombine.low %v1475_v23, %v1482_v24  ;;  %v10544_v44 = vcombine.low %v1492_v33, %v1499_v34  ;;  %v10546_v45 = vcombine.low %v1508_v35, %v1499_v34  ;;  %v10549_v52 = vcombine.low %v1499_v34, %v1508_v35 }
  0x6b   :  { %v10551_v53 = vcombine.low %v1508_v35, %v1475_v23  ;;  %v10553_v54 = vcombine.low %v1482_v24, %v1475_v23  ;;  %v10556_v0 = vcombine.low %v1482_v24, %v1492_v33 }
  0x6d   :  { %9881 = vmatmul.mubr.msk.bf16.gmra.mrb[44].mxu0 %vm1521_vm2, %v1406_v2  ;;  %v10061_v2 = vld [vmem:[%s12927_s3 + $0x88] sm:$0xff]  }
  0x6e   :  { %9884 = vmatprep.mubr.msk.bf16.mxu0 %vm10169_vm1, %v12936_v1  ;;  %4790 = vmatpush1.bf16.msra.mxu0 %v10061_v2 }
  0x6f   :  { %4791 = vmatprep.subr.bf16.mxu0 %v10172_v25 }
  0x75   :  { %9885 = vmatmul.mubr.msk.bf16.gmra.mrb[48].mxu0 %vm1521_vm2, %v1455_v7 }
  0xe8   :  { %v1599_v29 = vpop.f32.mrb[0].mxu0 }
  0xe9   :  { %v1600_v30 = vadd.f32 %v1599_v29, %v10534_v9  ;;  %v9838_v31 = vpop.f32.mrb[1].mxu0 }
  0xea   :  { %v1602_v32 = vpop.f32.mrb[2].mxu0 }
  0xeb   :  { %v1728_v36 = vcombine.high %v1600_v30, %v1600_v30  ;;  %v1735_v37 = vrot.slane %v1600_v30, %v10523_v14  ;;  %v1603_v38 = vadd.f32 %v1602_v32, %v10534_v9  ;;  %v9839_v39 = vpop.f32.mrb[3].mxu0 }
  0xed   :  { %v1742_v40 = vrot.slane %v1728_v36, %v10523_v14  ;;  %v1743_v41 = vcombine.high %v1735_v37, %v1735_v37  ;;  %v1745_v42 = vcombine.high %v1603_v38, %v1603_v38  ;;  %v1752_v43 = vrot.slane %v1603_v38, %v10523_v14 }
  0xee   :  { %v2274_v47 = vmax.f32 %v1735_v37, 0.0 }
  0xef   :  { %v1744_v46 = vcombine.high %v1742_v40, %v1742_v40  ;;  %v2275_v48 = vmax.f32 %v1743_v41, 0.0  ;;  %v1759_v49 = vrot.slane %v1745_v42, %v10523_v14  ;;  %v1760_v50 = vcombine.high %v1752_v43, %v1752_v43 }
  0xf0   :  { %v1607_v51 = vpop.f32.mrb[4].mxu0  ;;  %v2276_v55 = vmax.f32 %v1742_v40, 0.0  ;;  %v2278_v60 = vmax.f32 %v1752_v43, 0.0 }
  0xf1   :  { %v2277_v56 = vmax.f32 %v1744_v46, 0.0  ;;  %v2482_v57 = vcombine.low %v2274_v47, %v2275_v48  ;;  %v1761_v58 = vcombine.high %v1759_v49, %v1759_v49  ;;  %v9842_v59 = vpop.f32.mrb[5].mxu0  ;;  %v2279_v61 = vmax.f32 %v1760_v50, 0.0  ;;  %v10062_v50 = vld [vmem:[%s12927_s3 + $0x90] sm:$0xff]  }
  0xf2   :  { %v1608_v62 = vadd.f32 %v1607_v51, %v10534_v9  ;;  %v1610_v63 = vpop.f32.mrb[6].mxu0  ;;  %v2280_v4 = vmax.f32 %v1759_v49, 0.0  ;;  %4792 = vmatpush1.bf16.msra.mxu0 %v10062_v50 }
  0xf3   :  { %v2483_v3 = vcombine.low %v2276_v55, %v2277_v56  ;;  %v2281_v5 = vmax.f32 %v1761_v58, 0.0  ;;  %v1611_v6 = vadd.f32 %v1610_v63, %v10544_v44  ;;  %v9843_v7 = vpop.f32.mrb[7].mxu0  ;;  %v2490_v8 = vrot.slane %v2482_v57, %v10523_v14  ;;  %4793 = vmatprep.subr.bf16.mxu0 %v10172_v25 }
  0xf4   :  { %v2499_v10 = vcombine.low %v2278_v60, %v2279_v61  ;;  %v1762_v11 = vcombine.high %v1608_v62, %v1608_v62  ;;  %v1769_v12 = vrot.slane %v1608_v62, %v10523_v14  ;;  %v10063_v62 = vld [vmem:[%s12927_s3 + $0x98] sm:$0xff]  }
  0xf5   :  { %v2497_v13 = vrot.slane %v2483_v3, %v10523_v14  ;;  %v2500_v15 = vcombine.low %v2280_v4, %v2281_v5  ;;  %v1779_v16 = vcombine.high %v1611_v6, %v1611_v6  ;;  %v1786_v17 = vrot.slane %v1611_v6, %v10523_v14 }
  0xf6   :  { %v2507_v19 = vrot.slane %v2499_v10, %v10523_v14  ;;  %v1776_v20 = vrot.slane %v1762_v11, %v10523_v14  ;;  %v1777_v21 = vcombine.high %v1769_v12, %v1769_v12  ;;  %v2282_v22 = vmax.f32 %v1769_v12, 0.0  ;;  %4794 = vmatpush1.bf16.msra.mxu0 %v10063_v62 }
  0xf7   :  { %v2498_v23 = vcombine.low %v2490_v8, %v2497_v13  ;;  %v2514_v24 = vrot.slane %v2500_v15, %v10523_v14  ;;  %v1793_v26 = vrot.slane %v1779_v16, %v10523_v14  ;;  %v1794_v27 = vcombine.high %v1786_v17, %v1786_v17  ;;  %4795 = vmatprep.subr.bf16.mxu0 %v10172_v25 }
  0xf8   :  { %v1778_v28 = vcombine.high %v1776_v20, %v1776_v20  ;;  %v2283_v29 = vmax.f32 %v1777_v21, 0.0  ;;  %v2284_v30 = vmax.f32 %v1776_v20, 0.0  ;;  %v2286_v31 = vmax.f32 %v1786_v17, 0.0  ;;  %v1615_v32 = vpop.f32.mrb[8].mxu0 }
  0xf9   :  { %v2515_v33 = vcombine.low %v2507_v19, %v2514_v24  ;;  %v1795_v34 = vcombine.high %v1793_v26, %v1793_v26  ;;  %v2287_v35 = vmax.f32 %v1794_v27, 0.0  ;;  %v2288_v36 = vmax.f32 %v1793_v26, 0.0  ;;  %v9846_v37 = vpop.f32.mrb[9].mxu0 }
  0xfa   :  { %v2285_v38 = vmax.f32 %v1778_v28, 0.0  ;;  %v2516_v39 = vcombine.low %v2282_v22, %v2283_v29  ;;  %v2539_v40 = vrot.slane %v2286_v31, %v10523_v14  ;;  %v1616_v41 = vadd.f32 %v1615_v32, %v10546_v45  ;;  %v1618_v42 = vpop.f32.mrb[10].mxu0 }
  0xfb   :  { %v10573_v43 = vpack.c.bf16 %v2515_v33, %v2498_v23  ;;  %v2289_v46 = vmax.f32 %v1795_v34, 0.0  ;;  %v2540_v47 = vcombine.low %v2287_v35, %v2288_v36  ;;  %v1619_v48 = vadd.f32 %v1618_v42, %v10546_v45  ;;  %v9847_v49 = vpop.f32.mrb[11].mxu0 }
  0xfc   :  { %v2517_v51 = vcombine.low %v2284_v30, %v2285_v38  ;;  %v2524_v55 = vrot.slane %v2516_v39, %v10523_v14  ;;  %v1796_v56 = vcombine.high %v1616_v41, %v1616_v41  ;;  %v1803_v57 = vrot.slane %v1616_v41, %v10523_v14 }
  0xfd   :  { %v2548_v58 = vrot.slane %v2540_v47, %v10523_v14  ;;  %v1813_v59 = vcombine.high %v1619_v48, %v1619_v48  ;;  %v1820_v60 = vrot.slane %v1619_v48, %v10523_v14  ;;  %v10584_v61 = vshrl.u32 %v10573_v43, 16 }
  0xfe   :  { %v2531_v63 = vrot.slane %v2517_v51, %v10523_v14  ;;  %v1810_v2 = vrot.slane %v1796_v56, %v10523_v14  ;;  %v1811_v3 = vcombine.high %v1803_v57, %v1803_v57  ;;  %v2290_v4 = vmax.f32 %v1803_v57, 0.0 }
  0xff   :  { %v1827_v5 = vrot.slane %v1813_v59, %v10523_v14  ;;  %v1828_v6 = vcombine.high %v1820_v60, %v1820_v60  ;;  %v2294_v7 = vmax.f32 %v1820_v60, 0.0  ;;  %v10594_v8 = vshll.u32 %v10573_v43, 16  ;;  %v10064_v60 = vld [vmem:[%s12927_s3 + $0xa0] sm:$0xff]  }
 0x100   :  { %v2532_v10 = vcombine.low %v2524_v55, %v2531_v63  ;;  %v1812_v11 = vcombine.high %v1810_v2, %v1810_v2  ;;  %v2291_v12 = vmax.f32 %v1811_v3, 0.0  ;;  %v2292_v13 = vmax.f32 %v1810_v2, 0.0  ;;  %v1623_v15 = vpop.f32.mrb[12].mxu0  ;;  %4796 = vmatpush1.bf16.msra.mxu0 %v10064_v60 }
 0x101   :  { %v2541_v16 = vcombine.low %v2289_v46, %v2290_v4  ;;  %v1829_v17 = vcombine.high %v1827_v5, %v1827_v5  ;;  %v2295_v19 = vmax.f32 %v1828_v6, 0.0  ;;  %v2296_v20 = vmax.f32 %v1827_v5, 0.0  ;;  %v9850_v21 = vpop.f32.mrb[13].mxu0  ;;  %4797 = vmatprep.subr.bf16.mxu0 %v10172_v25 }
 0x102   :  { %v10596_v22 = vpack.c.bf16 %v2539_v40, %v2532_v10  ;;  %v2293_v23 = vmax.f32 %v1812_v11, 0.0  ;;  %v2557_v24 = vcombine.low %v2291_v12, %v2292_v13  ;;  %v1624_v26 = vadd.f32 %v1623_v15, %v10551_v53  ;;  %v1626_v27 = vpop.f32.mrb[14].mxu0 }
 0x103   :  { %v2555_v28 = vrot.slane %v2541_v16, %v10523_v14  ;;  %v2297_v29 = vmax.f32 %v1829_v17, 0.0  ;;  %v2574_v30 = vcombine.low %v2295_v19, %v2296_v20  ;;  %v1627_v31 = vadd.f32 %v1626_v27, %v10553_v54  ;;  %v9851_v32 = vpop.f32.mrb[15].mxu0 }
 0x104   :  { %v2565_v33 = vrot.slane %v2557_v24, %v10523_v14  ;;  %v2558_v34 = vcombine.low %v2293_v23, %v2294_v7  ;;  %v1830_v35 = vcombine.high %v1624_v26, %v1624_v26  ;;  %v1837_v36 = vrot.slane %v1624_v26, %v10523_v14 }
 0x105   :  { %v2556_v37 = vcombine.low %v2548_v58, %v2555_v28  ;;  %v2582_v38 = vrot.slane %v2574_v30, %v10523_v14  ;;  %v1847_v39 = vcombine.high %v1627_v31, %v1627_v31  ;;  %v1854_v40 = vrot.slane %v1627_v31, %v10523_v14 }
 0x106   :  { %v2572_v41 = vrot.slane %v2558_v34, %v10523_v14  ;;  %v1844_v42 = vrot.slane %v1830_v35, %v10523_v14  ;;  %v1845_v46 = vcombine.high %v1837_v36, %v1837_v36  ;;  %v2298_v47 = vmax.f32 %v1837_v36, 0.0 }
 0x107   :  { %v1861_v48 = vrot.slane %v1847_v39, %v10523_v14  ;;  %v1862_v49 = vcombine.high %v1854_v40, %v1854_v40  ;;  %v2302_v50 = vmax.f32 %v1854_v40, 0.0  ;;  %v3000_v51 = vrot.slane %v10594_v8, 1 }
 0x108   :  { %v2573_v55 = vcombine.low %v2565_v33, %v2572_v41  ;;  %v1846_v56 = vcombine.high %v1844_v42, %v1844_v42  ;;  %v2299_v57 = vmax.f32 %v1845_v46, 0.0  ;;  %v2300_v58 = vmax.f32 %v1844_v42, 0.0  ;;  %v1631_v59 = vpop.f32.mrb[16].mxu0  ;;  %v10065_v42 = vld [vmem:[%s12927_s3 + $0xa8] sm:$0xff]  }
 0x109   :  { %v2575_v62 = vcombine.low %v2297_v29, %v2298_v47  ;;  %v1863_v63 = vcombine.high %v1861_v48, %v1861_v48  ;;  %v2303_v2 = vmax.f32 %v1862_v49, 0.0  ;;  %v2304_v3 = vmax.f32 %v1861_v48, 0.0  ;;  %v9854_v4 = vpop.f32.mrb[17].mxu0  ;;  %4798 = vmatpush1.bf16.msra.mxu0 %v10065_v42 }
 0x10a   :  { %v10613_v5 = vpack.c.bf16 %v2573_v55, %v2556_v37  ;;  %v2301_v6 = vmax.f32 %v1846_v56, 0.0  ;;  %v2597_v7 = vrot.slane %v2299_v57, %v10523_v14  ;;  %v3001_v10 = vor.u32 %v3000_v51, %v10584_v61  ;;  %v1634_v11 = vpop.f32.mrb[18].mxu0  ;;  %v10066_v51 = vld [vmem:[%s12927_s3 + $0x40] sm:$0xff]   ;;  %4799 = vmatprep.subr.bf16.mxu0 %v10172_v25 }
 0x10b   :  { %v2589_v12 = vrot.slane %v2575_v62, %v10523_v14  ;;  %v2305_v13 = vmax.f32 %v1863_v63, 0.0  ;;  %v2599_v15 = vcombine.low %v2302_v50, %v2303_v2  ;;  %v10619_v16 = vshll.u32 %v10596_v22, 16  ;;  %v9855_v17 = vpop.f32.mrb[19].mxu0  ;;  %v10067_v55 = vld [vmem:[%s12927_s3] sm:$0xff]   ;;  %v10068_v62 = vld [vmem:[%s12927_s3 + $0xb0] sm:$0xff]   ;;  %v10069_v63 = vld [vmem:[%s12927_s3 + $0x48] sm:$0xff]   ;;  %9533 = vmatprep.subr.bf16.mxu1 %v10066_v51 }
 0x10c   :  { %v2598_v19 = vcombine.low %v2300_v58, %v2301_v6  ;;  %v1632_v20 = vadd.f32 %v1631_v59, %v10553_v54  ;;  %v3007_v21 = vshrl.u32 %v10596_v22, 16  ;;  %v1635_v23 = vadd.f32 %v1634_v11, %v10556_v0  ;;  %9534 = vmatpush3.bf16.msra.mxu1 %v10067_v55 }
 0x10d   :  { %v2590_v24 = vcombine.low %v2582_v38, %v2589_v12  ;;  %v2613_v26 = vrot.slane %v2599_v15, %v10523_v14  ;;  %v10626_v27 = vcombine.low %v2304_v3, %v2305_v13  ;;  %v3005_v28 = vrot.slane %v10619_v16, 1  ;;  %9535 = vmatprep.subr.bf16.mxu1 %v10069_v63  ;;  %4800 = vmatpush1.bf16.msra.mxu0 %v10068_v62 }
 0x10e   :  { %v2606_v29 = vrot.slane %v2598_v19, %v10523_v14  ;;  %v1864_v30 = vcombine.high %v1632_v20, %v1632_v20  ;;  %v1871_v31 = vrot.slane %v1632_v20, %v10523_v14  ;;  %v3192_v32 = vrot.slane %v3007_v21, 1  ;;  %4801 = vmatprep.subr.bf16.mxu0 %v10172_v25 }
 0x10f   :  { %v10631_v33 = vpack.c.bf16 %v2597_v7, %v2590_v24  ;;  %v2623_v34 = vrot.slane %v10626_v27, %v10523_v14  ;;  %v3006_v35 = vsel %vm2994_vm3, %v3001_v10, %v3005_v28  ;;  %v3193_v36 = vrot.slane %v10619_v16, 2 }
 0x110   :  { %v10637_v37 = vcombine.low %v2606_v29, %v2613_v26  ;;  %3115 = vrot.lane.b32.xlu0 %v3006_v35, %s10173_s15  ;;  %v1878_v38 = vrot.slane %v1864_v30, %v10523_v14  ;;  %v1879_v39 = vcombine.high %v1871_v31, %v1871_v31  ;;  %v2306_v40 = vmax.f32 %v1871_v31, 0.0  ;;  %v1639_v41 = vpop.f32.mrb[20].mxu0 }
 0x111   :  { %v10644_v46 = vor.u32 %v3193_v36, %v3192_v32  ;;  %v1881_v47 = vcombine.high %v1635_v23, %v1635_v23  ;;  %v1888_v48 = vrot.slane %v1635_v23, %v10523_v14  ;;  %v3009_v49 = vor.u32 %v3007_v21, %v3005_v28  ;;  %v9858_v50 = vpop.f32.mrb[21].mxu0  ;;  %v10072_v32 = vld [vmem:[%s12927_s3 + $0x50] sm:$0xff]  }
 0x112   :  { %v1880_v56 = vcombine.high %v1878_v38, %v1878_v38  ;;  %v2307_v57 = vmax.f32 %v1879_v39, 0.0  ;;  %v2308_v58 = vmax.f32 %v1878_v38, 0.0  ;;  %v3303_v59 = vrot.slane %v10584_v61, 2  ;;  %v1642_v60 = vpop.f32.mrb[22].mxu0 }
 0x113   :  { %3247 = vrot.lane.b32.xlu1 %v10644_v46, %s10173_s15  ;;  %v1895_v2 = vrot.slane %v1881_v47, %v10523_v14  ;;  %v1896_v3 = vcombine.high %v1888_v48, %v1888_v48  ;;  %v2310_v4 = vmax.f32 %v1888_v48, 0.0  ;;  %v3304_v6 = vrot.slane %v10594_v8, 3  ;;  %v9859_v7 = vpop.f32.mrb[23].mxu0 }
 0x114   :  { %v2309_v10 = vmax.f32 %v1880_v56, 0.0  ;;  %v2616_v11 = vcombine.low %v2306_v40, %v2307_v57  ;;  %3117 = vrot.lane.b32.xlu0 %v3009_v49, %s10173_s15  ;;  %v3306_v12 = vrot.slane %v3007_v21, 2  ;;  %v3307_v13 = vrot.slane %v10619_v16, 3  ;;  %v10070_v16 = vld [vmem:[%s12927_s3 + $0x8] sm:$0xff]   ;;  %v10071_v21 = vld [vmem:[%s12927_s3 + $0xb8] sm:$0xff]   ;;  %v10073_v57 = vld [vmem:[%s12927_s3 + $0x10] sm:$0xff]  }
 0x115   :  { %v1897_v15 = vcombine.high %v1895_v2, %v1895_v2  ;;  %v2311_v17 = vmax.f32 %v1896_v3, 0.0  ;;  %v2312_v19 = vmax.f32 %v1895_v2, 0.0  ;;  %v3305_v20 = vor.u32 %v3304_v6, %v3303_v59  ;;  %9536 = vmatpush3.bf16.msra.mxu1 %v10070_v16  ;;  %4802 = vmatpush1.bf16.msra.mxu0 %v10071_v21  ;;  %v10078_v16 = vld [vmem:[%s12927_s3 + $0x60] sm:$0xff]  }
 0x116   :  { %v2630_v23 = vrot.slane %v2616_v11, %v10523_v14  ;;  %v2632_v24 = vcombine.low %v2308_v58, %v2309_v10  ;;  %v3308_v26 = vor.u32 %v3307_v13, %v3306_v12  ;;  %v1640_v27 = vadd.f32 %v1639_v41, %v10549_v52  ;;  %v10074_v58 = vld [vmem:[%s12927_s3 + $0xc0] sm:$0xff]   ;;  %9537 = vmatprep.subr.bf16.mxu1 %v10072_v32 }
 0x117   :  { %v2313_v28 = vmax.f32 %v1897_v15, 0.0  ;;  %v2633_v29 = vcombine.low %v2310_v4, %v2311_v17  ;;  %v2655_v30 = vrot.slane %v2312_v19, %v10523_v14  ;;  %v1643_v31 = vadd.f32 %v1642_v60, %v10549_v52  ;;  %4803 = vmatprep.subr.bf16.mxu0 %v10172_v25  ;;  %v10076_v19 = vld [vmem:[%s12927_s3 + $0x18] sm:$0xff]  }
 0x118   :  { %v2631_v35 = vcombine.low %v2623_v34, %v2630_v23  ;;  %v2640_v36 = vrot.slane %v2632_v24, %v10523_v14  ;;  %v3309_v38 = vsel %vm3302_vm4, %v3305_v20, %v3308_v26  ;;  %3361 = vrot.lane.b32.xlu0 %v3308_v26, %s10173_s15  ;;  %v1898_v39 = vcombine.high %v1640_v27, %v1640_v27  ;;  %v1647_v40 = vpop.f32.mrb[24].mxu0  ;;  %v10077_v20 = vld [vmem:[%s12927_s3 + $0xc8] sm:$0xff]  }
 0x119   :  { %v2647_v41 = vrot.slane %v2633_v29, %v10523_v14  ;;  %3359 = vrot.lane.b32.xlu1 %v3309_v38, %s10173_s15  ;;  %v1905_v42 = vrot.slane %v1640_v27, %v10523_v14  ;;  %v1915_v47 = vcombine.high %v1643_v31, %v1643_v31  ;;  %v1922_v48 = vrot.slane %v1643_v31, %v10523_v14  ;;  %v9862_v49 = vpop.f32.mrb[25].mxu0 }
 0x11a   :  { %v10689_v34 = vpack.c.bf16 %v2631_v35, %v10637_v37  ;;  %v1912_v50 = vrot.slane %v1898_v39, %v10523_v14  ;;  %v3189_v51 = vrot.slane %v10584_v61, 1  ;;  %v3190_v55 = vrot.slane %v10594_v8, 2  ;;  %v1650_v56 = vpop.f32.mrb[26].mxu0  ;;  %v10075_v61 = vld [vmem:[%s12927_s3 + $0x58] sm:$0xff]   ;;  %9538 = vmatpush3.bf16.msra.mxu1 %v10073_v57  ;;  %4804 = vmatpush1.bf16.msra.mxu0 %v10074_v58  ;;  %v10079_v49 = vld [vmem:[%s12927_s3 + $0x20] sm:$0xff]  }
 0x11b   :  { %v2648_v59 = vcombine.low %v2640_v36, %v2647_v41  ;;  %v1913_v37 = vcombine.high %v1905_v42, %v1905_v42  ;;  %v2314_v60 = vmax.f32 %v1905_v42, 0.0  ;;  %v1929_v62 = vrot.slane %v1915_v47, %v10523_v14  ;;  %v9863_v63 = vpop.f32.mrb[27].mxu0  ;;  %9539 = vmatprep.subr.bf16.mxu1 %v10075_v61  ;;  %4805 = vmatprep.subr.bf16.mxu0 %v10172_v25 }
 0x11c   :  { %v1914_v8 = vcombine.high %v1912_v50, %v1912_v50  ;;  %v2316_v2 = vmax.f32 %v1912_v50, 0.0  ;;  %v1930_v3 = vcombine.high %v1922_v48, %v1922_v48  ;;  %v2318_v4 = vmax.f32 %v1922_v48, 0.0 }
 0x11d   :  { %v10705_v6 = vpack.c.bf16 %v2655_v30, %v2648_v59  ;;  %v2315_v7 = vmax.f32 %v1913_v37, 0.0  ;;  %v2656_v10 = vcombine.low %v2313_v28, %v2314_v60  ;;  %v1931_v11 = vcombine.high %v1929_v62, %v1929_v62  ;;  %v10080_v60 = vld [vmem:[%s12927_s3 + $0xd0] sm:$0xff]  }
 0x11e   :  { %v2317_v12 = vmax.f32 %v1914_v8, 0.0  ;;  %v2319_v13 = vmax.f32 %v1930_v3, 0.0  ;;  %v2320_v15 = vmax.f32 %v1929_v62, 0.0  ;;  %v3191_v17 = vor.u32 %v3190_v55, %v3189_v51  ;;  %9540 = vmatpush3.bf16.msra.mxu1 %v10076_v19  ;;  %4806 = vmatpush1.bf16.msra.mxu0 %v10077_v20  ;;  %v10081_v62 = vld [vmem:[%s12927_s3 + $0x68] sm:$0xff]   ;;  %v10084_v19 = vld [vmem:[%s12927_s3 + $0x70] sm:$0xff]  }
 0x11f   :  { %v2657_v23 = vcombine.low %v2315_v7, %v2316_v2  ;;  %v2664_v24 = vrot.slane %v2656_v10, %v10523_v14  ;;  %v2321_v26 = vmax.f32 %v1931_v11, 0.0  ;;  %v10715_v27 = vshrl.u32 %v10613_v5, 16  ;;  %9541 = vmatprep.subr.bf16.mxu1 %v10078_v16  ;;  %4807 = vmatprep.subr.bf16.mxu0 %v10172_v25  ;;  %v10082_v11 = vld [vmem:[%s12927_s3 + $0x28] sm:$0xff]  }
 0x120   :  { %v2673_v21 = vcombine.low %v2317_v12, %v2318_v4  ;;  %v2674_v28 = vcombine.low %v2319_v13, %v2320_v15  ;;  %v3195_v29 = vsel %vm3188_vm5, %v3191_v17, %v10644_v46  ;;  %v10724_v30 = vshll.u32 %v10613_v5, 16  ;;  %v10726_v31 = vpop.f32.mrb[28].mxu0 }
 0x121   :  { %v2671_v32 = vrot.slane %v2657_v23, %v10523_v14  ;;  %3245 = vrot.lane.b32.xlu0 %v3195_v29, %s10173_s15  ;;  %v10731_v35 = vshll.u32 %v10631_v33, 16  ;;  %v10734_v36 = vshrl.u32 %v10631_v33, 16  ;;  %v1648_v38 = vadd.f32 %v1647_v40, %v10549_v52  ;;  %v9866_v39 = vpop.f32.mrb[29].mxu0 }
 0x122   :  { %v2681_v46 = vrot.slane %v2673_v21, %v10523_v14  ;;  %v2688_v41 = vrot.slane %v2674_v28, %v10523_v14  ;;  %v3015_v42 = vrot.slane %v10724_v30, 1  ;;  %v1651_v47 = vadd.f32 %v1650_v56, %v10534_v9  ;;  %v10741_v48 = vpop.f32.mrb[30].mxu0  ;;  %9542 = vmatpush3.bf16.msra.mxu1 %v10079_v49  ;;  %4808 = vmatpush1.bf16.msra.mxu0 %v10080_v60  ;;  %v10083_v28 = vld [vmem:[%s12927_s3 + $0xd8] sm:$0xff]  }
 0x123   :  { %v2672_v50 = vcombine.low %v2664_v24, %v2671_v32  ;;  %v3020_v40 = vrot.slane %v10731_v35, 1  ;;  %v3199_v51 = vrot.slane %v10734_v36, 1  ;;  %v3200_v55 = vrot.slane %v10731_v35, 2  ;;  %v9867_v57 = vpop.f32.mrb[31].mxu0  ;;  %9543 = vmatprep.subr.bf16.mxu1 %v10081_v62  ;;  %4809 = vmatprep.subr.bf16.mxu0 %v10172_v25 }
 0x124   :  { %v2689_v56 = vcombine.low %v2681_v46, %v2688_v41  ;;  %v3016_v58 = vor.u32 %v3015_v42, %v10715_v27  ;;  %v1932_v59 = vcombine.high %v1648_v38, %v1648_v38  ;;  %v1939_v37 = vrot.slane %v1648_v38, %v10523_v14 }
 0x125   :  { %v10758_v63 = vor.u32 %v3200_v55, %v3199_v51  ;;  %v3024_v61 = vor.u32 %v10734_v36, %v3020_v40  ;;  %v1949_v8 = vcombine.high %v1651_v47, %v1651_v47  ;;  %v1956_v2 = vrot.slane %v1651_v47, %v10523_v14 }
 0x126   :  { %v10762_v3 = vpack.c.bf16 %v2689_v56, %v2672_v50  ;;  %v3021_v4 = vsel %vm2994_vm3, %v3016_v58, %v3020_v40  ;;  %v1946_v7 = vrot.slane %v1932_v59, %v10523_v14  ;;  %v1947_v10 = vcombine.high %v1939_v37, %v1939_v37  ;;  %9544 = vmatpush3.bf16.msra.mxu1 %v10082_v11  ;;  %v10085_v40 = vld [vmem:[%s12927_s3 + $0x30] sm:$0xff]  }
 0x127   :  { %3119 = vrot.lane.b32.xlu1 %v3021_v4, %s10173_s15  ;;  %3251 = vrot.lane.b32.xlu0 %v10758_v63, %s10173_s15  ;;  %v2322_v12 = vmax.f32 %v1939_v37, 0.0  ;;  %v1963_v13 = vrot.slane %v1949_v8, %v10523_v14  ;;  %v1964_v15 = vcombine.high %v1956_v2, %v1956_v2  ;;  %v2326_v17 = vmax.f32 %v1956_v2, 0.0 }
 0x128   :  { %v1948_v20 = vcombine.high %v1946_v7, %v1946_v7  ;;  %v2323_v23 = vmax.f32 %v1947_v10, 0.0  ;;  %v2324_v24 = vmax.f32 %v1946_v7, 0.0  ;;  %v3310_v16 = vrot.slane %v10715_v27, 2  ;;  %v10777_v21 = vpop.f32.mrb[32].mxu0  ;;  %9545 = vmatprep.subr.bf16.mxu1 %v10084_v19  ;;  %4810 = vmatpush1.bf16.msra.mxu0 %v10083_v28 }
 0x129   :  { %v2690_v29 = vcombine.low %v2321_v26, %v2322_v12  ;;  %v1965_v32 = vcombine.high %v1963_v13, %v1963_v13  ;;  %v2327_v38 = vmax.f32 %v1964_v15, 0.0  ;;  %v2328_v39 = vmax.f32 %v1963_v13, 0.0  ;;  %v9870_v46 = vpop.f32.mrb[33].mxu0 }
 0x12a   :  { %v2325_v41 = vmax.f32 %v1948_v20, 0.0  ;;  %v2691_v42 = vcombine.low %v2323_v23, %v2324_v24  ;;  %v3311_v47 = vrot.slane %v10724_v30, 3  ;;  %v3313_v49 = vrot.slane %v10734_v36, 2  ;;  %v10785_v50 = vpop.f32.mrb[34].mxu0  ;;  %v10086_v36 = vld [vmem:[%s12927_s3 + $0x78] sm:$0xff]   ;;  %9546 = vmatpush3.bf16.msra.mxu1 %v10085_v40 }
 0x12b   :  { %3121 = vrot.lane.b32.xlu1 %v3024_v61, %s10173_s15  ;;  %v2698_v26 = vrot.slane %v2690_v29, %v10523_v14  ;;  %v2329_v51 = vmax.f32 %v1965_v32, 0.0  ;;  %v2714_v55 = vcombine.low %v2326_v17, %v2327_v38  ;;  %v3314_v25 = vrot.slane %v10731_v35, 3  ;;  %v9871_v57 = vpop.f32.mrb[35].mxu0  ;;  %9547 = vmatprep.subr.bf16.mxu1 %v10086_v36 }
 0x12c   :  { %v2705_v56 = vrot.slane %v2691_v42, %v10523_v14  ;;  %v2713_v58 = vrot.slane %v2325_v41, %v10523_v14  ;;  %v3312_v59 = vor.u32 %v3311_v47, %v3310_v16  ;;  %v3196_v37 = vrot.slane %v10715_v27, 1  ;;  %v10087_v27 = vld [vmem:[%s12927_s3 + $0x38] sm:$0xff]  }
 0x12d   :  { %v2715_v60 = vcombine.low %v2328_v39, %v2329_v51  ;;  %v2722_v62 = vrot.slane %v2714_v55, %v10523_v14  ;;  %v3315_v61 = vor.u32 %v3314_v25, %v3313_v49  ;;  %v3197_v35 = vrot.slane %v10724_v30, 2 }
 0x12e   :  { %v2706_v8 = vcombine.low %v2698_v26, %v2705_v56  ;;  %v1656_v2 = vadd.f32 %v10726_v31, %v10534_v9  ;;  %v3026_v4 = vshrl.u32 %v10689_v34, 16  ;;  %v3028_v7 = vshll.u32 %v10689_v34, 16  ;;  %9548 = vmatpush3.bf16.msra.mxu1 %v10087_v27 }
 0x12f   :  { %v2729_v10 = vrot.slane %v2715_v60, %v10523_v14  ;;  %v3316_v11 = vsel %vm3302_vm4, %v3312_v59, %v3315_v61  ;;  %3365 = vrot.lane.b32.xlu1 %v3315_v61, %s10173_s15  ;;  %v3198_v30 = vor.u32 %v3197_v35, %v3196_v37  ;;  %v10812_v12 = vshll.u32 %v10705_v6, 16 }
 0x130   :  { %v10814_v31 = vpack.c.bf16 %v2713_v58, %v2706_v8  ;;  %3363 = vrot.lane.b32.xlu0 %v3316_v11, %s10173_s15  ;;  %v1966_v13 = vcombine.high %v1656_v2, %v1656_v2  ;;  %v1973_v15 = vrot.slane %v1656_v2, %v10523_v14  ;;  %v3037_v17 = vshrl.u32 %v10705_v6, 16  ;;  %v10819_v19 = vpop.f32.mrb[36].mxu0 }
 0x131   :  { %v10821_v20 = vcombine.low %v2722_v62, %v2729_v10  ;;  %v3202_v23 = vsel %vm3188_vm5, %v3198_v30, %v10758_v63  ;;  %v3203_v24 = vrot.slane %v3026_v4, 1  ;;  %v3204_v16 = vrot.slane %v3028_v7, 2  ;;  %v9874_v28 = vpop.f32.mrb[37].mxu0 }
 0x132   :  { %v1980_v29 = vrot.slane %v1966_v13, %v10523_v14  ;;  %v1981_v32 = vcombine.high %v1973_v15, %v1973_v15  ;;  %v2330_v38 = vmax.f32 %v1973_v15, 0.0  ;;  %v3206_v39 = vrot.slane %v3037_v17, 1  ;;  %v10826_v46 = vpop.f32.mrb[38].mxu0 }
 0x133   :  { %3249 = vrot.lane.b32.xlu1 %v3202_v23, %s10173_s15  ;;  %v3205_v41 = vor.u32 %v3204_v16, %v3203_v24  ;;  %v3207_v42 = vrot.slane %v10812_v12, 2  ;;  %v1659_v47 = vadd.f32 %v10741_v48, %v10534_v9  ;;  %v3030_v63 = vrot.slane %v3028_v7, 1  ;;  %v9875_v49 = vpop.f32.mrb[39].mxu0 }
 0x134   :  { %v1982_v40 = vcombine.high %v1980_v29, %v1980_v29  ;;  %v2331_v26 = vmax.f32 %v1981_v32, 0.0  ;;  %v2332_v51 = vmax.f32 %v1980_v29, 0.0  ;;  %v3035_v55 = vrot.slane %v10812_v12, 1 }
 0x135   :  { %v3208_v25 = vor.u32 %v3207_v42, %v3206_v39  ;;  %v1983_v57 = vcombine.high %v1659_v47, %v1659_v47  ;;  %v1990_v36 = vrot.slane %v1659_v47, %v10523_v14  ;;  %v3031_v56 = vor.u32 %v3030_v63, %v3026_v4 }
 0x136   :  { %v2333_v58 = vmax.f32 %v1982_v40, 0.0  ;;  %v2731_v59 = vcombine.low %v2330_v38, %v2331_v26  ;;  %v3317_v37 = vrot.slane %v3026_v4, 2  ;;  %v3318_v60 = vrot.slane %v3028_v7, 3 }
 0x137   :  { %v3209_v62 = vsel %vm3188_vm5, %v3205_v41, %v3208_v25  ;;  %v1997_v9 = vrot.slane %v1983_v57, %v10523_v14  ;;  %v1998_v48 = vcombine.high %v1990_v36, %v1990_v36  ;;  %v2334_v61 = vmax.f32 %v1990_v36, 0.0 }
 0x138   :  { %v2732_v35 = vcombine.low %v2332_v51, %v2333_v58  ;;  %v2739_v8 = vrot.slane %v2731_v59, %v10523_v14  ;;  %3253 = vrot.lane.b32.xlu0 %v3209_v62, %s10173_s15  ;;  %v3036_v2 = vsel %vm2994_vm3, %v3031_v56, %v3035_v55  ;;  %v3319_v27 = vor.u32 %v3318_v60, %v3317_v37  ;;  %v10839_v10 = vpop.f32.mrb[40].mxu0 }
 0x139   :  { %v1999_v11 = vcombine.high %v1997_v9, %v1997_v9  ;;  %v2335_v30 = vmax.f32 %v1998_v48, 0.0  ;;  %v2336_v4 = vmax.f32 %v1997_v9, 0.0  ;;  %3123 = vrot.lane.b32.xlu1 %v3036_v2, %s10173_s15  ;;  %v3320_v7 = vrot.slane %v3037_v17, 2  ;;  %v9878_v13 = vpop.f32.mrb[41].mxu0 }
 0x13a   :  { %v2746_v15 = vrot.slane %v2732_v35, %v10523_v14  ;;  %v3321_v23 = vrot.slane %v10812_v12, 3  ;;  %v3039_v24 = vor.u32 %v3037_v17, %v3035_v55  ;;  %v1664_v16 = vadd.f32 %v10777_v21, %v10544_v44  ;;  %v10846_v28 = vpop.f32.mrb[42].mxu0 }
 0x13b   :  { %v2337_v29 = vmax.f32 %v1999_v11, 0.0  ;;  %v2748_v32 = vcombine.low %v2334_v61, %v2335_v30  ;;  %v1667_v38 = vadd.f32 %v10785_v50, %v10546_v45  ;;  %v10851_v39 = vshrl.u32 %v10762_v3, 16  ;;  %v9879_v41 = vpop.f32.mrb[43].mxu0 }
 0x13c   :  { %v2747_v42 = vcombine.low %v2739_v8, %v2746_v15  ;;  %v3322_v47 = vor.u32 %v3321_v23, %v3320_v7  ;;  %v2000_v63 = vcombine.high %v1664_v16, %v1664_v16  ;;  %v2007_v12 = vrot.slane %v1664_v16, %v10523_v14 }
 0x13d   :  { %v2749_v17 = vcombine.low %v2336_v4, %v2337_v29  ;;  %v2756_v49 = vrot.slane %v2748_v32, %v10523_v14  ;;  %3125 = vrot.lane.b32.xlu1 %v3039_v24, %s10173_s15  ;;  %v2017_v44 = vcombine.high %v1667_v38, %v1667_v38  ;;  %v2024_v21 = vrot.slane %v1667_v38, %v10523_v14 }
 0x13e   :  { %v10858_v40 = vpack.c.bf16 %v2747_v42, %v10821_v20  ;;  %v3323_v50 = vsel %vm3302_vm4, %v3319_v27, %v3322_v47  ;;  %v2014_v26 = vrot.slane %v2000_v63, %v10523_v14  ;;  %v2015_v51 = vcombine.high %v2007_v12, %v2007_v12 }
 0x13f   :  { %v2763_v55 = vrot.slane %v2749_v17, %v10523_v14  ;;  %3367 = vrot.lane.b32.xlu0 %v3323_v50, %s10173_s15  ;;  %v2338_v57 = vmax.f32 %v2007_v12, 0.0  ;;  %v2031_v36 = vrot.slane %v2017_v44, %v10523_v14  ;;  %v2032_v56 = vcombine.high %v2024_v21, %v2024_v21 }
 0x140   :  { %v2016_v58 = vcombine.high %v2014_v26, %v2014_v26  ;;  %v2339_v59 = vmax.f32 %v2015_v51, 0.0  ;;  %v2340_v37 = vmax.f32 %v2014_v26, 0.0  ;;  %v2342_v60 = vmax.f32 %v2024_v21, 0.0  ;;  %v10865_v62 = vpop.f32.mrb[44].mxu0 }
 0x141   :  { %v2764_v20 = vcombine.low %v2756_v49, %v2763_v55  ;;  %v2771_v9 = vrot.slane %v2338_v57, %v10523_v14  ;;  %v2033_v48 = vcombine.high %v2031_v36, %v2031_v36  ;;  %v2343_v61 = vmax.f32 %v2032_v56, 0.0  ;;  %3255 = vrot.lane.b32.xlu1 %v3208_v25, %s10173_s15  ;;  %v9882_v35 = vpop.f32.mrb[45].mxu0 }
 0x142   :  { %v2341_v8 = vmax.f32 %v2016_v58, 0.0  ;;  %v2772_v2 = vcombine.low %v2339_v59, %v2340_v37  ;;  %v2344_v27 = vmax.f32 %v2031_v36, 0.0  ;;  %v10870_v11 = vshll.u32 %v10762_v3, 16  ;;  %v10872_v30 = vpop.f32.mrb[46].mxu0 }
 0x143   :  { %v10874_v4 = vpack.c.bf16 %v2771_v9, %v2764_v20  ;;  %v2345_v7 = vmax.f32 %v2033_v48, 0.0  ;;  %v3048_v13 = vshll.u32 %v10814_v31, 16  ;;  %v1672_v15 = vadd.f32 %v10819_v19, %v10546_v45  ;;  %v9883_v23 = vpop.f32.mrb[47].mxu0 }
 0x144   :  { %v2780_v25 = vrot.slane %v2772_v2, %v10523_v14  ;;  %v2773_v24 = vcombine.low %v2341_v8, %v2342_v60  ;;  %v2789_v16 = vcombine.low %v2343_v61, %v2344_v27  ;;  %v3045_v29 = vrot.slane %v10870_v11, 1 }
 0x145   :  { %v3050_v32 = vrot.slane %v3048_v13, 1  ;;  %3369 = vrot.lane.b32.xlu1 %v3322_v47, %s10173_s15  ;;  %v2034_v38 = vcombine.high %v1672_v15, %v1672_v15  ;;  %v2041_v41 = vrot.slane %v1672_v15, %v10523_v14  ;;  %v3052_v42 = vshrl.u32 %v10814_v31, 16 }
 0x146   :  { %v2787_v63 = vrot.slane %v2773_v24, %v10523_v14  ;;  %v2797_v12 = vrot.slane %v2789_v16, %v10523_v14  ;;  %v3046_v45 = vor.u32 %v3045_v29, %v10851_v39  ;;  %v3214_v19 = vrot.slane %v3048_v13, 2 }
 0x147   :  { %v2048_v17 = vrot.slane %v2034_v38, %v10523_v14  ;;  %v2049_v49 = vcombine.high %v2041_v41, %v2041_v41  ;;  %v2346_v44 = vmax.f32 %v2041_v41, 0.0  ;;  %v3213_v21 = vrot.slane %v3052_v42, 1 }
 0x148   :  { %v2788_v50 = vcombine.low %v2780_v25, %v2787_v63  ;;  %v3051_v47 = vsel %vm2994_vm3, %v3046_v45, %v3050_v32  ;;  %v1675_v26 = vadd.f32 %v10826_v46, %v10551_v53  ;;  %v3054_v51 = vor.u32 %v3052_v42, %v3050_v32  ;;  %v10891_v55 = vpop.f32.mrb[48].mxu0 }
 0x149   :  { %3127 = vrot.lane.b32.xlu0 %v3051_v47, %s10173_s15  ;;  %v2050_v57 = vcombine.high %v2048_v17, %v2048_v17  ;;  %v2347_v36 = vmax.f32 %v2049_v49, 0.0  ;;  %v2348_v56 = vmax.f32 %v2048_v17, 0.0  ;;  %v2790_v58 = vcombine.low %v2345_v7, %v2346_v44  ;;  %v9886_v59 = vpop.f32.mrb[49].mxu0 }
 0x14a   :  { %v3215_v37 = vor.u32 %v3214_v19, %v3213_v21  ;;  %v2051_v60 = vcombine.high %v1675_v26, %v1675_v26  ;;  %v2058_v20 = vrot.slane %v1675_v26, %v10523_v14  ;;  %3129 = vrot.lane.b32.xlu1 %v3054_v51, %s10173_s15  ;;  %v3210_v9 = vrot.slane %v10851_v39, 1  ;;  %v10897_v48 = vpop.f32.mrb[50].mxu0 }
 0x14b   :  { %v2349_v53 = vmax.f32 %v2050_v57, 0.0  ;;  %v2804_v46 = vrot.slane %v2790_v58, %v10523_v14  ;;  %v2806_v61 = vcombine.low %v2347_v36, %v2348_v56  ;;  %v3211_v35 = vrot.slane %v10870_v11, 2  ;;  %v9887_v8 = vpop.f32.mrb[51].mxu0 }
 0x14c   :  { %v2065_v2 = vrot.slane %v2051_v60, %v10523_v14  ;;  %v2066_v27 = vcombine.high %v2058_v20, %v2058_v20  ;;  %v2350_v7 = vmax.f32 %v2058_v20, 0.0  ;;  %v3327_v15 = vrot.slane %v3052_v42, 2 }
 0x14d   :  { %v2805_v23 = vcombine.low %v2797_v12, %v2804_v46  ;;  %v2814_v25 = vrot.slane %v2806_v61, %v10523_v14  ;;  %3259 = vrot.lane.b32.xlu0 %v3215_v37, %s10173_s15  ;;  %v3212_v24 = vor.u32 %v3211_v35, %v3210_v9  ;;  %v3328_v16 = vrot.slane %v3048_v13, 3 }
 0x14e   :  { %v2067_v29 = vcombine.high %v2065_v2, %v2065_v2  ;;  %v2351_v32 = vmax.f32 %v2066_v27, 0.0  ;;  %v2352_v38 = vmax.f32 %v2065_v2, 0.0  ;;  %v2807_v41 = vcombine.low %v2349_v53, %v2350_v7 }
 0x14f   :  { %v10904_v63 = vpack.c.bf16 %v2805_v23, %v2788_v50  ;;  %v3216_v45 = vsel %vm3188_vm5, %v3212_v24, %v3215_v37  ;;  %v3329_v19 = vor.u32 %v3328_v16, %v3327_v15  ;;  %v1680_v17 = vadd.f32 %v10839_v10, %v10553_v54 }
 0x150   :  { %v2353_v42 = vmax.f32 %v2067_v29, 0.0  ;;  %v2821_v12 = vrot.slane %v2807_v41, %v10523_v14  ;;  %v2829_v49 = vrot.slane %v2351_v32, %v10523_v14  ;;  %v3324_v44 = vrot.slane %v10851_v39, 2 }
 0x151   :  { %3257 = vrot.lane.b32.xlu0 %v3216_v45, %s10173_s15  ;;  %3373 = vrot.lane.b32.xlu1 %v3329_v19, %s10173_s15  ;;  %v2068_v13 = vcombine.high %v1680_v17, %v1680_v17  ;;  %v2075_v21 = vrot.slane %v1680_v17, %v10523_v14  ;;  %v3325_v50 = vrot.slane %v10870_v11, 3  ;;  %v1683_v47 = vadd.f32 %v10846_v28, %v10553_v54 }
 0x152   :  { %v2822_v10 = vcombine.low %v2814_v25, %v2821_v12  ;;  %v2830_v26 = vcombine.low %v2352_v38, %v2353_v42  ;;  %v10919_v51 = vshll.u32 %v10874_v4, 16  ;;  %v10922_v57 = vshrl.u32 %v10874_v4, 16 }
 0x153   :  { %v2082_v39 = vrot.slane %v2068_v13, %v10523_v14  ;;  %v2083_v36 = vcombine.high %v2075_v21, %v2075_v21  ;;  %v2354_v56 = vmax.f32 %v2075_v21, 0.0  ;;  %v3326_v58 = vor.u32 %v3325_v50, %v3324_v44 }
 0x154   :  { %v2838_v59 = vrot.slane %v2830_v26, %v10523_v14  ;;  %v10926_v37 = vpack.c.bf16 %v2829_v49, %v2822_v10  ;;  %v2085_v11 = vcombine.high %v1683_v47, %v1683_v47  ;;  %v2092_v54 = vrot.slane %v1683_v47, %v10523_v14 }
 0x155   :  { %v2084_v28 = vcombine.high %v2082_v39, %v2082_v39  ;;  %v2355_v60 = vmax.f32 %v2083_v36, 0.0  ;;  %v2356_v20 = vmax.f32 %v2082_v39, 0.0  ;;  %v3330_v9 = vsel %vm3302_vm4, %v3326_v58, %v3329_v19 }
 0x156   :  { %3371 = vrot.lane.b32.xlu0 %v3330_v9, %s10173_s15  ;;  %v2099_v53 = vrot.slane %v2085_v11, %v10523_v14  ;;  %v2100_v46 = vcombine.high %v2092_v54, %v2092_v54  ;;  %v2358_v61 = vmax.f32 %v2092_v54, 0.0  ;;  %v3220_v35 = vrot.slane %v10922_v57, 1 }
 0x157   :  { %v2357_v8 = vmax.f32 %v2084_v28, 0.0  ;;  %v2831_v2 = vcombine.low %v2354_v56, %v2355_v60  ;;  %v3221_v27 = vrot.slane %v10919_v51, 2  ;;  %v3056_v7 = vshrl.u32 %v10858_v40, 16 }
 0x158   :  { %v2101_v15 = vcombine.high %v2099_v53, %v2099_v53  ;;  %v2359_v23 = vmax.f32 %v2100_v46, 0.0  ;;  %v2360_v25 = vmax.f32 %v2099_v53, 0.0  ;;  %v3058_v24 = vshll.u32 %v10858_v40, 16 }
 0x159   :  { %v2845_v16 = vrot.slane %v2831_v2, %v10523_v14  ;;  %v2847_v29 = vcombine.low %v2356_v20, %v2357_v8  ;;  %v3222_v32 = vor.u32 %v3221_v27, %v3220_v35  ;;  %v3065_v38 = vrot.slane %v10919_v51, 1 }
 0x15a   :  { %v2361_v41 = vmax.f32 %v2101_v15, 0.0  ;;  %v2848_v45 = vcombine.low %v2358_v61, %v2359_v23  ;;  %v3060_v19 = vrot.slane %v3058_v24, 1  ;;  %v3217_v17 = vrot.slane %v3056_v7, 1 }
 0x15b   :  { %v2846_v42 = vcombine.low %v2838_v59, %v2845_v16  ;;  %v2855_v12 = vrot.slane %v2847_v29, %v10523_v14  ;;  %3263 = vrot.lane.b32.xlu1 %v3222_v32, %s10173_s15  ;;  %v3218_v49 = vrot.slane %v3058_v24, 2  ;;  %v1688_v44 = vadd.f32 %v10865_v62, %v10556_v0 }
 0x15c   :  { %v2862_v13 = vrot.slane %v2848_v45, %v10523_v14  ;;  %v2864_v21 = vcombine.low %v2360_v25, %v2361_v41  ;;  %v3061_v50 = vor.u32 %v3060_v19, %v3056_v7  ;;  %v3069_v47 = vor.u32 %v10922_v57, %v3065_v38 }
 0x15d   :  { %v3219_v10 = vor.u32 %v3218_v49, %v3217_v17  ;;  %v2102_v26 = vcombine.high %v1688_v44, %v1688_v44  ;;  %v2109_v39 = vrot.slane %v1688_v44, %v10523_v14  ;;  %v1691_v36 = vadd.f32 %v10872_v30, %v10549_v52 }
 0x15e   :  { %v2863_v56 = vcombine.low %v2855_v12, %v2862_v13  ;;  %v2872_v58 = vrot.slane %v2864_v21, %v10523_v14  ;;  %v3066_v59 = vsel %vm2994_vm3, %v3061_v50, %v3065_v38  ;;  %v3331_v11 = vrot.slane %v3056_v7, 2 }
 0x15f   :  { %3131 = vrot.lane.b32.xlu0 %v3066_v59, %s10173_s15  ;;  %v3223_v0 = vsel %vm3188_vm5, %v3219_v10, %v3222_v32  ;;  %v2116_v62 = vrot.slane %v2102_v26, %v10523_v14  ;;  %v2117_v54 = vcombine.high %v2109_v39, %v2109_v39  ;;  %v2362_v28 = vmax.f32 %v2109_v39, 0.0 }
 0x160   :  { %v10952_v60 = vpack.c.bf16 %v2863_v56, %v2846_v42  ;;  %3261 = vrot.lane.b32.xlu1 %v3223_v0, %s10173_s15  ;;  %v2119_v20 = vcombine.high %v1691_v36, %v1691_v36  ;;  %v2126_v30 = vrot.slane %v1691_v36, %v10523_v14  ;;  %v3332_v9 = vrot.slane %v3058_v24, 3 }
 0x161   :  { %v2118_v53 = vcombine.high %v2116_v62, %v2116_v62  ;;  %v2363_v46 = vmax.f32 %v2117_v54, 0.0  ;;  %v2364_v61 = vmax.f32 %v2116_v62, 0.0  ;;  %v3334_v35 = vrot.slane %v10922_v57, 2 }
 0x162   :  { %v2133_v8 = vrot.slane %v2119_v20, %v10523_v14  ;;  %v2134_v2 = vcombine.high %v2126_v30, %v2126_v30  ;;  %v2366_v27 = vmax.f32 %v2126_v30, 0.0  ;;  %v3333_v7 = vor.u32 %v3332_v9, %v3331_v11 }
 0x163   :  { %v2365_v15 = vmax.f32 %v2118_v53, 0.0  ;;  %v2865_v23 = vcombine.low %v2362_v28, %v2363_v46  ;;  %v2887_v25 = vrot.slane %v2364_v61, %v10523_v14  ;;  %3133 = vrot.lane.b32.xlu0 %v3069_v47, %s10173_s15  ;;  %v3335_v16 = vrot.slane %v10919_v51, 3 }
 0x164   :  { %v2135_v29 = vcombine.high %v2133_v8, %v2133_v8  ;;  %v2367_v24 = vmax.f32 %v2134_v2, 0.0  ;;  %v2368_v32 = vmax.f32 %v2133_v8, 0.0  ;;  %v1696_v38 = vadd.f32 %v10891_v55, %v10549_v52 }
 0x165   :  { %v2879_v57 = vrot.slane %v2865_v23, %v10523_v14  ;;  %v2888_v41 = vcombine.low %v2365_v15, %v2366_v27  ;;  %v3336_v45 = vor.u32 %v3335_v16, %v3334_v35  ;;  %v3071_v19 = vshrl.u32 %v10904_v63, 16 }
 0x166   :  { %v2369_v17 = vmax.f32 %v2135_v29, 0.0  ;;  %v2889_v42 = vcombine.low %v2367_v24, %v2368_v32  ;;  %v2136_v12 = vcombine.high %v1696_v38, %v1696_v38  ;;  %v2143_v49 = vrot.slane %v1696_v38, %v10523_v14 }
 0x167   :  { %v2880_v44 = vcombine.low %v2872_v58, %v2879_v57  ;;  %v2896_v51 = vrot.slane %v2888_v41, %v10523_v14  ;;  %v3337_v13 = vsel %vm3302_vm4, %v3333_v7, %v3336_v45  ;;  %3377 = vrot.lane.b32.xlu0 %v3336_v45, %s10173_s15  ;;  %v3073_v55 = vshll.u32 %v10904_v63, 16 }
 0x168   :  { %v2903_v21 = vrot.slane %v2889_v42, %v10523_v14  ;;  %3375 = vrot.lane.b32.xlu1 %v3337_v13, %s10173_s15  ;;  %v2150_v50 = vrot.slane %v2136_v12, %v10523_v14  ;;  %v2151_v47 = vcombine.high %v2143_v49, %v2143_v49  ;;  %v2370_v10 = vmax.f32 %v2143_v49, 0.0 }
 0x169   :  { %v10973_v26 = vpack.c.bf16 %v2887_v25, %v2880_v44  ;;  %v3078_v39 = vshll.u32 %v10926_v37, 16  ;;  %v3082_v36 = vshrl.u32 %v10926_v37, 16  ;;  %v3224_v56 = vrot.slane %v3071_v19, 1 }
 0x16a   :  { %v2904_v58 = vcombine.low %v2896_v51, %v2903_v21  ;;  %v2152_v59 = vcombine.high %v2150_v50, %v2150_v50  ;;  %v2371_v11 = vmax.f32 %v2151_v47, 0.0  ;;  %v2372_v0 = vmax.f32 %v2150_v50, 0.0 }
 0x16b   :  { %v2905_v62 = vcombine.low %v2369_v17, %v2370_v10  ;;  %v3225_v54 = vrot.slane %v3073_v55, 2  ;;  %v3227_v28 = vrot.slane %v3082_v36, 1  ;;  %v3228_v20 = vrot.slane %v3078_v39, 2 }
 0x16c   :  { %v2373_v30 = vmax.f32 %v2152_v59, 0.0  ;;  %v2906_v9 = vcombine.low %v2371_v11, %v2372_v0  ;;  %v3075_v53 = vrot.slane %v3073_v55, 1  ;;  %v3080_v46 = vrot.slane %v3078_v39, 1 }
 0x16d   :  { %v2913_v61 = vrot.slane %v2905_v62, %v10523_v14  ;;  %v3226_v35 = vor.u32 %v3225_v54, %v3224_v56  ;;  %v3229_v8 = vor.u32 %v3228_v20, %v3227_v28  ;;  %v1699_v2 = vadd.f32 %v10897_v48, %v10549_v52 }
 0x16e   :  { %v2920_v27 = vrot.slane %v2906_v9, %v10523_v14  ;;  %v3076_v7 = vor.u32 %v3075_v53, %v3071_v19  ;;  %v3084_v15 = vor.u32 %v3082_v36, %v3080_v46  ;;  %v3338_v23 = vrot.slane %v3071_v19, 2 }
 0x16f   :  { %v3230_v25 = vsel %vm3188_vm5, %v3226_v35, %v3229_v8  ;;  %v2153_v16 = vcombine.high %v1699_v2, %v1699_v2  ;;  %v2160_v29 = vrot.slane %v1699_v2, %v10523_v14  ;;  %v3339_v24 = vrot.slane %v3073_v55, 3 }
 0x170   :  { %v2921_v32 = vcombine.low %v2913_v61, %v2920_v27  ;;  %3265 = vrot.lane.b32.xlu1 %v3230_v25, %s10173_s15  ;;  %v3081_v38 = vsel %vm2994_vm3, %v3076_v7, %v3080_v46  ;;  %v3341_v57 = vrot.slane %v3082_v36, 2  ;;  %v3342_v41 = vrot.slane %v3078_v39, 3 }
 0x171   :  { %3135 = vrot.lane.b32.xlu0 %v3081_v38, %s10173_s15  ;;  %v2167_v52 = vrot.slane %v2153_v16, %v10523_v14  ;;  %v2168_v48 = vcombine.high %v2160_v29, %v2160_v29  ;;  %v2374_v45 = vmax.f32 %v2160_v29, 0.0  ;;  %v3340_v19 = vor.u32 %v3339_v24, %v3338_v23 }
 0x172   :  { %v10987_v17 = vpack.c.bf16 %v2921_v32, %v2904_v58  ;;  %v3343_v42 = vor.u32 %v3342_v41, %v3341_v57  ;;  %v3086_v12 = vshrl.u32 %v10952_v60, 16  ;;  %v3088_v49 = vshll.u32 %v10952_v60, 16 }
 0x173   :  { %v2169_v44 = vcombine.high %v2167_v52, %v2167_v52  ;;  %v2375_v51 = vmax.f32 %v2168_v48, 0.0  ;;  %v2376_v13 = vmax.f32 %v2167_v52, 0.0  ;;  %v2922_v55 = vcombine.low %v2373_v30, %v2374_v45 }
 0x174   :  { %3137 = vrot.lane.b32.xlu1 %v3084_v15, %s10173_s15  ;;  %v3344_v21 = vsel %vm3302_vm4, %v3340_v19, %v3343_v42  ;;  %v3090_v50 = vrot.slane %v3088_v49, 1  ;;  %v3093_v47 = vshll.u32 %v10973_v26, 16  ;;  %v3097_v10 = vshrl.u32 %v10973_v26, 16 }
 0x175   :  { %v2377_v39 = vmax.f32 %v2169_v44, 0.0  ;;  %v2923_v36 = vcombine.low %v2375_v51, %v2376_v13  ;;  %v2930_v56 = vrot.slane %v2922_v55, %v10523_v14  ;;  %3379 = vrot.lane.b32.xlu0 %v3344_v21, %s10173_s15  ;;  %v3231_v58 = vrot.slane %v3086_v12, 1 }
 0x176   :  { %v3091_v59 = vor.u32 %v3090_v50, %v3086_v12  ;;  %v3095_v11 = vrot.slane %v3093_v47, 1  ;;  %v3232_v0 = vrot.slane %v3088_v49, 2  ;;  %v3234_v62 = vrot.slane %v3097_v10, 1 }
 0x177   :  { %v2937_v54 = vrot.slane %v2923_v36, %v10523_v14  ;;  %v3235_v28 = vrot.slane %v3093_v47, 2  ;;  %v2945_v20 = vrot.slane %v2377_v39, %v10523_v14  ;;  %v3348_v61 = vrot.slane %v3097_v10, 2 }
 0x178   :  { %3381 = vrot.lane.b32.xlu1 %v3343_v42, %s10173_s15  ;;  %v3096_v30 = vsel %vm2994_vm3, %v3091_v59, %v3095_v11  ;;  %v3233_v9 = vor.u32 %v3232_v0, %v3231_v58  ;;  %v3349_v35 = vrot.slane %v3093_v47, 3  ;;  %v3345_v2 = vrot.slane %v3086_v12, 2 }
 0x179   :  { %v2938_v53 = vcombine.low %v2930_v56, %v2937_v54  ;;  %3267 = vrot.lane.b32.xlu0 %v3229_v8, %s10173_s15  ;;  %v3236_v46 = vor.u32 %v3235_v28, %v3234_v62  ;;  %v3346_v27 = vrot.slane %v3088_v49, 3  ;;  %v3103_v7 = vshll.u32 %v10987_v17, 16 }
 0x17a   :  { %v3350_v25 = vor.u32 %v3349_v35, %v3348_v61  ;;  %v3101_v16 = vshrl.u32 %v10987_v17, 16  ;;  %v3099_v32 = vor.u32 %v3097_v10, %v3095_v11  ;;  %v3279_v39 = vrot.slane %v10596_v22, 2 }
 0x17b   :  { %v11003_v15 = vpack.c.bf16 %v2945_v20, %v2938_v53  ;;  %v3237_v23 = vsel %vm3188_vm5, %v3233_v9, %v3236_v46  ;;  %v3105_v29 = vrot.slane %v3103_v7, 1  ;;  %v3347_v38 = vor.u32 %v3346_v27, %v3345_v2 }
 0x17c   :  { %3139 = vrot.lane.b32.xlu1 %v3096_v30, %s10173_s15  ;;  %v3238_v42 = vrot.slane %v3101_v16, 1  ;;  %v3239_v12 = vrot.slane %v3103_v7, 2  ;;  %v3352_v50 = vrot.slane %v3101_v16, 2  ;;  %v3353_v47 = vrot.slane %v3103_v7, 3 }
 0x17d   :  { %3269 = vrot.lane.b32.xlu0 %v3237_v23, %s10173_s15  ;;  %v3108_v8 = vshll.u32 %v11003_v15, 16  ;;  %v3112_v24 = vshrl.u32 %v11003_v15, 16  ;;  %v3106_v57 = vor.u32 %v3105_v29, %v3101_v16  ;;  %v3351_v52 = vsel %vm3302_vm4, %v3347_v38, %v3350_v25 }
 0x17e   :  { %v3240_v21 = vor.u32 %v3239_v12, %v3238_v42  ;;  %v3393_v58 = vrot.slane %v10596_v22, 3  ;;  %v3278_v59 = vrot.slane %v10573_v43, 2  ;;  %v3354_v0 = vor.u32 %v3353_v47, %v3352_v50 }
 0x17f   :  { %v3110_v41 = vrot.slane %v3108_v8, 1  ;;  %v3241_v48 = vrot.slane %v3112_v24, 1  ;;  %v3242_v45 = vrot.slane %v3108_v8, 2  ;;  %v3355_v51 = vrot.slane %v3112_v24, 2 }
 0x180   :  { %3141 = vrot.lane.b32.xlu1 %v3099_v32, %s10173_s15  ;;  %v3356_v13 = vrot.slane %v3108_v8, 3  ;;  %v3392_v62 = vrot.slane %v10573_v43, 3  ;;  %v3280_v54 = vsel %vm1561_vm0, %v3278_v59, %v3279_v39  ;;  %v3165_v35 = vrot.slane %v10596_v22, 1 }
 0x181   :  { %3383 = vrot.lane.b32.xlu0 %v3351_v52, %s10173_s15  ;;  %v3111_v19 = vsel %vm2994_vm3, %v3106_v57, %v3110_v41  ;;  %v3243_v44 = vor.u32 %v3242_v45, %v3241_v48  ;;  %v3114_v11 = vor.u32 %v3112_v24, %v3110_v41  ;;  %v3281_v50 = vrot.slane %v10613_v5, 2 }
 0x182   :  { %v3116_v49 = vpop.permute.xlu0 %3115  ;;  %v3357_v56 = vor.u32 %v3356_v13, %v3355_v51  ;;  %v3394_v30 = vsel %vm3391_vm6, %v3392_v62, %v3393_v58  ;;  %v3396_v13 = vrot.slane %v10631_v33, 3  ;;  %v3167_v62 = vrot.slane %v10613_v5, 1 }
 0x183   :  { %v3244_v36 = vsel %vm3188_vm5, %v3240_v21, %v3243_v44  ;;  %v3418_v32 = vsel %vm3416_vm7, %v10573_v43, %v3116_v49  ;;  %v3282_v49 = vrot.slane %v10631_v33, 2  ;;  %v3168_v21 = vrot.slane %v10631_v33, 1 }
 0x184   :  { %3271 = vrot.lane.b32.xlu1 %v3236_v46, %s10173_s15  ;;  %v3358_v20 = vsel %vm3302_vm4, %v3354_v0, %v3357_v56 }
 0x185   :  { %3143 = vrot.lane.b32.xlu0 %v3111_v19, %s10173_s15  ;;  %v11017_v55 = vpop.permute.xlu1 %3247 }
 0x186   :  { %v3118_v10 = vpop.permute.xlu0 %3117 }
 0x187   :  { %v3420_v59 = vsel %vm3416_vm7, %v10596_v22, %v3118_v10  ;;  %v3169_v10 = vsel %vm3163_vm8, %v3167_v62, %v3168_v21 }
 0x188   :  { %3385 = vrot.lane.b32.xlu1 %v3350_v25, %s10173_s15  ;;  %v3164_v25 = vrot.slane %v10573_v43, 1 }
 0x189   :  { %3273 = vrot.lane.b32.xlu0 %v3244_v36, %s10173_s15  ;;  %v3395_v36 = vrot.slane %v10613_v5, 3 }
 0x18a   :  { %v3362_v61 = vpop.permute.xlu0 %3361  ;;  %v3166_v29 = vsel %vm3163_vm8, %v3164_v25, %v3165_v35 }
 0x18b   :  { %v3360_v28 = vpop.permute.xlu1 %3359  ;;  %v3502_v47 = vsel %vm3416_vm7, %v3279_v39, %v3362_v61 }
 0x18c   :  { %3145 = vrot.lane.b32.xlu1 %v3114_v11, %s10173_s15  ;;  %v3499_v9 = vsel %vm3416_vm7, %v3280_v54, %v3360_v28  ;;  %v3283_v11 = vsel %vm1561_vm0, %v3281_v50, %v3282_v49  ;;  %v3454_v54 = vsel %vm3416_vm7, %v3165_v35, %v11017_v55  ;;  %v3397_v28 = vsel %vm3391_vm6, %v3395_v36, %v3396_v13 }
 0x18d   :  { %3387 = vrot.lane.b32.xlu0 %v3358_v20, %s10173_s15  ;;  %v3657_v53 = vcombine.low %v3499_v9, %v3394_v30  ;;  %v3658_v46 = vcombine.high %v3499_v9, %v3394_v30  ;;  %v3692_v30 = vcombine.low %v3502_v47, %v3393_v58  ;;  %v3284_v50 = vrot.slane %v10689_v34, 2 }
 0x18f   :  { %v3679_v2 = vrot.slane %v3657_v53, %v10523_v14  ;;  %v3686_v27 = vrot.slane %v3658_v46, %v10523_v14  ;;  %v3171_v53 = vrot.slane %v10705_v6, 1  ;;  %v3691_v46 = vcombine.low %v3420_v59, %v3454_v54 }
 0x190   :  { %3389 = vrot.lane.b32.xlu1 %v3357_v56, %s10173_s15 }
 0x191   :  { %3275 = vrot.lane.b32.xlu0 %v3243_v44, %s10173_s15  ;;  %v4097_v7 = vrot.slane %v3679_v2, %v10523_v14  ;;  %v4111_v23 = vrot.slane %v3686_v27, %v10523_v14 }
 0x193   :  { %v4114_v16 = vcombine.low %v4097_v7, %v4111_v23  ;;  %v3246_v8 = vpop.permute.xlu0 %3245  ;;  %v4115_v24 = vcombine.high %v4097_v7, %v4111_v23 }
 0x194   :  { %v3451_v38 = vsel %vm3416_vm7, %v3166_v29, %v3246_v8  ;;  %v3170_v8 = vrot.slane %v10689_v34, 1 }
 0x195   :  { %v3655_v57 = vcombine.low %v3418_v32, %v3451_v38  ;;  %v3656_v41 = vcombine.high %v3418_v32, %v3451_v38  ;;  %9393 = vmatprep.mubr.msk.bf16.mxu0 %vm3416_vm7, %v4115_v24  ;;  %v3699_v24 = vrot.slane %v3691_v46, %v10523_v14 }
 0x196   :  { %4820 = vmatmul.mubr.bf16.vlgmr.msra.gmra.mrb[52].mxu0 %v4114_v16  ;;  %v3706_v16 = vrot.slane %v3692_v30, %v10523_v14  ;;  %v3398_v30 = vrot.slane %v10689_v34, 3 }
 0x197   :  { %v3665_v52 = vrot.slane %v3655_v57, %v10523_v14  ;;  %v3672_v48 = vrot.slane %v3656_v41, %v10523_v14  ;;  %v3172_v41 = vsel %vm3163_vm8, %v3170_v8, %v3171_v53 }
 0x199   :  { %v3120_v45 = vpop.permute.xlu1 %3119  ;;  %v4090_v19 = vrot.slane %v3665_v52, %v10523_v14  ;;  %v4104_v42 = vrot.slane %v3672_v48, %v10523_v14  ;;  %v3252_v51 = vpop.permute.xlu0 %3251 }
 0x19a   :  { %v3460_v61 = vsel %vm3416_vm7, %v3168_v21, %v3252_v51  ;;  %v3422_v27 = vsel %vm3416_vm7, %v10613_v5, %v3120_v45 }
 0x19b   :  { %v4113_v12 = vcombine.high %v4090_v19, %v4104_v42  ;;  %v4112_v44 = vcombine.low %v4090_v19, %v4104_v42 }
 0x19d   :  { %v3122_v43 = vpop.permute.xlu1 %3121  ;;  %4706 = vmatprep.mubr.bf16.mxu1 %v4113_v12 }
 0x19e   :  { %4707 = vmatmul.mubr.bf16.vlgmr.msra.gmra.mrb[0].mxu1 %v4112_v44  ;;  %v3424_v55 = vsel %vm3416_vm7, %v10631_v33, %v3122_v43 }
 0x19f   :  { %v3744_v29 = vcombine.low %v3424_v55, %v3460_v61 }
 0x1a1   :  { %v3366_v56 = vpop.permute.xlu1 %3365  ;;  %v3752_v44 = vrot.slane %v3744_v29, %v10523_v14 }
 0x1a2   :  { %v3364_v0 = vpop.permute.xlu0 %3363  ;;  %v3508_v39 = vsel %vm3416_vm7, %v3282_v49, %v3366_v56  ;;  %v3285_v49 = vrot.slane %v10705_v6, 2  ;;  %v3399_v56 = vrot.slane %v10705_v6, 3 }
 0x1a3   :  { %v3505_v20 = vsel %vm3416_vm7, %v3283_v11, %v3364_v0  ;;  %v3745_v22 = vcombine.low %v3508_v39, %v3396_v13 }
 0x1a4   :  { %v3710_v9 = vcombine.low %v3505_v20, %v3397_v28  ;;  %v3711_v35 = vcombine.high %v3505_v20, %v3397_v28  ;;  %v3286_v39 = vsel %vm1561_vm0, %v3284_v50, %v3285_v49  ;;  %v3402_v50 = vrot.slane %v10814_v31, 3 }
 0x1a5   :  { %v3250_v2 = vpop.permute.xlu1 %3249  ;;  %v3759_v57 = vrot.slane %v3745_v22, %v10523_v14 }
 0x1a6   :  { %v3732_v7 = vrot.slane %v3710_v9, %v10523_v14  ;;  %v3457_v58 = vsel %vm3416_vm7, %v3169_v10, %v3250_v2  ;;  %v3739_v33 = vrot.slane %v3711_v35, %v10523_v14  ;;  %v11113_v2 = vsel %vm3391_vm6, %v3398_v30, %v3399_v56 }
 0x1a7   :  { %v3708_v23 = vcombine.low %v3422_v27, %v3457_v58  ;;  %v3709_v25 = vcombine.high %v3422_v27, %v3457_v58  ;;  %v3760_v36 = vcombine.low %v3752_v44, %v3759_v57  ;;  %v3174_v57 = vrot.slane %v10814_v31, 1 }
 0x1a8   :  { %v9342_v38 = vcombine.low %v3706_v16, %v3732_v7 }
 0x1a9   :  { %v3718_v32 = vrot.slane %v3708_v23, %v10523_v14  ;;  %v3725_v5 = vrot.slane %v3709_v25, %v10523_v14  ;;  %v9346_v22 = vcombine.high %v3739_v33, %v3760_v36 }
 0x1aa   :  { %v3254_v52 = vpop.permute.xlu0 %3253  ;;  %v4133_v59 = vrot.slane %v9342_v38, %v10523_v14 }
 0x1ab   :  { %v3741_v48 = vcombine.high %v3718_v32, %v3732_v7  ;;  %v3742_v45 = vcombine.low %v3725_v5, %v3739_v33  ;;  %v3743_v19 = vcombine.high %v3725_v5, %v3739_v33  ;;  %v9341_v42 = vcombine.low %v3699_v24, %v3718_v32  ;;  %v3124_v12 = vpop.permute.xlu1 %3123 }
 0x1ac   :  { %v11089_v51 = vsel %vm3416_vm7, %v3172_v41, %v3254_v52  ;;  %v11093_v43 = vsel %vm3416_vm7, %v10689_v34, %v3124_v12  ;;  %v4169_v29 = vrot.slane %v9346_v22, %v10523_v14  ;;  %v3288_v12 = vrot.slane %v10814_v31, 2 }
 0x1ad   :  { %v9344_v13 = vcombine.high %v3732_v7, %v3742_v45  ;;  %v3761_v21 = vcombine.low %v11093_v43, %v11089_v51  ;;  %v9343_v47 = vcombine.low %v3741_v48, %v3725_v5  ;;  %v9345_v11 = vcombine.low %v3743_v19, %v3752_v44 }
 0x1ae   :  { %v4126_v54 = vrot.slane %v9341_v42, %v10523_v14  ;;  %v3173_v48 = vrot.slane %v10762_v3, 1  ;;  %v3762_v45 = vcombine.high %v11093_v43, %v11089_v51 }
 0x1af   :  { %v3771_v0 = vrot.slane %v3761_v21, %v10523_v14  ;;  %v3126_v62 = vpop.permute.xlu1 %3125  ;;  %v4140_v28 = vrot.slane %v9343_v47, %v10523_v14  ;;  %v4147_v20 = vrot.slane %v9344_v13, %v10523_v14  ;;  %v4162_v9 = vrot.slane %v9345_v11, %v10523_v14 }
 0x1b0   :  { %v3428_v19 = vsel %vm3416_vm7, %v10705_v6, %v3126_v62  ;;  %v3175_v13 = vsel %vm3163_vm8, %v3173_v48, %v3174_v57  ;;  %v3176_v48 = vrot.slane %v10858_v40, 1 }
 0x1b1   :  { %v3368_v10 = vpop.permute.xlu0 %3367  ;;  %v4149_v46 = vcombine.high %v4126_v54, %v4140_v28  ;;  %v4151_v61 = vcombine.high %v4133_v59, %v4147_v20  ;;  %v4148_v55 = vcombine.low %v4126_v54, %v4140_v28  ;;  %v4150_v35 = vcombine.low %v4133_v59, %v4147_v20 }
 0x1b2   :  { %v3511_v27 = vsel %vm3416_vm7, %v3286_v39, %v3368_v10  ;;  %v4176_v7 = vrot.slane %v3771_v0, %v10523_v14  ;;  %v3778_v54 = vrot.slane %v3762_v45, %v10523_v14  ;;  %v3401_v28 = vrot.slane %v10762_v3, 3 }
 0x1b3   :  { %v3763_v58 = vcombine.low %v3511_v27, %v11113_v2  ;;  %v3256_v34 = vpop.permute.xlu1 %3255  ;;  %4714 = vmatprep.mubr.bf16.mxu1 %v4149_v46  ;;  %9394 = vmatprep.mubr.msk.bf16.mxu0 %vm3416_vm7, %v4151_v61  ;;  %v3764_v20 = vcombine.high %v3511_v27, %v11113_v2 }
 0x1b4   :  { %4715 = vmatmul.mubr.bf16.gmra.mrb[4].mxu1 %v4148_v55  ;;  %4828 = vmatmul.mubr.bf16.gmra.mrb[56].mxu0 %v4150_v35  ;;  %v4185_v23 = vcombine.high %v4162_v9, %v4176_v7  ;;  %v4184_v32 = vcombine.low %v4162_v9, %v4176_v7  ;;  %v3466_v52 = vsel %vm3416_vm7, %v3171_v53, %v3256_v34 }
 0x1b5   :  { %v3785_v25 = vrot.slane %v3763_v58, %v10523_v14  ;;  %v3797_v44 = vcombine.low %v3428_v19, %v3466_v52  ;;  %v3792_v22 = vrot.slane %v3764_v20, %v10523_v14  ;;  %v4198_v34 = vrot.slane %v3778_v54, %v10523_v14 }
 0x1b6   :  { %4722 = vmatprep.mubr.bf16.mxu1 %v4185_v23 }
 0x1b7   :  { %v4183_v16 = vrot.slane %v3785_v25, %v10523_v14  ;;  %v3370_v8 = vpop.permute.xlu1 %3369  ;;  %v3805_v39 = vrot.slane %v3797_v44, %v10523_v14 }
 0x1b8   :  { %v3514_v59 = vsel %vm3416_vm7, %v3285_v49, %v3370_v8 }
 0x1b9   :  { %v4187_v24 = vcombine.high %v4169_v29, %v4183_v16  ;;  %v4186_v33 = vcombine.low %v4169_v29, %v4183_v16  ;;  %v3798_v49 = vcombine.low %v3514_v59, %v3399_v56  ;;  %v3177_v29 = vrot.slane %v10874_v4, 1 }
 0x1bb   :  { %v3128_v5 = vpop.permute.xlu0 %3127  ;;  %9395 = vmatprep.mubr.msk.bf16.mxu0 %vm3416_vm7, %v4187_v24  ;;  %v3812_v56 = vrot.slane %v3798_v49, %v10523_v14  ;;  %v3405_v49 = vrot.slane %v10874_v4, 3 }
 0x1bc   :  { %4723 = vmatmul.mubr.bf16.gmra.mrb[8].mxu1 %v4184_v32  ;;  %4836 = vmatmul.mubr.bf16.gmra.mrb[60].mxu0 %v4186_v33  ;;  %v3130_v38 = vpop.permute.xlu1 %3129  ;;  %v3430_v47 = vsel %vm3416_vm7, %v10762_v3, %v3128_v5 }
 0x1bd   :  { %v3432_v42 = vsel %vm3416_vm7, %v10814_v31, %v3130_v38  ;;  %v3287_v31 = vrot.slane %v10762_v3, 2  ;;  %v3403_v3 = vsel %vm3391_vm6, %v3401_v28, %v3402_v50 }
 0x1bf   :  { %v3260_v41 = vpop.permute.xlu0 %3259  ;;  %v3289_v46 = vsel %vm1561_vm0, %v3287_v31, %v3288_v12 }
 0x1c0   :  { %v3472_v51 = vsel %vm3416_vm7, %v3174_v57, %v3260_v41  ;;  %v4205_v41 = vrot.slane %v3792_v22, %v10523_v14 }
 0x1c1   :  { %v3850_v11 = vcombine.low %v3432_v42, %v3472_v51 }
 0x1c3   :  { %v3258_v21 = vpop.permute.xlu0 %3257  ;;  %v3374_v53 = vpop.permute.xlu1 %3373  ;;  %v3858_v55 = vrot.slane %v3850_v11, %v10523_v14 }
 0x1c4   :  { %v3469_v43 = vsel %vm3416_vm7, %v3175_v13, %v3258_v21  ;;  %v3520_v36 = vsel %vm3416_vm7, %v3288_v12, %v3374_v53  ;;  %v3178_v13 = vsel %vm3163_vm8, %v3176_v48, %v3177_v29  ;;  %v3294_v48 = vrot.slane %v10926_v37, 2 }
 0x1c5   :  { %v3814_v0 = vcombine.low %v3430_v47, %v3469_v43  ;;  %v3851_v62 = vcombine.low %v3520_v36, %v3402_v50  ;;  %v3815_v10 = vcombine.high %v3430_v47, %v3469_v43 }
 0x1c7   :  { %v3824_v30 = vrot.slane %v3814_v0, %v10523_v14  ;;  %v3865_v9 = vrot.slane %v3851_v62, %v10523_v14  ;;  %v3831_v23 = vrot.slane %v3815_v10, %v10523_v14  ;;  %v3290_v10 = vrot.slane %v10858_v40, 2 }
 0x1c8   :  { %v3372_v61 = vpop.permute.xlu0 %3371 }
 0x1c9   :  { %v9347_v35 = vcombine.low %v3805_v39, %v3824_v30  ;;  %v3517_v2 = vsel %vm3416_vm7, %v3289_v46, %v3372_v61  ;;  %v3866_v58 = vcombine.low %v3858_v55, %v3865_v9  ;;  %v3291_v39 = vrot.slane %v10874_v4, 2 }
 0x1ca   :  { %v3816_v27 = vcombine.low %v3517_v2, %v3403_v3  ;;  %v3817_v7 = vcombine.high %v3517_v2, %v3403_v3 }
 0x1cb   :  { %v4212_v6 = vrot.slane %v9347_v35, %v10523_v14  ;;  %v3292_v35 = vsel %vm1561_vm0, %v3290_v10, %v3291_v39 }
 0x1cc   :  { %v3838_v25 = vrot.slane %v3816_v27, %v10523_v14  ;;  %v3845_v16 = vrot.slane %v3817_v7, %v10523_v14 }
 0x1cd   :  { %v11166_v8 = vpop.permute.xlu1 %3263  ;;  %v4221_v24 = vcombine.high %v4198_v34, %v4212_v6  ;;  %v4220_v32 = vcombine.low %v4198_v34, %v4212_v6 }
 0x1ce   :  { %v3847_v33 = vcombine.high %v3824_v30, %v3838_v25  ;;  %v3848_v5 = vcombine.low %v3831_v23, %v3845_v16  ;;  %v3849_v38 = vcombine.high %v3831_v23, %v3845_v16  ;;  %v9348_v57 = vcombine.low %v3812_v56, %v3838_v25 }
 0x1cf   :  { %v9352_v52 = vcombine.high %v3845_v16, %v3866_v58  ;;  %4730 = vmatprep.mubr.bf16.mxu1 %v4221_v24 }
 0x1d0   :  { %v9350_v45 = vcombine.high %v3838_v25, %v3848_v5  ;;  %4731 = vmatmul.mubr.bf16.gmra.mrb[12].mxu1 %v4220_v32  ;;  %v4219_v19 = vrot.slane %v9348_v57, %v10523_v14  ;;  %v9349_v42 = vcombine.low %v3847_v33, %v3831_v23  ;;  %v9351_v12 = vcombine.low %v3849_v38, %v3858_v55 }
 0x1d1   :  { %v3132_v44 = vpop.permute.xlu0 %3131  ;;  %v4255_v51 = vrot.slane %v9352_v52, %v10523_v14  ;;  %v3404_v55 = vrot.slane %v10858_v40, 3  ;;  %v3179_v32 = vrot.slane %v10904_v63, 1 }
 0x1d2   :  { %v3262_v21 = vpop.permute.xlu1 %3261  ;;  %v4223_v50 = vcombine.high %v4205_v41, %v4219_v19  ;;  %v4222_v53 = vcombine.low %v4205_v41, %v4219_v19  ;;  %v4234_v47 = vrot.slane %v9349_v42, %v10523_v14  ;;  %v3434_v43 = vsel %vm3416_vm7, %v10858_v40, %v3132_v44 }
 0x1d3   :  { %v3475_v36 = vsel %vm3416_vm7, %v3178_v13, %v3262_v21  ;;  %v4248_v59 = vrot.slane %v9351_v12, %v10523_v14  ;;  %v4241_v11 = vrot.slane %v9350_v45, %v10523_v14  ;;  %v3406_v27 = vsel %vm3391_vm6, %v3404_v55, %v3405_v49 }
 0x1d4   :  { %v3867_v0 = vcombine.low %v3434_v43, %v3475_v36  ;;  %v3868_v62 = vcombine.high %v3434_v43, %v3475_v36  ;;  %9396 = vmatprep.mubr.msk.bf16.mxu0 %vm3416_vm7, %v4223_v50  ;;  %v3180_v40 = vrot.slane %v10926_v37, 1  ;;  %v3408_v42 = vrot.slane %v10926_v37, 3 }
 0x1d5   :  { %4844 = vmatmul.mubr.bf16.gmra.mrb[64].mxu0 %v4222_v53  ;;  %v4257_v54 = vcombine.high %v4234_v47, %v4248_v59  ;;  %v4259_v31 = vcombine.high %v4241_v11, %v4255_v51  ;;  %v4256_v30 = vcombine.low %v4234_v47, %v4248_v59  ;;  %v3134_v9 = vpop.permute.xlu0 %3133  ;;  %v4258_v22 = vcombine.low %v4241_v11, %v4255_v51 }
 0x1d6   :  { %v3877_v28 = vrot.slane %v3867_v0, %v10523_v14  ;;  %v3884_v20 = vrot.slane %v3868_v62, %v10523_v14  ;;  %v3181_v33 = vsel %vm3163_vm8, %v3179_v32, %v3180_v40  ;;  %v3436_v57 = vsel %vm3416_vm7, %v10874_v4, %v3134_v9 }
 0x1d7   :  { %4738 = vmatprep.mubr.bf16.mxu1 %v4257_v54  ;;  %9397 = vmatprep.mubr.msk.bf16.mxu0 %vm3416_vm7, %v4259_v31  ;;  %v3478_v12 = vsel %vm3416_vm7, %v3177_v29, %v11166_v8  ;;  %v3293_v21 = vrot.slane %v10904_v63, 2  ;;  %v3407_v47 = vrot.slane %v10904_v63, 3  ;;  %v3182_v31 = vrot.slane %v10952_v60, 1 }
 0x1d8   :  { %4739 = vmatmul.mubr.bf16.gmra.mrb[16].mxu1 %v4256_v30  ;;  %v4270_v46 = vrot.slane %v3877_v28, %v10523_v14  ;;  %v4284_v61 = vrot.slane %v3884_v20, %v10523_v14  ;;  %v3903_v50 = vcombine.low %v3436_v57, %v3478_v12 }
 0x1d9   :  { %v3378_v6 = vpop.permute.xlu0 %3377  ;;  %v3295_v43 = vsel %vm1561_vm0, %v3293_v21, %v3294_v48  ;;  %v3409_v11 = vsel %vm3391_vm6, %v3407_v47, %v3408_v42 }
 0x1da   :  { %v3376_v3 = vpop.permute.xlu1 %3375  ;;  %v4293_v2 = vcombine.high %v4270_v46, %v4284_v61  ;;  %v4292_v25 = vcombine.low %v4270_v46, %v4284_v61  ;;  %v3526_v44 = vsel %vm3416_vm7, %v3291_v39, %v3378_v6  ;;  %v3911_v62 = vrot.slane %v3903_v50, %v10523_v14 }
 0x1db   :  { %v3523_v7 = vsel %vm3416_vm7, %v3292_v35, %v3376_v3  ;;  %v3904_v59 = vcombine.low %v3526_v44, %v3405_v49  ;;  %v3296_v61 = vrot.slane %v10952_v60, 2 }
 0x1dc   :  { %v3869_v58 = vcombine.low %v3523_v7, %v3406_v27  ;;  %v3870_v34 = vcombine.high %v3523_v7, %v3406_v27  ;;  %4746 = vmatprep.mubr.bf16.mxu1 %v4293_v2 }
 0x1dd   :  { %4852 = vmatmul.mubr.bf16.gmra.mrb[68].mxu0 %v4258_v22  ;;  %v3918_v49 = vrot.slane %v3904_v59, %v10523_v14 }
 0x1de   :  { %v3891_v56 = vrot.slane %v3869_v58, %v10523_v14  ;;  %v3898_v23 = vrot.slane %v3870_v34, %v10523_v14  ;;  %v3297_v34 = vrot.slane %v10973_v26, 2 }
 0x1e0   :  { %v4277_v16 = vrot.slane %v3891_v56, %v10523_v14  ;;  %v4291_v24 = vrot.slane %v3898_v23, %v10523_v14  ;;  %4747 = vmatmul.mubr.bf16.gmra.mrb[20].mxu1 %v4292_v25  ;;  %v3411_v25 = vrot.slane %v10973_v26, 3  ;;  %v3298_v44 = vsel %vm1561_vm0, %v3296_v61, %v3297_v34 }
 0x1e2   :  { %v3266_v5 = vpop.permute.xlu1 %3265  ;;  %v4295_v38 = vcombine.high %v4277_v16, %v4291_v24  ;;  %v4294_v45 = vcombine.low %v4277_v16, %v4291_v24 }
 0x1e3   :  { %v3481_v41 = vsel %vm3416_vm7, %v3181_v33, %v3266_v5  ;;  %v3136_v52 = vpop.permute.xlu0 %3135 }
 0x1e4   :  { %v3438_v19 = vsel %vm3416_vm7, %v10904_v63, %v3136_v52  ;;  %9398 = vmatprep.mubr.msk.bf16.mxu0 %vm3416_vm7, %v4295_v38  ;;  %v3183_v63 = vrot.slane %v10973_v26, 1 }
 0x1e5   :  { %v3920_v13 = vcombine.low %v3438_v19, %v3481_v41  ;;  %4860 = vmatmul.mubr.bf16.gmra.mrb[72].mxu0 %v4294_v45  ;;  %v3921_v51 = vcombine.high %v3438_v19, %v3481_v41  ;;  %v3410_v19 = vrot.slane %v10952_v60, 3 }
 0x1e6   :  { %v3138_v53 = vpop.permute.xlu1 %3137  ;;  %v3184_v56 = vsel %vm3163_vm8, %v3182_v31, %v3183_v63 }
 0x1e7   :  { %v3380_v36 = vpop.permute.xlu0 %3379  ;;  %v3930_v29 = vrot.slane %v3920_v13, %v10523_v14  ;;  %v3937_v28 = vrot.slane %v3921_v51, %v10523_v14  ;;  %v3440_v35 = vsel %vm3416_vm7, %v10926_v37, %v3138_v53  ;;  %v3412_v50 = vsel %vm3391_vm6, %v3410_v19, %v3411_v25 }
 0x1e8   :  { %v3529_v4 = vsel %vm3416_vm7, %v3295_v43, %v3380_v36 }
 0x1e9   :  { %v3922_v8 = vcombine.low %v3529_v4, %v3409_v11  ;;  %v3923_v0 = vcombine.high %v3529_v4, %v3409_v11  ;;  %v9353_v55 = vcombine.low %v3911_v62, %v3930_v29  ;;  %v3186_v4 = vrot.slane %v11003_v15, 1 }
 0x1ea   :  { %v3382_v54 = vpop.permute.xlu1 %3381 }
 0x1eb   :  { %v3944_v20 = vrot.slane %v3922_v8, %v10523_v14  ;;  %v3951_v39 = vrot.slane %v3923_v0, %v10523_v14  ;;  %v3532_v30 = vsel %vm3416_vm7, %v3294_v48, %v3382_v54  ;;  %v3268_v9 = vpop.permute.xlu0 %3267  ;;  %v4306_v5 = vrot.slane %v9353_v55, %v10523_v14 }
 0x1ec   :  { %v3957_v10 = vcombine.low %v3532_v30, %v3408_v42  ;;  %v3484_v46 = vsel %vm3416_vm7, %v3180_v40, %v3268_v9  ;;  %v3185_v54 = vrot.slane %v10987_v17, 1  ;;  %v3300_v9 = vrot.slane %v11003_v15, 2 }
 0x1ed   :  { %v3953_v3 = vcombine.high %v3930_v29, %v3944_v20  ;;  %v3954_v2 = vcombine.low %v3937_v28, %v3951_v39  ;;  %v9354_v27 = vcombine.low %v3918_v49, %v3944_v20  ;;  %v3956_v22 = vcombine.low %v3440_v35, %v3484_v46 }
 0x1ee   :  { %v3971_v7 = vrot.slane %v3957_v10, %v10523_v14  ;;  %v3140_v58 = vpop.permute.xlu1 %3139  ;;  %v3955_v16 = vcombine.high %v3937_v28, %v3951_v39  ;;  %v3187_v30 = vsel %vm3163_vm8, %v3185_v54, %v3186_v4  ;;  %v3414_v49 = vrot.slane %v11003_v15, 3 }
 0x1ef   :  { %v9356_v6 = vcombine.high %v3944_v20, %v3954_v2  ;;  %v3270_v23 = vpop.permute.xlu0 %3269  ;;  %v9355_v40 = vcombine.low %v3953_v3, %v3937_v28  ;;  %v3964_v24 = vrot.slane %v3956_v22, %v10523_v14  ;;  %v11239_v37 = vsel %vm3416_vm7, %v10952_v60, %v3140_v58 }
 0x1f0   :  { %v11242_v32 = vsel %vm3416_vm7, %v3184_v56, %v3270_v23  ;;  %v4313_v45 = vrot.slane %v9354_v27, %v10523_v14 }
 0x1f1   :  { %v3973_v33 = vcombine.low %v11239_v37, %v11242_v32  ;;  %v4320_v38 = vrot.slane %v9355_v40, %v10523_v14  ;;  %v4327_v57 = vrot.slane %v9356_v6, %v10523_v14  ;;  %v3972_v41 = vcombine.low %v3964_v24, %v3971_v7 }
 0x1f2   :  { %v9357_v52 = vcombine.low %v3955_v16, %v3964_v24  ;;  %v3142_v48 = vpop.permute.xlu1 %3141  ;;  %v3974_v35 = vcombine.high %v11239_v37, %v11242_v32  ;;  %v3299_v7 = vrot.slane %v10987_v17, 2  ;;  %v3413_v6 = vrot.slane %v10987_v17, 3 }
 0x1f3   :  { %v3983_v42 = vrot.slane %v3973_v33, %v10523_v14  ;;  %v4329_v12 = vcombine.high %v4306_v5, %v4320_v38  ;;  %v3384_v13 = vpop.permute.xlu0 %3383  ;;  %v4331_v21 = vcombine.high %v4313_v45, %v4327_v57  ;;  %v4328_v47 = vcombine.low %v4306_v5, %v4320_v38 }
 0x1f4   :  { %v3535_v53 = vsel %vm3416_vm7, %v3298_v44, %v3384_v13  ;;  %v9358_v51 = vcombine.high %v3951_v39, %v3972_v41  ;;  %v4330_v36 = vcombine.low %v4313_v45, %v4327_v57  ;;  %v4342_v59 = vrot.slane %v9357_v52, %v10523_v14  ;;  %v10089_v57 = vld [vmem:[%s12929_s5] sm:$0xff]   ;;  %v10090_v41 = vld [vmem:[%s12929_s5 + $0x48] sm:$0xff]  }
 0x1f5   :  { %4754 = vmatprep.mubr.bf16.mxu1 %v4329_v12  ;;  %v3975_v43 = vcombine.low %v3535_v53, %v3412_v50  ;;  %9399 = vmatprep.mubr.msk.bf16.mxu0 %vm3416_vm7, %v4331_v21  ;;  %v4356_v11 = vrot.slane %v3983_v42, %v10523_v14  ;;  %v3444_v20 = vsel %vm3416_vm7, %v10973_v26, %v3142_v48 }
 0x1f6   :  { %4755 = vmatmul.mubr.bf16.gmra.mrb[24].mxu1 %v4328_v47  ;;  %v3272_v60 = vpop.permute.xlu1 %3271  ;;  %4868 = vmatmul.mubr.bf16.gmra.mrb[76].mxu0 %v4330_v36  ;;  %v4349_v28 = vrot.slane %v9358_v51, %v10523_v14  ;;  %v3976_v22 = vcombine.high %v3535_v53, %v3412_v50  ;;  %v3301_v40 = vsel %vm1561_vm0, %v3299_v7, %v3300_v9  ;;  %v10094_v7 = vld [vmem:[%s12929_s5 + $0x140] sm:$0xff]  }
 0x1f7   :  { %v3997_v29 = vrot.slane %v3975_v43, %v10523_v14  ;;  %v3144_v8 = vpop.permute.xlu0 %3143  ;;  %v3490_v0 = vsel %vm3416_vm7, %v3183_v63, %v3272_v60  ;;  %v4365_v62 = vcombine.high %v4342_v59, %v4356_v11  ;;  %v4364_v2 = vcombine.low %v4342_v59, %v4356_v11  ;;  %9725 = vmatprep.subr.bf16.mxu0 %v10094_v7 }
 0x1f8   :  { %v4009_v10 = vcombine.low %v3444_v20, %v3490_v0  ;;  %v3446_v26 = vsel %vm3416_vm7, %v10987_v17, %v3144_v8  ;;  %v3990_v24 = vrot.slane %v3974_v35, %v10523_v14  ;;  %v3415_v32 = vsel %vm3391_vm6, %v3413_v6, %v3414_v49  ;;  %v10088_v17 = vld [vmem:[%s12929_s5 + $0x40] sm:$0xff]   ;;  %v10097_v6 = vld [vmem:[%s12929_s5 + $0x18] sm:$0xff]  }
 0x1f9   :  { %v4363_v31 = vrot.slane %v3997_v29, %v10523_v14  ;;  %4762 = vmatprep.mubr.bf16.mxu1 %v4365_v62  ;;  %v4004_v52 = vrot.slane %v3976_v22, %v10523_v14  ;;  %9609 = vmatprep.subr.bf16.mxu1 %v10088_v17  ;;  %v10095_v22 = vld [vmem:[%s12929_s5 + $0x58] sm:$0xff]   ;;  %v10110_v17 = vld [vmem:[%s12929_s5 + $0x168] sm:$0xff]  }
 0x1fa   :  { %v3386_v39 = vpop.permute.xlu1 %3385  ;;  %v4017_v56 = vrot.slane %v4009_v10, %v10523_v14  ;;  %v4378_v47 = vrot.slane %v3990_v24, %v10523_v14  ;;  %9610 = vmatpush3.bf16.msra.mxu1 %v10089_v57  ;;  %v10103_v24 = vld [vmem:[%s12929_s5 + $0x20] sm:$0xff]   ;;  %v10112_v57 = vld [vmem:[%s12929_s5 + $0x70] sm:$0xff]  }
 0x1fb   :  { %v3538_v63 = vsel %vm3416_vm7, %v3297_v34, %v3386_v39  ;;  %v3274_v46 = vpop.permute.xlu0 %3273  ;;  %v4367_v61 = vcombine.high %v4349_v28, %v4363_v31  ;;  %v4366_v55 = vcombine.low %v4349_v28, %v4363_v31  ;;  %9611 = vmatprep.subr.bf16.mxu1 %v10090_v41  ;;  %v4385_v8 = vrot.slane %v4004_v52, %v10523_v14  ;;  %v10111_v41 = vld [vmem:[%s12929_s5 + $0x128] sm:$0xff]   ;;  %v10113_v52 = vld [vmem:[%s12929_s5 + $0x30] sm:$0xff]  }
 0x1fc   :  { %v3493_v3 = vsel %vm3416_vm7, %v3187_v30, %v3274_v46  ;;  %v4010_v58 = vcombine.low %v3538_v63, %v3411_v25 }
 0x1fd   :  { %v4026_v27 = vcombine.low %v3446_v26, %v3493_v3  ;;  %9400 = vmatprep.mubr.msk.bf16.mxu0 %vm3416_vm7, %v4367_v61  ;;  %v4027_v37 = vcombine.high %v3446_v26, %v3493_v3 }
 0x1fe   :  { %4763 = vmatmul.mubr.bf16.gmra.mrb[28].mxu1 %v4364_v2  ;;  %v3146_v34 = vpop.permute.xlu1 %3145  ;;  %4876 = vmatmul.mubr.bf16.gmra.mrb[80].mxu0 %v4366_v55  ;;  %v4024_v48 = vrot.slane %v4010_v58, %v10523_v14  ;;  %v10092_v2 = vld [vmem:[%s12929_s5 + $0x50] sm:$0xff]   ;;  %v10096_v58 = vld [vmem:[%s12929_s5 + $0x100] sm:$0xff]  }
 0x1ff   :  { %v4036_v23 = vrot.slane %v4026_v27, %v10523_v14  ;;  %v3388_v16 = vpop.permute.xlu0 %3387  ;;  %v4043_v21 = vrot.slane %v4027_v37, %v10523_v14  ;;  %v3448_v51 = vsel %vm3416_vm7, %v11003_v15, %v3146_v34  ;;  %v10093_v27 = vld [vmem:[%s12929_s5 + $0x10] sm:$0xff]   ;;  %v10098_v34 = vld [vmem:[%s12929_s5 + $0x148] sm:$0xff]   ;;  %9726 = vmatpush3.bf16.msra.mxu0 %v10096_v58  ;;  %v10104_v37 = vld [vmem:[%s12929_s5 + $0x158] sm:$0xff]  }
 0x200   :  { %v3541_v33 = vsel %vm3416_vm7, %v3301_v40, %v3388_v16  ;;  %9727 = vmatprep.subr.bf16.mxu0 %v10098_v34  ;;  %v10101_v40 = vld [vmem:[%s12929_s5 + $0x110] sm:$0xff]   ;;  %v10102_v16 = vld [vmem:[%s12929_s5 + $0x60] sm:$0xff]  }
 0x201   :  { %v9359_v25 = vcombine.low %v4017_v56, %v4036_v23  ;;  %v4028_v5 = vcombine.low %v3541_v33, %v3415_v32  ;;  %v4029_v38 = vcombine.high %v3541_v33, %v3415_v32  ;;  %v10099_v56 = vld [vmem:[%s12929_s5 + $0x108] sm:$0xff]   ;;  %v10105_v32 = vld [vmem:[%s12929_s5 + $0x118] sm:$0xff]   ;;  %v10106_v33 = vld [vmem:[%s12929_s5 + $0x160] sm:$0xff]  }
 0x202   :  { %v3390_v45 = vpop.permute.xlu1 %3389 }
 0x203   :  { %v4050_v19 = vrot.slane %v4028_v5, %v10523_v14  ;;  %v4057_v42 = vrot.slane %v4029_v38, %v10523_v14  ;;  %v3544_v12 = vsel %vm3416_vm7, %v3300_v9, %v3390_v45  ;;  %v3276_v44 = vpop.permute.xlu0 %3275  ;;  %v4392_v13 = vrot.slane %v9359_v25, %v10523_v14  ;;  %9728 = vmatpush3.bf16.msra.mxu0 %v10099_v56  ;;  %v10107_v25 = vld [vmem:[%s12929_s5 + $0x120] sm:$0xff]   ;;  %v10108_v5 = vld [vmem:[%s12929_s5 + $0x68] sm:$0xff]   ;;  %v10116_v45 = vld [vmem:[%s12929_s5 + $0x78] sm:$0xff]  }
 0x204   :  { %v4063_v50 = vcombine.low %v3544_v12, %v3414_v49  ;;  %v3496_v53 = vsel %vm3416_vm7, %v3186_v4, %v3276_v44  ;;  %v10091_v4 = vld [vmem:[%s12929_s5 + $0x8] sm:$0xff]   ;;  %v10118_v12 = vld [vmem:[%s12929_s5 + $0x178] sm:$0xff]  }
 0x205   :  { %v4059_v43 = vcombine.high %v4036_v23, %v4050_v19  ;;  %v9360_v36 = vcombine.low %v4024_v48, %v4050_v19  ;;  %v4060_v60 = vcombine.low %v4043_v21, %v4057_v42  ;;  %v4062_v59 = vcombine.low %v3448_v51, %v3496_v53  ;;  %9612 = vmatpush3.bf16.msra.mxu1 %v10091_v4  ;;  %v10100_v23 = vld [vmem:[%s12929_s5 + $0x150] sm:$0xff]   ;;  %v10109_v38 = vld [vmem:[%s12929_s5 + $0x28] sm:$0xff]   ;;  %v10119_v44 = vld [vmem:[%s12929_s5 + $0x138] sm:$0xff]  }
 0x206   :  { %v4401_v11 = vcombine.high %v4378_v47, %v4392_v13  ;;  %v4400_v29 = vcombine.low %v4378_v47, %v4392_v13  ;;  %v4077_v62 = vrot.slane %v4063_v50, %v10523_v14  ;;  %v4061_v54 = vcombine.high %v4043_v21, %v4057_v42  ;;  %9613 = vmatprep.subr.bf16.mxu1 %v10092_v2  ;;  %v10114_v48 = vld [vmem:[%s12929_s5 + $0x170] sm:$0xff]   ;;  %v9340_v50 = vld [vmem:[%s12928_s4] ss:$0 sm:$0xff] }
 0x207   :  { %v4399_v0 = vrot.slane %v9360_v36, %v10523_v14  ;;  %v4070_v15 = vrot.slane %v4062_v59, %v10523_v14  ;;  %v9361_v31 = vcombine.low %v4059_v43, %v4043_v21  ;;  %v9362_v39 = vcombine.high %v4050_v19, %v4060_v60  ;;  %9729 = vmatprep.subr.bf16.mxu0 %v10100_v23  ;;  %v10115_v19 = vld [vmem:[%s12929_s5 + $0x130] sm:$0xff]  }
 0x208   :  { %4770 = vmatprep.mubr.bf16.mxu1 %v4401_v11  ;;  %9730 = vmatpush3.bf16.msra.mxu0 %v10101_v40  ;;  %v4079_v51 = vcombine.high %v9340_v50, %v9340_v50 }
 0x209   :  { %4771 = vmatmul.mubr.bf16.gmra.mrb[32].mxu1 %v4400_v29  ;;  %v4403_v28 = vcombine.high %v4385_v8, %v4399_v0  ;;  %v4402_v20 = vcombine.low %v4385_v8, %v4399_v0  ;;  %v4078_v30 = vcombine.low %v4070_v15, %v4077_v62  ;;  %v9363_v9 = vcombine.low %v4061_v54, %v4070_v15 }
 0x20a   :  { %v4414_v10 = vrot.slane %v9361_v31, %v10523_v14  ;;  %v4421_v55 = vrot.slane %v9362_v39, %v10523_v14  ;;  %9614 = vmatpush3.bf16.msra.mxu1 %v10093_v27  ;;  %9731 = vmatprep.subr.bf16.mxu0 %v10104_v37  ;;  %v11404_v36 = vcombine.low %v9340_v50, %v4079_v51 }
 0x20b   :  { %9401 = vmatprep.mubr.msk.bf16.mxu0 %vm3416_vm7, %v4403_v28  ;;  %v9364_v49 = vcombine.high %v4057_v42, %v4078_v30  ;;  %v4428_v63 = vrot.slane %v9363_v9, %v10523_v14  ;;  %9615 = vmatprep.subr.bf16.mxu1 %v10095_v22  ;;  %v10117_v42 = vld [vmem:[%s12929_s5 + $0x38] sm:$0xff]   ;;  %v11417_v34 = vcombine.low %v4079_v51, %v9340_v50 }
 0x20c   :  { %4884 = vmatmul.mubr.bf16.gmra.mrb[84].mxu0 %v4402_v20 }
 0x20d   :  { %v4437_v46 = vcombine.high %v4414_v10, %v4428_v63  ;;  %v4436_v61 = vcombine.low %v4414_v10, %v4428_v63  ;;  %v4435_v35 = vrot.slane %v9364_v49, %v10523_v14  ;;  %9732 = vmatpush3.bf16.msra.mxu0 %v10105_v32  ;;  %v10120_v10 = vld [vmem:[%s12929_s5 + $0xc0] sm:$0xff]  }
 0x20e   :  { %9616 = vmatpush3.bf16.msra.mxu1 %v10097_v6  ;;  %9733 = vmatprep.subr.bf16.mxu0 %v10106_v33 }
 0x20f   :  { %4778 = vmatprep.mubr.bf16.mxu1 %v4437_v46  ;;  %v4439_v26 = vcombine.high %v4421_v55, %v4435_v35  ;;  %v4438_v3 = vcombine.low %v4421_v55, %v4435_v35  ;;  %9617 = vmatprep.subr.bf16.mxu1 %v10102_v16  ;;  %v11414_v35 = vcombine.low %v9340_v50, %v9340_v50 }
 0x211   :  { %4779 = vmatmul.mubr.bf16.gmra.mrb[36].mxu1 %v4436_v61  ;;  %9402 = vmatprep.mubr.msk.bf16.mxu0 %vm3416_vm7, %v4439_v26  ;;  %12969 = vst [vmem:[#allocation6_spill] sm:$0xff] %v11414_v35 }
 0x212   :  { %9618 = vmatpush3.bf16.msra.mxu1 %v10103_v24  ;;  %9734 = vmatpush3.bf16.msra.mxu0 %v10107_v25 }
 0x213   :  { %9619 = vmatprep.subr.bf16.mxu1 %v10108_v5  ;;  %9735 = vmatprep.subr.bf16.mxu0 %v10110_v17 }
 0x214   :  { %4892 = vmatmul.mubr.bf16.gmra.mrb[88].mxu0 %v4438_v3 }
 0x216   :  { %9620 = vmatpush3.bf16.msra.mxu1 %v10109_v38  ;;  %9736 = vmatpush3.bf16.msra.mxu0 %v10111_v41 }
 0x217   :  { %9621 = vmatprep.subr.bf16.mxu1 %v10112_v57  ;;  %9737 = vmatprep.subr.bf16.mxu0 %v10114_v48 }
 0x21a   :  { %9622 = vmatpush3.bf16.msra.mxu1 %v10113_v52  ;;  %9738 = vmatpush3.bf16.msra.mxu0 %v10115_v19 }
 0x21b   :  { %9623 = vmatprep.subr.bf16.mxu1 %v10116_v45  ;;  %9739 = vmatprep.subr.bf16.mxu0 %v10118_v12 }
 0x21e   :  { %9624 = vmatpush3.bf16.msra.mxu1 %v10117_v42  ;;  %9740 = vmatpush3.bf16.msra.mxu0 %v10119_v44 }
 0x21f   :  { %9667 = vmatprep.subr.bf16.mxu1 %v10120_v10 }
 0x269   :  { %v4821_v13 = vpop.f32.mrb[52].mxu0 }
 0x26a   :  { %v4823_v21 = vpop.f32.mrb[53].mxu0 }
 0x26b   :  { %v4824_v53 = vpop.f32.mrb[54].mxu0 }
 0x26c   :  { %v4826_v47 = vpop.f32.mrb[55].mxu0 }
 0x271   :  { %v9549_v43 = vpop.f32.mrb[0].mxu1 }
 0x272   :  { %v9550_v60 = vpop.f32.mrb[1].mxu1 }
 0x273   :  { %v9551_v59 = vadd.f32 %v9550_v60, %v9549_v43  ;;  %v9552_v11 = vpop.f32.mrb[2].mxu1 }
 0x274   :  { %v9553_v29 = vpop.f32.mrb[3].mxu1 }
 0x275   :  { %v4709_v8 = vadd.f32 %v9551_v59, %v11404_v36  ;;  %v9554_v0 = vadd.f32 %v9553_v29, %v9552_v11 }
 0x277   :  { %v4822_v4 = vadd.f32 %v4821_v13, %v4709_v8  ;;  %v4712_v62 = vadd.f32 %v9554_v0, %v11404_v36 }
 0x279   :  { %v4920_v54 = vcombine.high %v4822_v4, %v4822_v4  ;;  %v4825_v15 = vadd.f32 %v4824_v53, %v4712_v62  ;;  %v4960_v20 = vmax.f32 %v4822_v4, 0.0 }
 0x27b   :  { %v4961_v31 = vmax.f32 %v4920_v54, 0.0  ;;  %v4921_v28 = vcombine.high %v4825_v15, %v4825_v15  ;;  %v4962_v39 = vmax.f32 %v4825_v15, 0.0 }
 0x27d   :  { %v4963_v30 = vmax.f32 %v4921_v28, 0.0  ;;  %v5032_v9 = vcombine.low %v4960_v20, %v4961_v31 }
 0x27f   :  { %v5033_v49 = vcombine.low %v4962_v39, %v4963_v30 }
 0x281   :  { %v11411_v63 = vpack.c.bf16 %v5033_v49, %v5032_v9 }
 0x283   :  { %v5083_v46 = vshll.u32 %v11411_v63, 16  ;;  %v5081_v7 = vshrl.u32 %v11411_v63, 16  ;;  %v5224_v48 = vrot.slane %v11411_v63, 2  ;;  %v5320_v45 = vrot.slane %v11411_v63, 3 }
 0x284   :  { %v5144_v12 = vrot.slane %v11411_v63, 1 }
 0x285   :  { %v5085_v2 = vrot.slane %v5083_v46, 1  ;;  %v5248_v37 = vrot.slane %v5081_v7, 2  ;;  %v5249_v32 = vrot.slane %v5083_v46, 3  ;;  %v5152_v25 = vrot.slane %v5081_v7, 1 }
 0x286   :  { %v5153_v5 = vrot.slane %v5083_v46, 2 }
 0x287   :  { %v9555_v61 = vpop.f32.mrb[4].mxu1  ;;  %v4829_v55 = vpop.f32.mrb[56].mxu0  ;;  %v5086_v16 = vor.u32 %v5085_v2, %v5081_v7  ;;  %v5250_v50 = vor.u32 %v5249_v32, %v5248_v37 }
 0x288   :  { %v9556_v26 = vpop.f32.mrb[5].mxu1  ;;  %v4831_v3 = vpop.f32.mrb[57].mxu0  ;;  %v5154_v29 = vor.u32 %v5153_v5, %v5152_v25 }
 0x289   :  { %v9557_v27 = vadd.f32 %v9556_v26, %v9555_v61  ;;  %v9558_v22 = vpop.f32.mrb[6].mxu1  ;;  %v4832_v58 = vpop.f32.mrb[58].mxu0  ;;  %v5462_v44 = vcombine.low %v11411_v63, %v5086_v16  ;;  %v5463_v8 = vcombine.high %v11411_v63, %v5086_v16 }
 0x28a   :  { %v9559_v6 = vpop.f32.mrb[7].mxu1  ;;  %v4834_v56 = vpop.f32.mrb[59].mxu0 }
 0x28b   :  { %v4717_v23 = vadd.f32 %v9557_v27, %v11414_v35  ;;  %v9560_v40 = vadd.f32 %v9559_v6, %v9558_v22  ;;  %v11428_v20 = vrot.slane %v5462_v44, %v10268_v18  ;;  %v11436_v61 = vrot.slane %v5463_v8, %v10268_v18 }
 0x28d   :  { %v4830_v24 = vadd.f32 %v4829_v55, %v4717_v23  ;;  %v4720_v33 = vadd.f32 %v9560_v40, %v11417_v34 }
 0x28f   :  { %v4922_v38 = vcombine.high %v4830_v24, %v4830_v24  ;;  %v4964_v17 = vmax.f32 %v4830_v24, 0.0  ;;  %v4833_v57 = vadd.f32 %v4832_v58, %v4720_v33  ;;  %v9561_v41 = vpop.f32.mrb[8].mxu1  ;;  %v4837_v52 = vpop.f32.mrb[60].mxu0 }
 0x290   :  { %v9562_v19 = vpop.f32.mrb[9].mxu1  ;;  %v4839_v42 = vpop.f32.mrb[61].mxu0 }
 0x291   :  { %v4965_v13 = vmax.f32 %v4922_v38, 0.0  ;;  %v5065_v21 = vpack.c.bf16 %v4964_v17, %v4964_v17  ;;  %v4966_v53 = vmax.f32 %v4833_v57, 0.0  ;;  %v9564_v47 = vpop.f32.mrb[10].mxu1  ;;  %v4840_v51 = vpop.f32.mrb[62].mxu0  ;;  %v4923_v43 = vcombine.high %v4833_v57, %v4833_v57 }
 0x292   :  { %v9563_v60 = vadd.f32 %v9562_v19, %v9561_v41  ;;  %v9565_v59 = vpop.f32.mrb[11].mxu1  ;;  %v4842_v11 = vpop.f32.mrb[63].mxu0 }
 0x293   :  { %v5156_v0 = vshll.u32 %v5065_v21, 16  ;;  %v5225_v4 = vrot.slane %v5065_v21, 2  ;;  %v5251_v62 = vshrl.u32 %v5065_v21, 16  ;;  %v5321_v54 = vrot.slane %v5065_v21, 3 }
 0x294   :  { %v5034_v15 = vcombine.low %v4965_v13, %v4966_v53  ;;  %v4725_v31 = vadd.f32 %v9563_v60, %v11417_v34  ;;  %v9566_v28 = vadd.f32 %v9565_v59, %v9564_v47  ;;  %v4967_v3 = vmax.f32 %v4923_v43, 0.0 }
 0x295   :  { %v5158_v39 = vrot.slane %v5156_v0, 2  ;;  %v11431_v30 = vsel %vm1561_vm0, %v5224_v48, %v5225_v4  ;;  %v5253_v9 = vrot.slane %v5251_v62, 2  ;;  %v5254_v49 = vrot.slane %v5156_v0, 3 }
 0x296   :  { %v5322_v10 = vsel %vm3391_vm6, %v5320_v45, %v5321_v54  ;;  %v4838_v63 = vadd.f32 %v4837_v52, %v4725_v31  ;;  %v4728_v46 = vadd.f32 %v9566_v28, %v11404_v36 }
 0x297   :  { %v5255_v55 = vor.u32 %v5254_v49, %v5253_v9  ;;  %v5468_v26 = vcombine.high %v5322_v10, %v5322_v10  ;;  %v5159_v2 = vsel %vm3188_vm5, %v5154_v29, %v5158_v39  ;;  %v11446_v40 = vrot.slane %v5322_v10, %v10268_v18 }
 0x298   :  { %v4924_v27 = vcombine.high %v4838_v63, %v4838_v63  ;;  %v4968_v7 = vmax.f32 %v4838_v63, 0.0  ;;  %v4841_v22 = vadd.f32 %v4840_v51, %v4728_v46  ;;  %v5464_v58 = vcombine.low %v5144_v12, %v5159_v2 }
 0x299   :  { %v11440_v6 = vsel %vm3302_vm4, %v5250_v50, %v5255_v55  ;;  %v5465_v56 = vcombine.high %v5144_v12, %v5159_v2  ;;  %v11443_v23 = vrot.slane %v5468_v26, %v10268_v18 }
 0x29a   :  { %v5467_v16 = vcombine.high %v11431_v30, %v11440_v6  ;;  %v4969_v24 = vmax.f32 %v4924_v27, 0.0  ;;  %v5035_v37 = vcombine.low %v4967_v3, %v4968_v7  ;;  %v4925_v32 = vcombine.high %v4841_v22, %v4841_v22 }
 0x29b   :  { %v4970_v33 = vmax.f32 %v4841_v22, 0.0  ;;  %v5489_v25 = vrot.slane %v5464_v58, %v10268_v18  ;;  %v5496_v5 = vrot.slane %v5465_v56, %v10268_v18  ;;  %v5466_v38 = vcombine.low %v11431_v30, %v11440_v6 }
 0x29c   :  { %v11454_v17 = vpack.c.bf16 %v5035_v37, %v5034_v15  ;;  %v5067_v57 = vpack.c.bf16 %v4969_v24, %v4969_v24  ;;  %v4971_v41 = vmax.f32 %v4925_v32, 0.0  ;;  %v11457_v52 = vrot.slane %v5467_v16, %v10268_v18 }
 0x29d   :  { %v5525_v48 = vcombine.low %v11428_v20, %v5489_v25  ;;  %v5526_v45 = vcombine.high %v11428_v20, %v5489_v25  ;;  %v5527_v19 = vcombine.low %v11436_v61, %v5496_v5  ;;  %v5528_v42 = vcombine.high %v11436_v61, %v5496_v5 }
 0x29e   :  { %v5088_v12 = vshrl.u32 %v11454_v17, 16  ;;  %v5090_v44 = vshll.u32 %v11454_v17, 16  ;;  %v5164_v13 = vshll.u32 %v5067_v57, 16  ;;  %v5227_v21 = vrot.slane %v11454_v17, 2 }
 0x29f   :  { %v5228_v50 = vrot.slane %v5067_v57, 2  ;;  %v5260_v53 = vshrl.u32 %v5067_v57, 16  ;;  %v5323_v47 = vrot.slane %v11454_v17, 3  ;;  %v5324_v51 = vrot.slane %v5067_v57, 3 }
 0x2a0   :  { %v5160_v43 = vrot.slane %v5088_v12, 1  ;;  %v5161_v60 = vrot.slane %v5090_v44, 2  ;;  %v5166_v59 = vrot.slane %v5164_v13, 2  ;;  %v5257_v11 = vrot.slane %v5088_v12, 2 }
 0x2a1   :  { %v11468_v29 = vsel %vm1561_vm0, %v5227_v21, %v5228_v50  ;;  %v5258_v8 = vrot.slane %v5090_v44, 3  ;;  %v5262_v0 = vrot.slane %v5260_v53, 2  ;;  %v5263_v4 = vrot.slane %v5164_v13, 3 }
 0x2a2   :  { %v5162_v62 = vor.u32 %v5161_v60, %v5160_v43  ;;  %v11471_v54 = vsel %vm3391_vm6, %v5323_v47, %v5324_v51  ;;  %v11473_v15 = vcombine.low %v4970_v33, %v4971_v41  ;;  %v5092_v31 = vrot.slane %v5090_v44, 1 }
 0x2a3   :  { %v5259_v28 = vor.u32 %v5258_v8, %v5257_v11  ;;  %v5264_v20 = vor.u32 %v5263_v4, %v5262_v0  ;;  %v11479_v9 = vrot.slane %v11471_v54, %v10268_v18  ;;  %v9567_v49 = vpop.f32.mrb[12].mxu1  ;;  %v12938_v61 = vrot.slane %v11454_v17, 1 }
 0x2a4   :  { %v11482_v10 = vsel %vm3188_vm5, %v5162_v62, %v5166_v59  ;;  %v9568_v63 = vpop.f32.mrb[13].mxu1  ;;  %v11484_v46 = vor.u32 %v5092_v31, %v5088_v12  ;;  %v5531_v55 = vcombine.low %v11457_v52, %v11443_v23  ;;  %v5539_v27 = vrot.slane %v5525_v48, %v10268_v18 }
 0x2a5   :  { %v11490_v26 = vsel %vm3302_vm4, %v5259_v28, %v5264_v20  ;;  %v9569_v3 = vadd.f32 %v9568_v63, %v9567_v49  ;;  %v9570_v2 = vpop.f32.mrb[14].mxu1  ;;  %v5546_v7 = vrot.slane %v5527_v19, %v10268_v18  ;;  %v5553_v16 = vrot.slane %v5526_v45, %v10268_v18 }
 0x2a6   :  { %v9571_v56 = vpop.f32.mrb[15].mxu1  ;;  %v5560_v24 = vrot.slane %v5528_v42, %v10268_v18  ;;  %v11502_v33 = vrot.slane %v5531_v55, %v10268_v18  ;;  %v5596_v25 = vcombine.low %v11454_v17, %v11484_v46  ;;  %v5598_v57 = vcombine.low %v12938_v61, %v11482_v10 }
 0x2a7   :  { %v9572_v37 = vadd.f32 %v9571_v56, %v9570_v2  ;;  %v4733_v32 = vadd.f32 %v9569_v3, %v11404_v36  ;;  %v9404_v41 = vcombine.low %v5539_v27, %v5553_v16  ;;  %v9406_v48 = vcombine.high %v5539_v27, %v5553_v16 }
 0x2a8   :  { %v4845_v5 = vpop.f32.mrb[64].mxu0  ;;  %v9408_v19 = vcombine.low %v5546_v7, %v5560_v24  ;;  %v5592_v44 = vcombine.high %v5546_v7, %v11502_v33  ;;  %v11512_v13 = vrot.slane %v5596_v25, %v10268_v18  ;;  %v11515_v50 = vrot.slane %v5598_v57, %v10268_v18 }
 0x2a9   :  { %v4846_v45 = vadd.f32 %v4845_v5, %v4733_v32  ;;  %v4847_v12 = vpop.f32.mrb[65].mxu0  ;;  %v4736_v42 = vadd.f32 %v9572_v37, %v11414_v35  ;;  %v6565_v53 = vrot.slane %v9404_v41, %v10268_v18  ;;  %v6579_v47 = vrot.slane %v9406_v48, %v10268_v18 }
 0x2aa   :  { %v4848_v21 = vpop.f32.mrb[66].mxu0  ;;  %v11520_v51 = vrot.slane %v9408_v19, %v10268_v18  ;;  %v11526_v0 = vrot.slane %v5466_v38, %v10268_v18  ;;  %v5659_v62 = vcombine.low %v11512_v13, %v11515_v50  ;;  %v5532_v20 = vcombine.high %v11457_v52, %v11443_v23 }
 0x2ab   :  { %v4926_v43 = vcombine.high %v4846_v45, %v4846_v45  ;;  %v4972_v60 = vmax.f32 %v4846_v45, 0.0  ;;  %v4849_v59 = vadd.f32 %v4848_v21, %v4736_v42  ;;  %v4850_v11 = vpop.f32.mrb[67].mxu0  ;;  %v9573_v8 = vpop.f32.mrb[16].mxu1  ;;  %v6615_v31 = vcombine.low %v6565_v53, %v6579_v47 }
 0x2ac   :  { %v9574_v4 = vpop.f32.mrb[17].mxu1  ;;  %v6616_v28 = vcombine.high %v6565_v53, %v6579_v47  ;;  %v11533_v7 = vrot.slane %v5659_v62, %v10268_v18  ;;  %v5529_v38 = vcombine.low %v11526_v0, %v11446_v40  ;;  %v5530_v57 = vcombine.high %v11526_v0, %v11446_v40 }
 0x2ad   :  { %v4973_v49 = vmax.f32 %v4926_v43, 0.0  ;;  %v4927_v63 = vcombine.high %v4849_v59, %v4849_v59  ;;  %v4974_v55 = vmax.f32 %v4849_v59, 0.0  ;;  %v9575_v3 = vadd.f32 %v9574_v4, %v9573_v8  ;;  %v9576_v2 = vpop.f32.mrb[18].mxu1 }
 0x2ae   :  { %v9577_v27 = vpop.f32.mrb[19].mxu1  ;;  %v11536_v30 = vrot.slane %v6616_v28, %v10268_v18  ;;  %v11539_v6 = vrot.slane %v6615_v31, %v10268_v18  ;;  %v9410_v5 = vcombine.low %v5592_v44, %v11533_v7  ;;  %v11548_v41 = vrot.slane %v5529_v38, %v10268_v18 }
 0x2af   :  { %v5037_v56 = vcombine.low %v4972_v60, %v4973_v49  ;;  %v4975_v16 = vmax.f32 %v4927_v63, 0.0  ;;  %v5069_v24 = vpack.c.bf16 %v4974_v55, %v4974_v55  ;;  %v9578_v37 = vadd.f32 %v9577_v27, %v9576_v2 }
 0x2b0   :  { %12970 = vst [vmem:[#allocation7_spill] sm:$0xff] %v11536_v30  ;;  %12971 = vst [vmem:[#allocation8_spill] sm:$0xff] %v11539_v6  ;;  %v4741_v32 = vadd.f32 %v9575_v3, %v11417_v34  ;;  %v4853_v25 = vpop.f32.mrb[68].mxu0  ;;  %v6607_v44 = vrot.slane %v9410_v5, %v10268_v18 }
 0x2b1   :  { %v11551_v48 = vpack.c.bf16 %v5037_v56, %v11473_v15  ;;  %v5172_v19 = vshll.u32 %v5069_v24, 16  ;;  %v5231_v45 = vrot.slane %v5069_v24, 2  ;;  %v5269_v12 = vshrl.u32 %v5069_v24, 16  ;;  %v4855_v42 = vpop.f32.mrb[69].mxu0 }
 0x2b2   :  { %v5327_v21 = vrot.slane %v5069_v24, 3  ;;  %v4854_v53 = vadd.f32 %v4853_v25, %v4741_v32  ;;  %v4744_v47 = vadd.f32 %v9578_v37, %v11417_v34  ;;  %v4856_v43 = vpop.f32.mrb[70].mxu0 }
 0x2b3   :  { %v11556_v60 = vshrl.u32 %v11551_v48, 16  ;;  %v11559_v59 = vshll.u32 %v11551_v48, 16  ;;  %v5146_v15 = vrot.slane %v11551_v48, 1  ;;  %v5174_v11 = vrot.slane %v5172_v19, 2  ;;  %v4858_v8 = vpop.f32.mrb[71].mxu0  ;;  %v9579_v4 = vpop.f32.mrb[20].mxu1 }
 0x2b4   :  { %v5230_v62 = vrot.slane %v11551_v48, 2  ;;  %v5271_v31 = vrot.slane %v5269_v12, 2  ;;  %v5272_v28 = vrot.slane %v5172_v19, 3  ;;  %v5326_v49 = vrot.slane %v11551_v48, 3  ;;  %v9580_v63 = vpop.f32.mrb[21].mxu1 }
 0x2b5   :  { %v5168_v55 = vrot.slane %v11556_v60, 1  ;;  %v5169_v3 = vrot.slane %v11559_v59, 2  ;;  %v5266_v2 = vrot.slane %v11556_v60, 2  ;;  %v5267_v27 = vrot.slane %v11559_v59, 3  ;;  %v9582_v38 = vpop.f32.mrb[22].mxu1 }
 0x2b6   :  { %v11569_v56 = vsel %vm1561_vm0, %v5230_v62, %v5231_v45  ;;  %v5273_v24 = vor.u32 %v5272_v28, %v5271_v31  ;;  %v5328_v37 = vsel %vm3391_vm6, %v5326_v49, %v5327_v21  ;;  %v4928_v32 = vcombine.high %v4854_v53, %v4854_v53  ;;  %v9583_v25 = vpop.f32.mrb[23].mxu1 }
 0x2b7   :  { %v5170_v5 = vor.u32 %v5169_v3, %v5168_v55  ;;  %v5268_v19 = vor.u32 %v5267_v27, %v5266_v2  ;;  %v5736_v12 = vcombine.high %v5328_v37, %v5328_v37  ;;  %v11573_v42 = vrot.slane %v5328_v37, %v10268_v18 }
 0x2b8   :  { %v4976_v8 = vmax.f32 %v4854_v53, 0.0  ;;  %v4977_v1 = vmax.f32 %v4928_v32, 0.0  ;;  %v4857_v39 = vadd.f32 %v4856_v43, %v4744_v47  ;;  %v9581_v58 = vadd.f32 %v9580_v63, %v9579_v4  ;;  %v4861_v61 = vpop.f32.mrb[72].mxu0 }
 0x2b9   :  { %v5175_v22 = vsel %vm3188_vm5, %v5170_v5, %v5174_v11  ;;  %v11577_v45 = vsel %vm3302_vm4, %v5268_v19, %v5273_v24  ;;  %v11580_v21 = vrot.slane %v5736_v12, %v10268_v18  ;;  %v9584_v62 = vadd.f32 %v9583_v25, %v9582_v38  ;;  %v4863_v31 = vpop.f32.mrb[73].mxu0  ;;  %v10121_v19 = vld [vmem:[%s12929_s5 + $0x80] sm:$0xff]  }
 0x2ba   :  { %v11582_v28 = vcombine.low %v5146_v15, %v5175_v22  ;;  %v11584_v49 = vcombine.high %v5146_v15, %v5175_v22  ;;  %v5735_v47 = vcombine.high %v11569_v56, %v11577_v45  ;;  %v4864_v43 = vpop.f32.mrb[74].mxu0  ;;  %v5038_v11 = vcombine.low %v4975_v16, %v4976_v8  ;;  %v10122_v8 = vld [vmem:[%s12929_s5 + $0xc8] sm:$0xff]  }
 0x2bb   :  { %v4929_v4 = vcombine.high %v4857_v39, %v4857_v39  ;;  %v4978_v63 = vmax.f32 %v4857_v39, 0.0  ;;  %v4749_v55 = vadd.f32 %v9581_v58, %v11404_v36  ;;  %v4866_v3 = vpop.f32.mrb[75].mxu0  ;;  %v4752_v27 = vadd.f32 %v9584_v62, %v11404_v36 }
 0x2bc   :  { %v11592_v2 = vrot.slane %v5735_v47, %v10268_v18  ;;  %v6619_v22 = vcombine.low %v11520_v51, %v6607_v44  ;;  %v6620_v15 = vcombine.high %v11520_v51, %v6607_v44  ;;  %v11601_v39 = vrot.slane %v5530_v57, %v10268_v18 }
 0x2bd   :  { %v4979_v38 = vmax.f32 %v4929_v4, 0.0  ;;  %v5039_v24 = vcombine.low %v4977_v1, %v4978_v63  ;;  %v4862_v37 = vadd.f32 %v4861_v61, %v4749_v55  ;;  %v4865_v58 = vadd.f32 %v4864_v43, %v4752_v27 }
 0x2be   :  { %v11604_v16 = vrot.slane %v6620_v15, %v10268_v18  ;;  %v11607_v32 = vrot.slane %v6619_v22, %v10268_v18  ;;  %v11613_v51 = vrot.slane %v5532_v20, %v10268_v18 }
 0x2bf   :  { %v11615_v1 = vpack.c.bf16 %v5039_v24, %v5038_v11  ;;  %v5071_v61 = vpack.c.bf16 %v4979_v38, %v4979_v38  ;;  %v4930_v44 = vcombine.high %v4862_v37, %v4862_v37  ;;  %v4980_v40 = vmax.f32 %v4862_v37, 0.0  ;;  %v10123_v38 = vld [vmem:[%s12929_s5 + $0x88] sm:$0xff]  }
 0x2c0   :  { %12972 = vst [vmem:[#allocation9_spill] sm:$0xff] %v11604_v16  ;;  %12973 = vst [vmem:[#allocation10_spill] sm:$0xff] %v11607_v32  ;;  %v4931_v0 = vcombine.high %v4865_v58, %v4865_v58  ;;  %v4982_v57 = vmax.f32 %v4865_v58, 0.0  ;;  %v6683_v25 = vcombine.low %v11536_v30, %v11604_v16  ;;  %v6679_v5 = vcombine.low %v11539_v6, %v11607_v32  ;;  %v10129_v30 = vld [vmem:[%s12929_s5 + $0xa0] sm:$0xff]  }
 0x2c1   :  { %v11625_v23 = vshrl.u32 %v11615_v1, 16  ;;  %v11628_v52 = vshll.u32 %v11615_v1, 16  ;;  %v5147_v20 = vrot.slane %v11615_v1, 1  ;;  %v5180_v12 = vshll.u32 %v5071_v61, 16 }
 0x2c2   :  { %v5233_v62 = vrot.slane %v11615_v1, 2  ;;  %v5234_v31 = vrot.slane %v5071_v61, 2  ;;  %v5278_v47 = vshrl.u32 %v5071_v61, 16  ;;  %v5329_v43 = vrot.slane %v11615_v1, 3  ;;  %7967 = vmatprep.mubr.bf16.mxu1 %v6683_v25 }
 0x2c3   :  { %v5176_v11 = vrot.slane %v11625_v23, 1  ;;  %v5177_v4 = vrot.slane %v11628_v52, 2  ;;  %v5182_v63 = vrot.slane %v5180_v12, 2  ;;  %v5275_v55 = vrot.slane %v11625_v23, 2  ;;  %7968 = vmatmul.mubr.bf16.vlgmr.msra.gmra.mrb[40].mxu1 %v6679_v5  ;;  %v10124_v5 = vld [vmem:[%s12929_s5 + $0xd0] sm:$0xff]  }
 0x2c4   :  { %v5235_v3 = vsel %vm1561_vm0, %v5233_v62, %v5234_v31  ;;  %v5276_v27 = vrot.slane %v11628_v52, 3  ;;  %v5280_v22 = vrot.slane %v5278_v47, 2  ;;  %v5281_v15 = vrot.slane %v5180_v12, 3  ;;  %9668 = vmatpush3.bf16.msra.mxu1 %v10121_v19 }
 0x2c5   :  { %v5178_v24 = vor.u32 %v5177_v4, %v5176_v11  ;;  %v5330_v37 = vrot.slane %v5071_v61, 3  ;;  %v4981_v58 = vmax.f32 %v4930_v44, 0.0  ;;  %v4983_v25 = vmax.f32 %v4931_v0, 0.0  ;;  %9669 = vmatprep.subr.bf16.mxu1 %v10122_v8 }
 0x2c6   :  { %v5277_v53 = vor.u32 %v5276_v27, %v5275_v55  ;;  %v5282_v62 = vor.u32 %v5281_v15, %v5280_v22  ;;  %v12974_v12 = vcombine.low %v11468_v29, %v11490_v26  ;;  %v9405_v31 = vcombine.low %v11548_v41, %v11601_v39  ;;  %v10125_v27 = vld [vmem:[%s12929_s5 + $0x90] sm:$0xff]  }
 0x2c7   :  { %v5183_v61 = vsel %vm3188_vm5, %v5178_v24, %v5182_v63  ;;  %v5331_v44 = vsel %vm3391_vm6, %v5329_v43, %v5330_v37  ;;  %v5040_v0 = vcombine.low %v4980_v40, %v4981_v58  ;;  %v5041_v8 = vcombine.low %v4982_v57, %v4983_v25 }
 0x2c8   :  { %v11651_v19 = vrot.slane %v12974_v12, %v10268_v18  ;;  %v5283_v47 = vsel %vm3302_vm4, %v5277_v53, %v5282_v62  ;;  %v11658_v11 = vcombine.low %v5147_v20, %v5183_v61  ;;  %v11660_v4 = vcombine.high %v5147_v20, %v5183_v61  ;;  %9670 = vmatpush3.bf16.msra.mxu1 %v10123_v38  ;;  %v10126_v53 = vld [vmem:[%s12929_s5 + $0xd8] sm:$0xff]  }
 0x2c9   :  { %v5870_v55 = vcombine.high %v5331_v44, %v5331_v44  ;;  %v5868_v22 = vcombine.low %v5235_v3, %v5283_v47  ;;  %v5869_v15 = vcombine.high %v5235_v3, %v5283_v47  ;;  %v11666_v63 = vrot.slane %v5331_v44, %v10268_v18  ;;  %v9585_v40 = vpop.f32.mrb[24].mxu1  ;;  %9671 = vmatprep.subr.bf16.mxu1 %v10124_v5  ;;  %v4869_v38 = vpop.f32.mrb[76].mxu0  ;;  %v10127_v44 = vld [vmem:[%s12929_s5 + $0x98] sm:$0xff]  }
 0x2ca   :  { %12975 = vst [vmem:[#allocation11_spill] sm:$0xff] %v11660_v4  ;;  %v11668_v43 = vpack.c.bf16 %v5041_v8, %v5040_v0  ;;  %v9586_v20 = vpop.f32.mrb[25].mxu1  ;;  %v5663_v24 = vcombine.low %v11651_v19, %v11479_v9  ;;  %v9407_v3 = vcombine.high %v11548_v41, %v11601_v39  ;;  %v9409_v37 = vcombine.low %v11502_v33, %v11613_v51  ;;  %v4871_v61 = vpop.f32.mrb[77].mxu0 }
 0x2cb   :  { %12976 = vst [vmem:[#allocation12_spill] sm:$0xff] %v11666_v63  ;;  %v11674_v57 = vrot.slane %v5870_v55, %v10268_v18  ;;  %v11683_v58 = vrot.slane %v5868_v22, %v10268_v18  ;;  %v11686_v25 = vrot.slane %v5869_v15, %v10268_v18  ;;  %v9587_v5 = vadd.f32 %v9586_v20, %v9585_v40  ;;  %v9588_v62 = vpop.f32.mrb[26].mxu1  ;;  %v4872_v47 = vpop.f32.mrb[78].mxu0  ;;  %v10128_v61 = vld [vmem:[%s12929_s5 + $0xe0] sm:$0xff]  }
 0x2cc   :  { %v11689_v12 = vshrl.u32 %v11668_v43, 16  ;;  %v11695_v41 = vshll.u32 %v11668_v43, 16  ;;  %v9589_v8 = vpop.f32.mrb[27].mxu1  ;;  %9672 = vmatpush3.bf16.msra.mxu1 %v10125_v27  ;;  %v4874_v20 = vpop.f32.mrb[79].mxu0  ;;  %v11713_v22 = vrot.slane %v5663_v24, %v10268_v18  ;;  %v6600_v6 = vrot.slane %v9409_v37, %v10268_v18 }
 0x2cd   :  { %12977 = vst [vmem:[#allocation13_spill] sm:$0xff] %v11674_v57  ;;  %12978 = vst [vmem:[#allocation14_spill] sm:$0xff] %v11686_v25  ;;  %v4757_v15 = vadd.f32 %v9587_v5, %v11414_v35  ;;  %9673 = vmatprep.subr.bf16.mxu1 %v10126_v53  ;;  %v9590_v55 = vadd.f32 %v9589_v8, %v9588_v62  ;;  %v6572_v5 = vrot.slane %v9405_v31, %v10268_v18 }
 0x2ce   :  { %12979 = vst [vmem:[#allocation15_spill] sm:$0xff] %v11689_v12  ;;  %12980 = vst [vmem:[#allocation16_spill] sm:$0xff] %v11695_v41  ;;  %v5184_v40 = vrot.slane %v11689_v12, 1  ;;  %v5185_v39 = vrot.slane %v11695_v41, 2  ;;  %v5284_v27 = vrot.slane %v11689_v12, 2  ;;  %v5285_v0 = vrot.slane %v11695_v41, 3 }
 0x2cf   :  { %v4870_v51 = vadd.f32 %v4869_v38, %v4757_v15  ;;  %v6586_v20 = vrot.slane %v9407_v3, %v10268_v18  ;;  %v4760_v32 = vadd.f32 %v9590_v55, %v11417_v34  ;;  %v5723_v24 = vcombine.low %v11533_v7, %v11713_v22  ;;  %v10130_v3 = vld [vmem:[%s12929_s5 + $0xe8] sm:$0xff]  }
 0x2d0   :  { %v5186_v53 = vor.u32 %v5185_v39, %v5184_v40  ;;  %v5286_v14 = vor.u32 %v5285_v0, %v5284_v27  ;;  %9674 = vmatpush3.bf16.msra.mxu1 %v10127_v44  ;;  %v5099_v55 = vrot.slane %v11559_v59, 1  ;;  %v5597_v15 = vcombine.high %v11454_v17, %v11484_v46  ;;  %v10131_v46 = vld [vmem:[%s12929_s5 + $0xa8] sm:$0xff]  }
 0x2d1   :  { %v4932_v62 = vcombine.high %v4870_v51, %v4870_v51  ;;  %v4984_v38 = vmax.f32 %v4870_v51, 0.0  ;;  %v6617_v8 = vcombine.low %v6572_v5, %v6586_v20  ;;  %v9591_v31 = vpop.f32.mrb[28].mxu1  ;;  %9675 = vmatprep.subr.bf16.mxu1 %v10128_v61  ;;  %v6618_v37 = vcombine.high %v6572_v5, %v6586_v20  ;;  %v4877_v44 = vpop.f32.mrb[80].mxu0 }
 0x2d2   :  { %v4873_v39 = vadd.f32 %v4872_v47, %v4760_v32  ;;  %v9592_v0 = vpop.f32.mrb[29].mxu1  ;;  %v9411_v27 = vcombine.high %v11502_v33, %v5723_v24  ;;  %v4879_v25 = vpop.f32.mrb[81].mxu0  ;;  %v12983_v41 = vrot.slane %v11668_v43, 3 }
 0x2d3   :  { %v4985_v51 = vmax.f32 %v4932_v62, 0.0  ;;  %v5073_v40 = vpack.c.bf16 %v4984_v38, %v4984_v38  ;;  %v11732_v16 = vrot.slane %v6617_v8, %v10268_v18  ;;  %v9594_v61 = vpop.f32.mrb[30].mxu1  ;;  %v6650_v57 = vrot.slane %v6618_v37, %v10268_v18  ;;  %v11735_v4 = vpop.f32.mrb[82].mxu0 }
 0x2d4   :  { %v4933_v5 = vcombine.high %v4873_v39, %v4873_v39  ;;  %v4986_v32 = vmax.f32 %v4873_v39, 0.0  ;;  %v9593_v47 = vadd.f32 %v9592_v0, %v9591_v31  ;;  %v9595_v20 = vpop.f32.mrb[31].mxu1  ;;  %9676 = vmatpush3.bf16.msra.mxu1 %v10129_v30  ;;  %v4882_v24 = vpop.f32.mrb[83].mxu0  ;;  %v6614_v25 = vrot.slane %v9411_v27, %v10268_v18 }
 0x2d5   :  { %12981 = vst [vmem:[#allocation17_spill] sm:$0xff] %v11732_v16  ;;  %v5188_v59 = vshll.u32 %v5073_v40, 16  ;;  %v5237_v33 = vrot.slane %v5073_v40, 2  ;;  %v5287_v62 = vshrl.u32 %v5073_v40, 16  ;;  %v5333_v38 = vrot.slane %v5073_v40, 3  ;;  %9677 = vmatprep.subr.bf16.mxu1 %v10130_v3 }
 0x2d6   :  { %v4987_v8 = vmax.f32 %v4933_v5, 0.0  ;;  %v5042_v37 = vcombine.low %v4985_v51, %v4986_v32  ;;  %v4765_v31 = vadd.f32 %v9593_v47, %v11417_v34  ;;  %v12982_v0 = vrot.slane %v11668_v43, 2 }
 0x2d7   :  { %v5190_v39 = vrot.slane %v5188_v59, 2  ;;  %v5289_v12 = vrot.slane %v5287_v62, 2  ;;  %v5290_v35 = vrot.slane %v5188_v59, 3  ;;  %v5334_v40 = vsel %vm3391_vm6, %v12983_v41, %v5333_v38 }
 0x2d8   :  { %v11745_v30 = vsel %vm1561_vm0, %v12982_v0, %v5237_v33  ;;  %v6621_v24 = vcombine.low %v6600_v6, %v6614_v25  ;;  %v6622_v3 = vcombine.high %v6600_v6, %v6614_v25  ;;  %v4878_v63 = vadd.f32 %v4877_v44, %v4765_v31  ;;  %9678 = vmatpush3.bf16.msra.mxu1 %v10131_v46  ;;  %v10132_v46 = vld [vmem:[%s12929_s5 + $0xf0] sm:$0xff]  }
 0x2d9   :  { %v5191_v51 = vsel %vm3188_vm5, %v5186_v53, %v5190_v39  ;;  %v5291_v27 = vor.u32 %v5290_v35, %v5289_v12  ;;  %v6004_v5 = vcombine.high %v5334_v40, %v5334_v40  ;;  %v11752_v32 = vrot.slane %v5334_v40, %v10268_v18  ;;  %9679 = vmatprep.subr.bf16.mxu1 %v10132_v46 }
 0x2da   :  { %v12984_v47 = vrot.slane %v11668_v43, 1  ;;  %v6678_v41 = vrot.slane %v6622_v3, %v10268_v18  ;;  %v11764_v6 = vrot.slane %v6621_v24, %v10268_v18  ;;  %v4934_v12 = vcombine.high %v4878_v63, %v4878_v63 }
 0x2db   :  { %v11767_v53 = vsel %vm3302_vm4, %v5286_v14, %v5291_v27  ;;  %v11770_v35 = vrot.slane %v6004_v5, %v10268_v18  ;;  %v4988_v44 = vmax.f32 %v4878_v63, 0.0  ;;  %v10133_v63 = vld [vmem:[%s12929_s5 + $0xb0] sm:$0xff]   ;;  %v9596_v24 = vadd.f32 %v9595_v20, %v9594_v61 }
 0x2dc   :  { %v11756_v33 = vcombine.low %v12984_v47, %v5191_v51  ;;  %v12985_v59 = vmov %v12984_v47  ;;  %12987 = vst [vmem:[#allocation19_spill] sm:$0xff] %v11764_v6  ;;  %v6003_v25 = vcombine.high %v11745_v30, %v11767_v53  ;;  %v6685_v31 = vcombine.low %v6650_v57, %v6678_v41  ;;  %v11781_v39 = vpop.f32.mrb[32].mxu1  ;;  %9680 = vmatpush3.bf16.msra.mxu1 %v10133_v63 }
 0x2dd   :  { %v11760_v62 = vcombine.high %v12985_v59, %v5191_v51  ;;  %12988 = vst [vmem:[#allocation20_spill] sm:$0xff] %v11770_v35  ;;  %v6681_v14 = vcombine.low %v11732_v16, %v11764_v6  ;;  %v4989_v0 = vmax.f32 %v4934_v12, 0.0  ;;  %v5043_v40 = vcombine.low %v4987_v8, %v4988_v44  ;;  %v11789_v51 = vpop.f32.mrb[33].mxu1 }
 0x2de   :  { %v11787_v3 = vor.u32 %v5099_v55, %v11556_v60  ;;  %v11792_v57 = vrot.slane %v6003_v25, %v10268_v18  ;;  %8145 = vmatprep.mubr.bf16.mxu0 %v6685_v31  ;;  %v12990_v27 = vrot.slane %v11454_v17, 1  ;;  %v11798_v47 = vrot.slane %v5597_v15, %v10268_v18  ;;  %v11806_v55 = vpop.f32.mrb[34].mxu1 }
 0x2df   :  { %12986 = vst [vmem:[#allocation18_spill] sm:$0xff] %v11760_v62  ;;  %v12991_v61 = vcombine.high %v11468_v29, %v11490_v26  ;;  %8146 = vmatmul.mubr.bf16.vlgmr.msra.gmra.mrb[92].mxu0 %v6681_v14  ;;  %v11808_v20 = vpack.c.bf16 %v5043_v40, %v5042_v37  ;;  %v5075_v8 = vpack.c.bf16 %v4989_v0, %v4989_v0  ;;  %v11817_v15 = vpop.f32.mrb[35].mxu1  ;;  %v11819_v41 = vpop.f32.mrb[84].mxu0 }
 0x2e0   :  { %12989 = vst [vmem:[#allocation21_spill] sm:$0xff] %v11792_v57  ;;  %v5599_v5 = vcombine.high %v12990_v27, %v11482_v10  ;;  %v4768_v59 = vadd.f32 %v9596_v24, %v11404_v36  ;;  %v12993_v17 = vcombine.high %v11471_v54, %v11471_v54  ;;  %v5660_v26 = vcombine.high %v11512_v13, %v11515_v50  ;;  %v4887_v44 = vpop.f32.mrb[85].mxu0 }
 0x2e1   :  { %v11804_v60 = vrot.slane %v12991_v61, %v10268_v18  ;;  %12992 = vst [vmem:[#allocation22_spill] sm:$0xff] %v11808_v20  ;;  %v5664_v37 = vcombine.high %v11651_v19, %v11479_v9  ;;  %v5724_v12 = vcombine.high %v11533_v7, %v11713_v22  ;;  %v11829_v54 = vshrl.u32 %v11808_v20, 16  ;;  %v11835_v14 = vpop.f32.mrb[86].mxu0 }
 0x2e2   :  { %v11815_v10 = vrot.slane %v12993_v17, %v10268_v18  ;;  %v5630_v29 = vrot.slane %v5599_v5, %v10268_v18  ;;  %v11832_v46 = vshll.u32 %v11808_v20, 16  ;;  %v5149_v25 = vrot.slane %v11808_v20, 1  ;;  %v4890_v7 = vpop.f32.mrb[87].mxu0 }
 0x2e3   :  { %v5196_v31 = vshll.u32 %v5075_v8, 16  ;;  %v5239_v13 = vrot.slane %v11808_v20, 2  ;;  %v5240_v50 = vrot.slane %v5075_v8, 2  ;;  %v5296_v9 = vshrl.u32 %v5075_v8, 16 }
 0x2e4   :  { %v5335_v19 = vrot.slane %v11808_v20, 3  ;;  %v5192_v63 = vrot.slane %v11829_v54, 1  ;;  %v5193_v0 = vrot.slane %v11832_v46, 2  ;;  %v5293_v24 = vrot.slane %v11829_v54, 2  ;;  %v11844_v44 = vpop.f32.mrb[36].mxu1 }
 0x2e5   :  { %v5198_v40 = vrot.slane %v5196_v31, 2  ;;  %v5241_v27 = vsel %vm1561_vm0, %v5239_v13, %v5240_v50  ;;  %v5294_v5 = vrot.slane %v11832_v46, 3  ;;  %v5298_v61 = vrot.slane %v5296_v9, 2  ;;  %v11848_v20 = vpop.f32.mrb[37].mxu1 }
 0x2e6   :  { %v5299_v17 = vrot.slane %v5196_v31, 3  ;;  %v5194_v38 = vor.u32 %v5193_v0, %v5192_v63  ;;  %v5336_v16 = vrot.slane %v5075_v8, 3  ;;  %v4881_v6 = vadd.f32 %v11735_v4, %v4768_v59  ;;  %v11853_v50 = vpop.f32.mrb[38].mxu1 }
 0x2e7   :  { %v5661_v7 = vcombine.low %v11798_v47, %v5630_v29  ;;  %v5295_v57 = vor.u32 %v5294_v5, %v5293_v24  ;;  %v5662_v62 = vcombine.high %v11798_v47, %v5630_v29  ;;  %v5665_v13 = vcombine.low %v11804_v60, %v11815_v10  ;;  %v11857_v4 = vpop.f32.mrb[39].mxu1  ;;  %v11859_v59 = vpop.f32.mrb[88].mxu0 }
 0x2e8   :  { %v5300_v35 = vor.u32 %v5299_v17, %v5298_v61  ;;  %v5199_v31 = vsel %vm3188_vm5, %v5194_v38, %v5198_v40  ;;  %v5337_v9 = vsel %vm3391_vm6, %v5335_v19, %v5336_v16  ;;  %v4935_v8 = vcombine.high %v4881_v6, %v4881_v6  ;;  %v4895_v5 = vpop.f32.mrb[89].mxu0 }
 0x2e9   :  { %v4990_v63 = vmax.f32 %v4881_v6, 0.0  ;;  %v11862_v24 = vcombine.low %v5149_v25, %v5199_v31  ;;  %v11864_v47 = vcombine.high %v5149_v25, %v5199_v31  ;;  %v6138_v29 = vcombine.high %v5337_v9, %v5337_v9  ;;  %v11869_v19 = vpop.f32.mrb[90].mxu0 }
 0x2ea   :  { %v5301_v0 = vsel %vm3302_vm4, %v5295_v57, %v5300_v35  ;;  %v11867_v38 = vrot.slane %v5337_v9, %v10268_v18  ;;  %v4991_v16 = vmax.f32 %v4935_v8, 0.0  ;;  %v5680_v40 = vrot.slane %v5661_v7, %v10268_v18  ;;  %v4898_v25 = vpop.f32.mrb[91].mxu0 }
 0x2eb   :  { %v6136_v61 = vcombine.low %v5241_v27, %v5301_v0  ;;  %v6137_v17 = vcombine.high %v5241_v27, %v5301_v0  ;;  %v11872_v6 = vrot.slane %v6138_v29, %v10268_v18  ;;  %v5687_v35 = vrot.slane %v5660_v26, %v10268_v18  ;;  %v10134_v27 = vld [vmem:[%s12929_s5 + $0xf8] sm:$0xff]  }
 0x2ec   :  { %12994 = vst [vmem:[#allocation23_spill] sm:$0xff] %v11867_v38  ;;  %v5694_v57 = vrot.slane %v5662_v62, %v10268_v18  ;;  %v11886_v8 = vcombine.low %v4990_v63, %v4991_v16  ;;  %v5708_v0 = vrot.slane %v5665_v13, %v10268_v18  ;;  %v10135_v26 = vld [vmem:[%s12929_s5 + $0xb8] sm:$0xff]   ;;  %v5715_v62 = vrot.slane %v5664_v37, %v10268_v18 }
 0x2ed   :  { %12995 = vst [vmem:[#allocation24_spill] sm:$0xff] %v11872_v6  ;;  %v11881_v31 = vrot.slane %v6136_v61, %v10268_v18  ;;  %v11884_v9 = vrot.slane %v6137_v17, %v10268_v18  ;;  %v5730_v7 = vcombine.low %v11551_v48, %v11787_v3  ;;  %v5757_v29 = vrot.slane %v11582_v28, %v10268_v18 }
 0x2ee   :  { %v9412_v5 = vcombine.low %v5687_v35, %v5724_v12  ;;  %9681 = vmatprep.subr.bf16.mxu1 %v10134_v27  ;;  %v5726_v61 = vcombine.high %v5680_v40, %v5708_v0  ;;  %v5666_v17 = vcombine.high %v11804_v60, %v11815_v10  ;;  %v5728_v37 = vcombine.high %v5687_v35, %v5715_v62 }
 0x2ef   :  { %12996 = vst [vmem:[#allocation25_spill] sm:$0xff] %v11881_v31  ;;  %12997 = vst [vmem:[#allocation26_spill] sm:$0xff] %v11884_v9  ;;  %9682 = vmatpush3.bf16.msra.mxu1 %v10135_v26  ;;  %v5743_v16 = vrot.slane %v5730_v7, %v10268_v18  ;;  %v5725_v9 = vcombine.low %v5680_v40, %v5708_v0  ;;  %v12998_v28 = vmov 0.0   ;;  %v5727_v63 = vcombine.low %v5687_v35, %v5715_v62 }
 0x2f0   :  { %v6700_v25 = vrot.slane %v9412_v5, %v10268_v18  ;;  %9888 = vmatprep.subr.bf16.mxu1 %v12998_v28  ;;  %v9416_v12 = vcombine.low %v5694_v57, %v5726_v61  ;;  %v5722_v27 = vrot.slane %v5666_v17, %v10268_v18  ;;  %v12999_v13 = vcombine.low %v11569_v56, %v11577_v45 }
 0x2f1   :  { %v5793_v38 = vcombine.low %v5743_v16, %v5757_v29  ;;  %v5794_v60 = vcombine.high %v5743_v16, %v5757_v29  ;;  %v9414_v10 = vcombine.low %v5728_v37, %v5680_v40  ;;  %v9415_v26 = vcombine.high %v5715_v62, %v5725_v9 }
 0x2f2   :  { %v5771_v6 = vrot.slane %v12999_v13, %v10268_v18  ;;  %v6728_v7 = vrot.slane %v9416_v12, %v10268_v18  ;;  %v5729_v31 = vcombine.low %v5694_v57, %v5722_v27  ;;  %v9413_v45 = vcombine.high %v5727_v63, %v11713_v22 }
 0x2f3   :  { %v11915_v61 = vrot.slane %v5793_v38, %v10268_v18  ;;  %v11918_v35 = vrot.slane %v5794_v60, %v10268_v18  ;;  %v6714_v56 = vrot.slane %v9414_v10, %v10268_v18  ;;  %v6721_v62 = vrot.slane %v9415_v26, %v10268_v18 }
 0x2f4   :  { %v5797_v5 = vcombine.low %v5771_v6, %v11573_v42  ;;  %v5798_v28 = vcombine.high %v5771_v6, %v11573_v42  ;;  %v9417_v57 = vcombine.high %v5729_v31, %v5708_v0  ;;  %v6707_v6 = vrot.slane %v9413_v45, %v10268_v18 }
 0x2f5   :  { %v9418_v42 = vcombine.low %v11915_v61, %v11918_v35  ;;  %v6751_v38 = vcombine.high %v6700_v25, %v6714_v56  ;;  %v6750_v29 = vcombine.low %v6700_v25, %v6714_v56  ;;  %v9599_v63 = vadd.f32 %v11789_v51, %v11781_v39 }
 0x2f6   :  { %v11923_v40 = vrot.slane %v5797_v5, %v10268_v18  ;;  %v11926_v9 = vrot.slane %v5798_v28, %v10268_v18  ;;  %v6735_v22 = vrot.slane %v9417_v57, %v10268_v18  ;;  %v9602_v31 = vadd.f32 %v11817_v15, %v11806_v55 }
 0x2f7   :  { %v6742_v0 = vrot.slane %v9418_v42, %v10268_v18  ;;  %v11941_v17 = vrot.slane %v6751_v38, %v10268_v18  ;;  %v6753_v37 = vcombine.high %v6707_v6, %v6721_v62  ;;  %v11944_v16 = vrot.slane %v6750_v29, %v10268_v18 }
 0x2f8   :  { %v9419_v13 = vcombine.low %v11923_v40, %v11926_v9  ;;  %v6752_v28 = vcombine.low %v6707_v6, %v6721_v62  ;;  %v4773_v12 = vadd.f32 %v9599_v63, %v11404_v36  ;;  %v5106_v27 = vrot.slane %v11628_v52, 1 }
 0x2f9   :  { %v6755_v39 = vcombine.high %v6728_v7, %v6742_v0  ;;  %v6785_v51 = vrot.slane %v6753_v37, %v10268_v18  ;;  %v6754_v55 = vcombine.low %v6728_v7, %v6742_v0  ;;  %v5731_v15 = vcombine.high %v11551_v48, %v11787_v3 }
 0x2fa   :  { %v6749_v25 = vrot.slane %v9419_v13, %v10268_v18  ;;  %v11953_v26 = vrot.slane %v6752_v28, %v10268_v18  ;;  %v4886_v5 = vadd.f32 %v11819_v41, %v4773_v12  ;;  %v11963_v52 = vor.u32 %v5106_v27, %v11625_v23  ;;  %v13002_v28 = vld [vmem:[#allocation12_spill] sm:$0xff] }
 0x2fb   :  { %v11957_v56 = vrot.slane %v6755_v39, %v10268_v18  ;;  %v11960_v36 = vrot.slane %v6754_v55, %v10268_v18  ;;  %v5750_v7 = vrot.slane %v5731_v15, %v10268_v18  ;;  %v5764_v42 = vrot.slane %v11584_v49, %v10268_v18  ;;  %v13004_v39 = vld [vmem:[#allocation16_spill] sm:$0xff] }
 0x2fc   :  { %v6757_v60 = vcombine.high %v6735_v22, %v6749_v25  ;;  %v6756_v10 = vcombine.low %v6735_v22, %v6749_v25  ;;  %13000 = vst [vmem:[#allocation27_spill] sm:$0xff] %v11953_v26  ;;  %v4936_v45 = vcombine.high %v4886_v5, %v4886_v5  ;;  %v4992_v57 = vmax.f32 %v4886_v5, 0.0 }
 0x2fd   :  { %v6818_v41 = vcombine.low %v11941_v17, %v11957_v56  ;;  %v6814_v62 = vcombine.low %v11944_v16, %v11960_v36  ;;  %v5799_v23 = vcombine.low %v11592_v2, %v11580_v21  ;;  %v5864_v13 = vcombine.low %v11615_v1, %v11963_v52 }
 0x2fe   :  { %v6813_v48 = vrot.slane %v6757_v60, %v10268_v18  ;;  %v11968_v3 = vrot.slane %v6756_v10, %v10268_v18  ;;  %v4993_v29 = vmax.f32 %v4936_v45, 0.0  ;;  %v5795_v22 = vcombine.low %v5750_v7, %v5764_v42 }
 0x2ff   :  { %7975 = vmatprep.mubr.bf16.mxu1 %v6818_v41  ;;  %v5796_v63 = vcombine.high %v5750_v7, %v5764_v42  ;;  %v5842_v0 = vrot.slane %v5799_v23, %v10268_v18  ;;  %v5891_v37 = vrot.slane %v11658_v11, %v10268_v18  ;;  %v5877_v25 = vrot.slane %v5864_v13, %v10268_v18 }
 0x300   :  { %13001 = vst [vmem:[#allocation28_spill] sm:$0xff] %v11968_v3  ;;  %v6820_v38 = vcombine.low %v6785_v51, %v6813_v48  ;;  %v6816_v6 = vcombine.low %v11953_v26, %v11968_v3  ;;  %7976 = vmatmul.mubr.bf16.gmra.mrb[44].mxu1 %v6814_v62  ;;  %v5045_v49 = vcombine.low %v4992_v57, %v4993_v29 }
 0x301   :  { %v13003_v12 = vcombine.low %v11683_v58, %v13002_v28  ;;  %v5814_v55 = vrot.slane %v5795_v22, %v10268_v18  ;;  %v5828_v15 = vrot.slane %v5796_v63, %v10268_v18  ;;  %v9420_v11 = vcombine.high %v11915_v61, %v11918_v35  ;;  %v13006_v35 = vld [vmem:[#allocation6_spill] sm:$0xff] }
 0x302   :  { %8153 = vmatprep.mubr.bf16.mxu0 %v6820_v38  ;;  %v5800_v60 = vcombine.high %v11592_v2, %v11580_v21  ;;  %v11998_v10 = vpack.c.bf16 %v5045_v49, %v11886_v8  ;;  %v5927_v5 = vcombine.low %v5877_v25, %v5891_v37  ;;  %v5928_v7 = vcombine.high %v5877_v25, %v5891_v37 }
 0x303   :  { %v5969_v27 = vrot.slane %v13003_v12, %v10268_v18  ;;  %8154 = vmatmul.mubr.bf16.gmra.mrb[96].mxu0 %v6816_v6  ;;  %v13005_v48 = vcombine.high %v11683_v58, %v13002_v28  ;;  %v5860_v57 = vcombine.high %v5814_v55, %v5842_v0  ;;  %v9422_v41 = vcombine.low %v5814_v55, %v5828_v15 }
 0x304   :  { %v12007_v62 = vrot.slane %v9420_v11, %v10268_v18  ;;  %v5856_v61 = vrot.slane %v5800_v60, %v10268_v18  ;;  %v5941_v21 = vrot.slane %v5927_v5, %v10268_v18  ;;  %v12012_v2 = vrot.slane %v5928_v7, %v10268_v18 }
 0x305   :  { %v12004_v45 = vrot.slane %v13005_v48, %v10268_v18  ;;  %v9421_v8 = vcombine.high %v11923_v40, %v11926_v9  ;;  %v4776_v42 = vadd.f32 %v9602_v31, %v13006_v35  ;;  %v6849_v58 = vrot.slane %v9422_v41, %v10268_v18 }
 0x306   :  { %v9423_v23 = vcombine.low %v5842_v0, %v5856_v61  ;;  %v12019_v38 = vshrl.u32 %v11998_v10, 16  ;;  %v12022_v6 = vshll.u32 %v11998_v10, 16  ;;  %v5992_v29 = vcombine.high %v5941_v21, %v5969_v27 }
 0x307   :  { %v9424_v13 = vcombine.low %v5860_v57, %v5941_v21  ;;  %v5991_v22 = vcombine.low %v5941_v21, %v5969_v27  ;;  %v5995_v63 = vcombine.low %v12012_v2, %v12004_v45  ;;  %v6886_v37 = vcombine.high %v12007_v62, %v6849_v58 }
 0x308   :  { %v6842_v40 = vrot.slane %v9421_v8, %v10268_v18  ;;  %v6856_v9 = vrot.slane %v9423_v23, %v10268_v18  ;;  %v4889_v31 = vadd.f32 %v11835_v14, %v4776_v42  ;;  %v9426_v49 = vcombine.low %v12012_v2, %v5992_v29 }
 0x309   :  { %v6863_v25 = vrot.slane %v9424_v13, %v10268_v18  ;;  %v9425_v28 = vcombine.high %v5842_v0, %v5991_v22  ;;  %v9427_v12 = vcombine.high %v5995_v63, %v5969_v27  ;;  %v12033_v55 = vrot.slane %v6886_v37, %v10268_v18 }
 0x30a   :  { %v6888_v15 = vcombine.high %v6842_v40, %v6856_v9  ;;  %v4937_v11 = vcombine.high %v4889_v31, %v4889_v31  ;;  %v4994_v60 = vmax.f32 %v4889_v31, 0.0  ;;  %v6877_v5 = vrot.slane %v9426_v49, %v10268_v18 }
 0x30b   :  { %v6870_v7 = vrot.slane %v9425_v28, %v10268_v18  ;;  %v6884_v48 = vrot.slane %v9427_v12, %v10268_v18  ;;  %v5150_v14 = vrot.slane %v11998_v10, 1  ;;  %v5200_v27 = vrot.slane %v12019_v38, 1 }
 0x30c   :  { %v6920_v57 = vrot.slane %v6888_v15, %v10268_v18  ;;  %v12040_v41 = vmax.f32 %v4937_v11, 0.0  ;;  %v5077_v0 = vpack.c.bf16 %v4994_v60, %v4994_v60  ;;  %v6890_v61 = vcombine.high %v6863_v25, %v6877_v5 }
 0x30d   :  { %v6892_v21 = vcombine.high %v6870_v7, %v6884_v48  ;;  %v5201_v8 = vrot.slane %v12022_v6, 2  ;;  %v5242_v35 = vrot.slane %v11998_v10, 2  ;;  %v5302_v29 = vrot.slane %v12019_v38, 2 }
 0x30e   :  { %v5204_v42 = vshll.u32 %v5077_v0, 16  ;;  %v5243_v23 = vrot.slane %v5077_v0, 2  ;;  %v5303_v13 = vrot.slane %v12022_v6, 3  ;;  %v12048_v22 = vrot.slane %v6890_v61, %v10268_v18 }
 0x30f   :  { %v6948_v63 = vrot.slane %v6892_v21, %v10268_v18  ;;  %v5202_v37 = vor.u32 %v5201_v8, %v5200_v27  ;;  %v5305_v31 = vshrl.u32 %v5077_v0, 16  ;;  %v5338_v26 = vrot.slane %v11998_v10, 3 }
 0x310   :  { %v5206_v49 = vrot.slane %v5204_v42, 2  ;;  %v12052_v28 = vsel %vm1561_vm0, %v5242_v35, %v5243_v23  ;;  %v5304_v12 = vor.u32 %v5303_v13, %v5302_v29  ;;  %v5308_v15 = vrot.slane %v5204_v42, 3 }
 0x311   :  { %v6953_v11 = vcombine.low %v12033_v55, %v12048_v22  ;;  %v6955_v60 = vcombine.low %v6920_v57, %v6948_v63  ;;  %v5307_v51 = vrot.slane %v5305_v31, 2  ;;  %v5339_v3 = vrot.slane %v5077_v0, 3  ;;  %v13010_v31 = vld [vmem:[#allocation11_spill] sm:$0xff] }
 0x312   :  { %v5207_v61 = vsel %vm3188_vm5, %v5202_v37, %v5206_v49  ;;  %v6885_v21 = vcombine.low %v12007_v62, %v6849_v58  ;;  %v6889_v27 = vcombine.low %v6863_v25, %v6877_v5  ;;  %v5120_v42 = vrot.slane %v11832_v46, 1 }
 0x313   :  { %7983 = vmatprep.mubr.bf16.mxu1 %v6953_v11  ;;  %8161 = vmatprep.mubr.bf16.mxu0 %v6955_v60  ;;  %v5309_v8 = vor.u32 %v5308_v15, %v5307_v51  ;;  %v12059_v35 = vcombine.low %v5150_v14, %v5207_v61  ;;  %v12061_v23 = vcombine.high %v5150_v14, %v5207_v61  ;;  %v13009_v13 = vrot.slane %v13004_v39, 1  ;;  %v13012_v15 = vld [vmem:[#allocation14_spill] sm:$0xff] }
 0x314   :  { %v12065_v57 = vsel %vm3391_vm6, %v5338_v26, %v5339_v3  ;;  %v12068_v29 = vrot.slane %v6885_v21, %v10268_v18  ;;  %v12071_v0 = vrot.slane %v6889_v27, %v10268_v18  ;;  %v6887_v62 = vcombine.low %v6842_v40, %v6856_v9 }
 0x315   :  { %v12074_v58 = vsel %vm3302_vm4, %v5304_v12, %v5309_v8  ;;  %v12080_v25 = vrot.slane %v12065_v57, %v10268_v18  ;;  %v6891_v46 = vcombine.low %v6870_v7, %v6884_v48  ;;  %v9605_v14 = vadd.f32 %v11848_v20, %v11844_v44  ;;  %v13008_v48 = vld [vmem:[#allocation15_spill] sm:$0xff]  ;;  %v13011_v12 = vld [vmem:[#allocation13_spill] sm:$0xff] }
 0x316   :  { %v6949_v40 = vcombine.low %v12068_v29, %v12071_v0  ;;  %v12089_v9 = vrot.slane %v6887_v62, %v10268_v18  ;;  %v9608_v7 = vadd.f32 %v11857_v4, %v11853_v50  ;;  %v12101_v63 = vor.u32 %v13009_v13, %v13008_v48 }
 0x317   :  { %v12092_v5 = vrot.slane %v6891_v46, %v10268_v18  ;;  %v5865_v37 = vcombine.high %v11615_v1, %v11963_v52  ;;  %v5898_v49 = vrot.slane %v13010_v31, %v10268_v18  ;;  %v5933_v11 = vcombine.low %v13012_v15, %v13011_v12 }
 0x318   :  { %13007 = vst [vmem:[#allocation12_spill] sm:$0xff] %v12089_v9  ;;  %7984 = vmatmul.mubr.bf16.gmra.mrb[48].mxu1 %v6949_v40  ;;  %v5996_v20 = vcombine.high %v12012_v2, %v12004_v45  ;;  %v4781_v50 = vadd.f32 %v9605_v14, %v11417_v34  ;;  %v4784_v4 = vadd.f32 %v9608_v7, %v11417_v34 }
 0x319   :  { %v6951_v44 = vcombine.low %v12089_v9, %v12092_v5  ;;  %v5998_v39 = vcombine.low %v11668_v43, %v12101_v63  ;;  %v5884_v1 = vrot.slane %v5865_v37, %v10268_v18  ;;  %v12119_v52 = vrot.slane %v5933_v11, %v10268_v18 }
 0x31a   :  { %v6025_v60 = vrot.slane %v11756_v33, %v10268_v18  ;;  %v5934_v2 = vcombine.high %v13012_v15, %v13011_v12  ;;  %v4894_v61 = vadd.f32 %v11859_v59, %v4781_v50  ;;  %v4897_v21 = vadd.f32 %v11869_v19, %v4784_v4 }
 0x31b   :  { %8162 = vmatmul.mubr.bf16.gmra.mrb[100].mxu0 %v6951_v44  ;;  %v6011_v34 = vrot.slane %v5998_v39, %v10268_v18  ;;  %v13013_v27 = vcombine.low %v11745_v30, %v11767_v53  ;;  %v5929_v62 = vcombine.low %v5884_v1, %v5898_v49  ;;  %v5930_v46 = vcombine.high %v5884_v1, %v5898_v49 }
 0x31c   :  { %v12135_v33 = vrot.slane %v5934_v2, %v10268_v18  ;;  %v12138_v40 = vor.u32 %v5120_v42, %v11829_v54  ;;  %v4938_v14 = vcombine.high %v4894_v61, %v4894_v61  ;;  %v4996_v59 = vmax.f32 %v4894_v61, 0.0 }
 0x31d   :  { %v12132_v8 = vrot.slane %v13013_v27, %v10268_v18  ;;  %v4939_v7 = vcombine.high %v4897_v21, %v4897_v21  ;;  %v4998_v19 = vmax.f32 %v4897_v21, 0.0  ;;  %v12141_v48 = vrot.slane %v5929_v62, %v10268_v18 }
 0x31e   :  { %v12144_v13 = vrot.slane %v5930_v46, %v10268_v18  ;;  %v6061_v30 = vcombine.low %v6011_v34, %v6025_v60  ;;  %v6062_v53 = vcombine.high %v6011_v34, %v6025_v60  ;;  %v4997_v37 = vmax.f32 %v4938_v14, 0.0 }
 0x31f   :  { %v5046_v31 = vcombine.low %v12040_v41, %v4996_v59  ;;  %v4999_v49 = vmax.f32 %v4939_v7, 0.0  ;;  %v6065_v54 = vcombine.low %v12132_v8, %v11752_v32  ;;  %v5994_v42 = vcombine.high %v12141_v48, %v12119_v52 }
 0x320   :  { %v6075_v12 = vrot.slane %v6061_v30, %v10268_v18  ;;  %v6089_v15 = vrot.slane %v6062_v53, %v10268_v18  ;;  %v9428_v11 = vcombine.low %v5996_v20, %v12141_v48  ;;  %v5047_v44 = vcombine.low %v4997_v37, %v4998_v19 }
 0x321   :  { %v5079_v50 = vpack.c.bf16 %v4999_v49, %v4999_v49  ;;  %v5993_v4 = vcombine.low %v12141_v48, %v12119_v52  ;;  %v5997_v41 = vcombine.low %v12144_v13, %v12135_v33  ;;  %v9430_v39 = vcombine.low %v12144_v13, %v5994_v42 }
 0x322   :  { %v9432_v1 = vcombine.low %v6075_v12, %v6089_v15  ;;  %v9434_v60 = vcombine.high %v6075_v12, %v6089_v15  ;;  %v6970_v2 = vrot.slane %v9428_v11, %v10268_v18  ;;  %v12160_v61 = vpack.c.bf16 %v5047_v44, %v5046_v31 }
 0x323   :  { %v5212_v21 = vshll.u32 %v5079_v50, 16  ;;  %v5246_v34 = vrot.slane %v5079_v50, 2  ;;  %v5314_v27 = vshrl.u32 %v5079_v50, 16  ;;  %v5342_v20 = vrot.slane %v5079_v50, 3 }
 0x324   :  { %v6984_v62 = vrot.slane %v9430_v39, %v10268_v18  ;;  %v6998_v46 = vrot.slane %v9432_v1, %v10268_v18  ;;  %v7012_v14 = vrot.slane %v9434_v60, %v10268_v18  ;;  %v12166_v33 = vshrl.u32 %v12160_v61, 16 }
 0x325   :  { %v12169_v59 = vshll.u32 %v12160_v61, 16  ;;  %v5151_v7 = vrot.slane %v12160_v61, 1  ;;  %v5214_v19 = vrot.slane %v5212_v21, 2  ;;  %v5245_v48 = vrot.slane %v12160_v61, 2 }
 0x326   :  { %v5316_v13 = vrot.slane %v5314_v27, 2  ;;  %v5317_v30 = vrot.slane %v5212_v21, 3  ;;  %v5341_v53 = vrot.slane %v12160_v61, 3  ;;  %v5208_v37 = vrot.slane %v12166_v33, 1 }
 0x327   :  { %v5209_v31 = vrot.slane %v12169_v59, 2  ;;  %v5311_v49 = vrot.slane %v12166_v33, 2  ;;  %v5312_v42 = vrot.slane %v12169_v59, 3  ;;  %v5247_v12 = vsel %vm1561_vm0, %v5245_v48, %v5246_v34 }
 0x328   :  { %v5318_v15 = vor.u32 %v5317_v30, %v5316_v13  ;;  %v5343_v11 = vsel %vm3391_vm6, %v5341_v53, %v5342_v20  ;;  %v7021_v44 = vcombine.high %v6970_v2, %v6984_v62  ;;  %v7025_v21 = vcombine.high %v6998_v46, %v7012_v14 }
 0x329   :  { %v5210_v50 = vor.u32 %v5209_v31, %v5208_v37  ;;  %v5313_v39 = vor.u32 %v5312_v42, %v5311_v49  ;;  %v6406_v1 = vcombine.high %v5343_v11, %v5343_v11  ;;  %v12181_v60 = vrot.slane %v5343_v11, %v10268_v18  ;;  %v13015_v11 = vld [vmem:[#allocation20_spill] sm:$0xff] }
 0x32a   :  { %v12184_v27 = vrot.slane %v7021_v44, %v10268_v18  ;;  %v7020_v51 = vcombine.low %v6970_v2, %v6984_v62  ;;  %v7024_v3 = vcombine.low %v6998_v46, %v7012_v14  ;;  %v6066_v20 = vcombine.high %v12132_v8, %v11752_v32  ;;  %v13016_v44 = vld [vmem:[#allocation21_spill] sm:$0xff] }
 0x32b   :  { %v5215_v26 = vsel %vm3188_vm5, %v5210_v50, %v5214_v19  ;;  %v5319_v34 = vsel %vm3302_vm4, %v5313_v39, %v5318_v15  ;;  %v12189_v48 = vrot.slane %v6406_v1, %v10268_v18  ;;  %v12198_v31 = vrot.slane %v7025_v21, %v10268_v18  ;;  %v13017_v39 = vld [vmem:[#allocation22_spill] sm:$0xff] }
 0x32c   :  { %v12193_v13 = vcombine.low %v5151_v7, %v5215_v26  ;;  %v12195_v30 = vcombine.high %v5151_v7, %v5215_v26  ;;  %v6404_v53 = vcombine.low %v5247_v12, %v5319_v34  ;;  %v6405_v37 = vcombine.high %v5247_v12, %v5319_v34 }
 0x32d   :  { %v12201_v2 = vrot.slane %v7020_v51, %v10268_v18  ;;  %v12204_v62 = vrot.slane %v7024_v3, %v10268_v18  ;;  %v6103_v46 = vrot.slane %v6065_v54, %v10268_v18  ;;  %v6117_v26 = vrot.slane %v6066_v20, %v10268_v18 }
 0x32e   :  { %v12208_v14 = vrot.slane %v6404_v53, %v10268_v18  ;;  %v12211_v32 = vrot.slane %v6405_v37, %v10268_v18  ;;  %v9429_v8 = vcombine.high %v12004_v45, %v5993_v4  ;;  %v7088_v7 = vcombine.low %v12184_v27, %v12198_v31 }
 0x32f   :  { %v7084_v51 = vcombine.low %v12201_v2, %v12204_v62  ;;  %v9431_v3 = vcombine.high %v5997_v41, %v12119_v52  ;;  %v5999_v54 = vcombine.high %v11668_v43, %v12101_v63  ;;  %v9433_v42 = vcombine.low %v6103_v46, %v6117_v26  ;;  %v13014_v52 = vld [vmem:[#allocation18_spill] sm:$0xff] }
 0x330   :  { %v9435_v12 = vcombine.high %v6103_v46, %v6117_v26  ;;  %7991 = vmatprep.mubr.bf16.mxu1 %v7088_v7  ;;  %v6977_v45 = vrot.slane %v9429_v8, %v10268_v18  ;;  %v6032_v41 = vrot.slane %v13014_v52, %v10268_v18  ;;  %v6067_v50 = vcombine.low %v13016_v44, %v13015_v11 }
 0x331   :  { %v6991_v4 = vrot.slane %v9431_v3, %v10268_v18  ;;  %v6018_v15 = vrot.slane %v5999_v54, %v10268_v18  ;;  %7992 = vmatmul.mubr.bf16.gmra.mrb[52].mxu1 %v7084_v51  ;;  %v7005_v43 = vrot.slane %v9433_v42, %v10268_v18  ;;  %v6132_v1 = vcombine.low %v13017_v39, %v12138_v40 }
 0x332   :  { %v7019_v63 = vrot.slane %v9435_v12, %v10268_v18  ;;  %v6110_v26 = vrot.slane %v6067_v50, %v10268_v18  ;;  %v6133_v8 = vcombine.high %v13017_v39, %v12138_v40  ;;  %v6159_v40 = vrot.slane %v11862_v24, %v10268_v18 }
 0x333   :  { %v7023_v21 = vcombine.high %v6977_v45, %v6991_v4  ;;  %v7022_v34 = vcombine.low %v6977_v45, %v6991_v4  ;;  %v6063_v20 = vcombine.low %v6018_v15, %v6032_v41  ;;  %v6064_v53 = vcombine.high %v6018_v15, %v6032_v41  ;;  %v13018_v41 = vld [vmem:[#allocation25_spill] sm:$0xff] }
 0x334   :  { %v7027_v37 = vcombine.high %v7005_v43, %v7019_v63  ;;  %v7026_v46 = vcombine.low %v7005_v43, %v7019_v63  ;;  %v6145_v45 = vrot.slane %v6132_v1, %v10268_v18  ;;  %v6152_v4 = vrot.slane %v6133_v8, %v10268_v18  ;;  %v13019_v43 = vld [vmem:[#allocation23_spill] sm:$0xff]  ;;  %v13022_v8 = vld [vmem:[#allocation24_spill] sm:$0xff] }
 0x335   :  { %v7055_v7 = vrot.slane %v7023_v21, %v10268_v18  ;;  %v12242_v51 = vrot.slane %v7022_v34, %v10268_v18  ;;  %v6082_v3 = vrot.slane %v6063_v20, %v10268_v18  ;;  %v6096_v54 = vrot.slane %v6064_v53, %v10268_v18 }
 0x336   :  { %v7083_v42 = vrot.slane %v7027_v37, %v10268_v18  ;;  %v12248_v12 = vrot.slane %v7026_v46, %v10268_v18  ;;  %v6166_v52 = vrot.slane %v11864_v47, %v10268_v18  ;;  %v13020_v63 = vcombine.low %v13018_v41, %v13019_v43 }
 0x337   :  { %v6128_v15 = vcombine.high %v6082_v3, %v6110_v26  ;;  %v13021_v1 = vcombine.high %v13018_v41, %v13019_v43  ;;  %v9436_v20 = vcombine.low %v6082_v3, %v6096_v54  ;;  %v6195_v53 = vcombine.low %v6145_v45, %v6159_v40 }
 0x338   :  { %v6237_v50 = vrot.slane %v13020_v63, %v10268_v18  ;;  %v7090_v39 = vcombine.low %v7055_v7, %v7083_v42  ;;  %v7086_v21 = vcombine.low %v12242_v51, %v12248_v12  ;;  %v6196_v24 = vcombine.high %v6145_v45, %v6159_v40  ;;  %v13023_v7 = vld [vmem:[#allocation26_spill] sm:$0xff] }
 0x339   :  { %v6251_v34 = vrot.slane %v13021_v1, %v10268_v18  ;;  %v6197_v37 = vcombine.low %v6152_v4, %v6166_v52  ;;  %v6068_v47 = vcombine.high %v13016_v44, %v13015_v11  ;;  %v7105_v46 = vrot.slane %v9436_v20, %v10268_v18 }
 0x33a   :  { %8169 = vmatprep.mubr.bf16.mxu0 %v7090_v39  ;;  %v6201_v42 = vcombine.low %v13023_v7, %v13022_v8  ;;  %v5127_v63 = vrot.slane %v12022_v6, 1  ;;  %v6198_v49 = vcombine.high %v6152_v4, %v6166_v52  ;;  %v6209_v41 = vrot.slane %v6195_v53, %v10268_v18 }
 0x33b   :  { %8170 = vmatmul.mubr.bf16.gmra.mrb[104].mxu0 %v7086_v21  ;;  %v6216_v3 = vrot.slane %v6197_v37, %v10268_v18  ;;  %v6223_v54 = vrot.slane %v6196_v24, %v10268_v18  ;;  %v6124_v45 = vrot.slane %v6068_v47, %v10268_v18  ;;  %v6293_v6 = vrot.slane %v12059_v35, %v10268_v18 }
 0x33c   :  { %v12277_v11 = vrot.slane %v6201_v42, %v10268_v18  ;;  %v5128_v44 = vor.u32 %v5127_v63, %v12019_v38  ;;  %v12281_v40 = vrot.slane %v6198_v49, %v10268_v18  ;;  %v6260_v4 = vcombine.high %v6209_v41, %v6237_v50 }
 0x33d   :  { %v6264_v52 = vcombine.high %v6223_v54, %v6251_v34  ;;  %v9438_v43 = vcombine.low %v6128_v15, %v6209_v41  ;;  %v6259_v39 = vcombine.low %v6209_v41, %v6237_v50  ;;  %v6263_v1 = vcombine.low %v6223_v54, %v6251_v34 }
 0x33e   :  { %v6261_v21 = vcombine.low %v6216_v3, %v12277_v11  ;;  %v9437_v20 = vcombine.low %v6110_v26, %v6124_v45  ;;  %v6262_v53 = vcombine.high %v6216_v3, %v12277_v11  ;;  %v9440_v24 = vcombine.low %v6223_v54, %v6260_v4 }
 0x33f   :  { %v9442_v37 = vcombine.low %v6264_v52, %v6216_v3  ;;  %v7119_v38 = vrot.slane %v9438_v43, %v10268_v18  ;;  %v9439_v47 = vcombine.high %v6110_v26, %v6259_v39  ;;  %v9441_v49 = vcombine.high %v6263_v1, %v6237_v50 }
 0x340   :  { %v9443_v42 = vcombine.high %v6251_v34, %v6261_v21  ;;  %v7112_v63 = vrot.slane %v9437_v20, %v10268_v18  ;;  %v6266_v35 = vcombine.low %v11998_v10, %v5128_v44  ;;  %v7133_v15 = vrot.slane %v9440_v24, %v10268_v18 }
 0x341   :  { %v7147_v41 = vrot.slane %v9442_v37, %v10268_v18  ;;  %v7156_v19 = vcombine.high %v7105_v46, %v7119_v38  ;;  %v7126_v45 = vrot.slane %v9439_v47, %v10268_v18  ;;  %v7140_v9 = vrot.slane %v9441_v49, %v10268_v18 }
 0x342   :  { %v7154_v3 = vrot.slane %v9443_v42, %v10268_v18  ;;  %v7155_v54 = vcombine.low %v7105_v46, %v7119_v38  ;;  %v6267_v26 = vcombine.high %v11998_v10, %v5128_v44  ;;  %v6279_v10 = vrot.slane %v6266_v35, %v10268_v18 }
 0x343   :  { %v7160_v50 = vcombine.high %v7133_v15, %v7147_v41  ;;  %v12297_v34 = vrot.slane %v7156_v19, %v10268_v18  ;;  %v7158_v4 = vcombine.high %v7112_v63, %v7126_v45  ;;  %v7159_v52 = vcombine.low %v7133_v15, %v7147_v41 }
 0x344   :  { %v7162_v43 = vcombine.high %v7140_v9, %v7154_v3  ;;  %v12300_v39 = vrot.slane %v7155_v54, %v10268_v18  ;;  %v7157_v21 = vcombine.low %v7112_v63, %v7126_v45  ;;  %v7161_v1 = vcombine.low %v7140_v9, %v7154_v3 }
 0x345   :  { %v12303_v20 = vrot.slane %v7160_v50, %v10268_v18  ;;  %v7190_v24 = vrot.slane %v7158_v4, %v10268_v18  ;;  %v12307_v46 = vrot.slane %v7159_v52, %v10268_v18  ;;  %v6286_v9 = vrot.slane %v6267_v26, %v10268_v18 }
 0x346   :  { %v7218_v19 = vrot.slane %v7162_v43, %v10268_v18  ;;  %v12312_v44 = vrot.slane %v7157_v21, %v10268_v18  ;;  %v12315_v37 = vrot.slane %v7161_v1, %v10268_v18  ;;  %v6300_v49 = vrot.slane %v12061_v23, %v10268_v18 }
 0x347   :  { %v7223_v38 = vcombine.low %v12297_v34, %v12303_v20  ;;  %v7219_v47 = vcombine.low %v12300_v39, %v12307_v46  ;;  %v6329_v42 = vcombine.low %v6279_v10, %v6293_v6  ;;  %v6330_v15 = vcombine.high %v6279_v10, %v6293_v6 }
 0x348   :  { %v7225_v63 = vcombine.low %v7190_v24, %v7218_v19  ;;  %v7221_v35 = vcombine.low %v12312_v44, %v12315_v37  ;;  %v9444_v41 = vcombine.low %v12281_v40, %v6262_v53  ;;  %v6331_v45 = vcombine.low %v6286_v9, %v6300_v49 }
 0x349   :  { %7999 = vmatprep.mubr.bf16.mxu1 %v7223_v38  ;;  %v6332_v3 = vcombine.high %v6286_v9, %v6300_v49  ;;  %v6343_v54 = vrot.slane %v6329_v42, %v10268_v18  ;;  %v6202_v26 = vcombine.high %v13023_v7, %v13022_v8  ;;  %v6357_v23 = vrot.slane %v6330_v15, %v10268_v18 }
 0x34a   :  { %8177 = vmatprep.mubr.bf16.mxu0 %v7225_v63  ;;  %8000 = vmatmul.mubr.bf16.gmra.mrb[56].mxu1 %v7219_v47  ;;  %v7240_v50 = vrot.slane %v9444_v41, %v10268_v18  ;;  %v13024_v6 = vcombine.low %v12052_v28, %v12074_v58  ;;  %v5134_v53 = vrot.slane %v12169_v59, 1  ;;  %v12338_v52 = vrot.slane %v6331_v45, %v10268_v18 }
 0x34b   :  { %8178 = vmatmul.mubr.bf16.gmra.mrb[108].mxu0 %v7221_v35  ;;  %v6364_v43 = vrot.slane %v6332_v3, %v10268_v18  ;;  %v6258_v8 = vrot.slane %v6202_v26, %v10268_v18  ;;  %v13025_v7 = vcombine.high %v12052_v28, %v12074_v58  ;;  %v9446_v1 = vcombine.low %v6343_v54, %v6357_v23 }
 0x34c   :  { %v6307_v4 = vrot.slane %v13024_v6, %v10268_v18  ;;  %v9448_v24 = vcombine.high %v6343_v54, %v6357_v23  ;;  %v13026_v10 = vcombine.high %v12065_v57, %v12065_v57  ;;  %v5135_v49 = vor.u32 %v5134_v53, %v12166_v33 }
 0x34d   :  { %v6314_v21 = vrot.slane %v13025_v7, %v10268_v18  ;;  %v9450_v9 = vcombine.low %v12338_v52, %v6364_v43  ;;  %v6265_v38 = vcombine.low %v12281_v40, %v6258_v8  ;;  %v7254_v28 = vrot.slane %v9446_v1, %v10268_v18 }
 0x34e   :  { %v6328_v59 = vrot.slane %v13026_v10, %v10268_v18  ;;  %v6333_v19 = vcombine.low %v6307_v4, %v12080_v25  ;;  %v6334_v47 = vcombine.high %v6307_v4, %v12080_v25  ;;  %v7268_v58 = vrot.slane %v9448_v24, %v10268_v18 }
 0x34f   :  { %v7282_v35 = vrot.slane %v9450_v9, %v10268_v18  ;;  %v9445_v41 = vcombine.high %v6265_v38, %v12277_v11  ;;  %v7291_v45 = vcombine.high %v7240_v50, %v7254_v28  ;;  %v7290_v33 = vcombine.low %v7240_v50, %v7254_v28 }
 0x350   :  { %v6335_v42 = vcombine.low %v6314_v21, %v6328_v59  ;;  %v6336_v63 = vcombine.high %v6314_v21, %v6328_v59  ;;  %v6371_v57 = vrot.slane %v6333_v19, %v10268_v18  ;;  %v6385_v15 = vrot.slane %v6334_v47, %v10268_v18 }
 0x351   :  { %v7295_v3 = vcombine.high %v7268_v58, %v7282_v35  ;;  %v7247_v23 = vrot.slane %v9445_v41, %v10268_v18  ;;  %v12365_v6 = vrot.slane %v7291_v45, %v10268_v18  ;;  %v7294_v53 = vcombine.low %v7268_v58, %v7282_v35 }
 0x352   :  { %v6378_v40 = vrot.slane %v6335_v42, %v10268_v18  ;;  %v6392_v25 = vrot.slane %v6336_v63, %v10268_v18  ;;  %v9447_v54 = vcombine.low %v6371_v57, %v6385_v15  ;;  %v9449_v26 = vcombine.high %v6371_v57, %v6385_v15 }
 0x353   :  { %v12368_v43 = vrot.slane %v7290_v33, %v10268_v18  ;;  %v12371_v11 = vrot.slane %v7295_v3, %v10268_v18  ;;  %v12378_v1 = vrot.slane %v7294_v53, %v10268_v18  ;;  %v6400_v24 = vcombine.low %v12160_v61, %v5135_v49 }
 0x354   :  { %v9451_v4 = vcombine.low %v6378_v40, %v6392_v25  ;;  %v7261_v8 = vrot.slane %v9447_v54, %v10268_v18  ;;  %v7275_v50 = vrot.slane %v9449_v26, %v10268_v18  ;;  %v6396_v7 = vcombine.high %v12338_v52, %v6378_v40 }
 0x355   :  { %v6401_v10 = vcombine.high %v12160_v61, %v5135_v49  ;;  %v7358_v59 = vcombine.low %v12365_v6, %v12371_v11  ;;  %v6427_v38 = vrot.slane %v12193_v13, %v10268_v18  ;;  %v7354_v52 = vcombine.low %v12368_v43, %v12378_v1 }
 0x356   :  { %v7289_v21 = vrot.slane %v9451_v4, %v10268_v18  ;;  %v7293_v19 = vcombine.high %v7247_v23, %v7261_v8  ;;  %v7292_v9 = vcombine.low %v7247_v23, %v7261_v8  ;;  %v6413_v58 = vrot.slane %v6400_v24, %v10268_v18 }
 0x357   :  { %8007 = vmatprep.mubr.bf16.mxu1 %v7358_v59  ;;  %v6420_v49 = vrot.slane %v6401_v10, %v10268_v18  ;;  %v6434_v63 = vrot.slane %v12195_v30, %v10268_v18  ;;  %v6469_v25 = vcombine.low %v12211_v32, %v12189_v48  ;;  %v13027_v33 = vcombine.low %v12208_v14, %v12181_v60 }
 0x358   :  { %v7297_v47 = vcombine.high %v7275_v50, %v7289_v21  ;;  %v7296_v28 = vcombine.low %v7275_v50, %v7289_v21  ;;  %v7325_v42 = vrot.slane %v7293_v19, %v10268_v18  ;;  %v12391_v61 = vrot.slane %v7292_v9, %v10268_v18  ;;  %8008 = vmatmul.mubr.bf16.gmra.mrb[60].mxu1 %v7354_v52 }
 0x359   :  { %v6463_v57 = vcombine.low %v6413_v58, %v6427_v38  ;;  %v6464_v15 = vcombine.high %v6413_v58, %v6427_v38  ;;  %v6465_v41 = vcombine.low %v6420_v49, %v6434_v63  ;;  %v6466_v45 = vcombine.high %v6420_v49, %v6434_v63 }
 0x35a   :  { %v7353_v13 = vrot.slane %v7297_v47, %v10268_v18  ;;  %v12398_v35 = vrot.slane %v7296_v28, %v10268_v18  ;;  %v6505_v3 = vrot.slane %v13027_v33, %v10268_v18  ;;  %v6512_v8 = vrot.slane %v6469_v25, %v10268_v18 }
 0x35b   :  { %v6477_v26 = vrot.slane %v6463_v57, %v10268_v18  ;;  %v6491_v23 = vrot.slane %v6464_v15, %v10268_v18  ;;  %v6484_v4 = vrot.slane %v6465_v41, %v10268_v18  ;;  %v6498_v53 = vrot.slane %v6466_v45, %v10268_v18 }
 0x35c   :  { %v7360_v54 = vcombine.low %v7325_v42, %v7353_v13  ;;  %v7356_v30 = vcombine.low %v12391_v61, %v12398_v35  ;;  %v13028_v50 = vcombine.high %v12208_v14, %v12181_v60  ;;  %v6470_v59 = vcombine.high %v12211_v32, %v12189_v48 }
 0x35d   :  { %v6528_v24 = vcombine.high %v6477_v26, %v6505_v3  ;;  %v9452_v10 = vcombine.low %v6396_v7, %v6477_v26  ;;  %v6527_v19 = vcombine.low %v6477_v26, %v6505_v3  ;;  %v6530_v9 = vcombine.high %v6484_v4, %v6512_v8 }
 0x35e   :  { %v6519_v21 = vrot.slane %v13028_v50, %v10268_v18  ;;  %8185 = vmatprep.mubr.bf16.mxu0 %v7360_v54  ;;  %v6529_v47 = vcombine.low %v6484_v4, %v6512_v8  ;;  %v6526_v58 = vrot.slane %v6470_v59, %v10268_v18 }
 0x35f   :  { %8186 = vmatmul.mubr.bf16.gmra.mrb[112].mxu0 %v7356_v30  ;;  %v9454_v28 = vcombine.low %v6491_v23, %v6528_v24  ;;  %v9453_v42 = vcombine.high %v6378_v40, %v6527_v19  ;;  %v9458_v63 = vcombine.low %v6498_v53, %v6530_v9  ;;  %v7375_v13 = vrot.slane %v9452_v10, %v10268_v18 }
 0x360   :  { %v6532_v38 = vcombine.high %v6491_v23, %v6519_v21  ;;  %v6531_v52 = vcombine.low %v6491_v23, %v6519_v21  ;;  %v9457_v14 = vcombine.high %v6519_v21, %v6529_v47  ;;  %v6533_v57 = vcombine.low %v6498_v53, %v6526_v58  ;;  %v13030_v47 = vld [vmem:[#allocation7_spill] sm:$0xff] }
 0x361   :  { %v7389_v7 = vrot.slane %v9454_v28, %v10268_v18  ;;  %v7382_v48 = vrot.slane %v9453_v42, %v10268_v18  ;;  %v7417_v15 = vrot.slane %v9458_v63, %v10268_v18  ;;  %v7089_v28 = vcombine.high %v12184_v27, %v12198_v31 }
 0x362   :  { %v9456_v49 = vcombine.low %v6532_v38, %v6484_v4  ;;  %v9455_v60 = vcombine.high %v6531_v52, %v6505_v3  ;;  %v9459_v25 = vcombine.high %v6533_v57, %v6512_v8  ;;  %v7410_v40 = vrot.slane %v9457_v14, %v10268_v18  ;;  %v13029_v38 = vld [vmem:[#allocation9_spill] sm:$0xff] }
 0x363   :  { %v7426_v45 = vcombine.high %v7375_v13, %v7389_v7  ;;  %v7425_v33 = vcombine.low %v7375_v13, %v7389_v7  ;;  %v6684_v52 = vcombine.high %v13030_v47, %v13029_v38  ;;  %v7224_v63 = vcombine.high %v12297_v34, %v12303_v20  ;;  %v10137_v57 = vld [vmem:[%s12929_s5 + $0x188] sm:$0xff]  }
 0x364   :  { %v7403_v32 = vrot.slane %v9456_v49, %v10268_v18  ;;  %v7396_v41 = vrot.slane %v9455_v60, %v10268_v18  ;;  %v7424_v4 = vrot.slane %v9459_v25, %v10268_v18  ;;  %v7085_v49 = vcombine.high %v12201_v2, %v12204_v62 }
 0x365   :  { %v12428_v23 = vrot.slane %v7426_v45, %v10268_v18  ;;  %v12432_v53 = vrot.slane %v7425_v33, %v10268_v18  ;;  %v7220_v60 = vcombine.high %v12300_v39, %v12307_v46  ;;  %v7359_v14 = vcombine.high %v12365_v6, %v12371_v11  ;;  %v13032_v11 = vld [vmem:[#allocation10_spill] sm:$0xff]  ;;  %v13034_v33 = vld [vmem:[#allocation19_spill] sm:$0xff] }
 0x366   :  { %v7430_v3 = vcombine.high %v7403_v32, %v7417_v15  ;;  %v7428_v54 = vcombine.high %v7382_v48, %v7396_v41  ;;  %v7429_v30 = vcombine.low %v7403_v32, %v7417_v15  ;;  %v7427_v26 = vcombine.low %v7382_v48, %v7396_v41  ;;  %v10138_v48 = vld [vmem:[%s12929_s5 + $0x190] sm:$0xff]   ;;  %v10140_v15 = vld [vmem:[%s12929_s5 + $0x1a0] sm:$0xff]  }
 0x367   :  { %v7432_v21 = vcombine.high %v7410_v40, %v7424_v4  ;;  %v7431_v10 = vcombine.low %v7410_v40, %v7424_v4  ;;  %v7355_v27 = vcombine.high %v12368_v43, %v12378_v1  ;;  %v7087_v34 = vcombine.high %v12242_v51, %v12248_v12  ;;  %v10136_v43 = vld [vmem:[%s12929_s5 + $0x180] sm:$0xff]  }
 0x368   :  { %v12435_v50 = vrot.slane %v7430_v3, %v10268_v18  ;;  %v12438_v8 = vrot.slane %v7429_v30, %v10268_v18  ;;  %v7460_v24 = vrot.slane %v7428_v54, %v10268_v18  ;;  %v12442_v59 = vrot.slane %v7427_v26, %v10268_v18  ;;  %v13033_v1 = vld [vmem:[#allocation8_spill] sm:$0xff]  ;;  %v13035_v3 = vld [vmem:[#allocation17_spill] sm:$0xff]  ;;  %v13037_v26 = vld [vmem:[#allocation27_spill] sm:$0xff] }
 0x369   :  { %v7488_v58 = vrot.slane %v7432_v21, %v10268_v18  ;;  %v12454_v42 = vrot.slane %v7431_v10, %v10268_v18  ;;  %v7222_v39 = vcombine.high %v12312_v44, %v12315_v37  ;;  %v7357_v20 = vcombine.high %v12391_v61, %v12398_v35  ;;  %v13036_v30 = vld [vmem:[#allocation28_spill] sm:$0xff] }
 0x36a   :  { %v7493_v19 = vcombine.low %v12428_v23, %v12435_v50  ;;  %v7489_v9 = vcombine.low %v12432_v53, %v12438_v8  ;;  %v7494_v18 = vcombine.high %v12428_v23, %v12435_v50  ;;  %v7490_v62 = vcombine.high %v12432_v53, %v12438_v8 }
 0x36b   :  { %v7495_v31 = vcombine.low %v7460_v24, %v7488_v58  ;;  %v7491_v2 = vcombine.low %v12442_v59, %v12454_v42  ;;  %v7492_v46 = vcombine.high %v12442_v59, %v12454_v42  ;;  %v13031_v6 = vmov 0.0   ;;  %v13038_v24 = vld [vmem:[#allocation12_spill] sm:$0xff] }
 0x36c   :  { %8015 = vmatprep.mubr.bf16.mxu1 %v7493_v19  ;;  %v6680_v13 = vcombine.high %v13033_v1, %v13032_v11  ;;  %v6819_v7 = vcombine.high %v11941_v17, %v11957_v56  ;;  %v6815_v32 = vcombine.high %v11944_v16, %v11960_v36  ;;  %v6954_v17 = vcombine.high %v12033_v55, %v12048_v22  ;;  %v10139_v56 = vld [vmem:[%s12929_s5 + $0x198] sm:$0xff]   ;;  %v10141_v36 = vld [vmem:[%s12929_s5 + $0x1a8] sm:$0xff]   ;;  %v10142_v55 = vld [vmem:[%s12929_s5 + $0x1b0] sm:$0xff]  }
 0x36d   :  { %8016 = vmatmul.mubr.bf16.gmra.mrb[64].mxu1 %v7489_v9  ;;  %8193 = vmatprep.mubr.bf16.mxu0 %v7495_v31  ;;  %v6950_v16 = vcombine.high %v12068_v29, %v12071_v0  ;;  %v10143_v22 = vld [vmem:[%s12929_s5 + $0x1b8] sm:$0xff]   ;;  %v6682_v54 = vcombine.high %v13035_v3, %v13034_v33  ;;  %v6817_v23 = vcombine.high %v13037_v26, %v13036_v30 }
 0x36e   :  { %8056 = vmatprep.mubr.bf16.mxu1 %v6684_v52  ;;  %8194 = vmatmul.mubr.bf16.gmra.mrb[116].mxu0 %v7491_v2  ;;  %v6952_v10 = vcombine.high %v13038_v24, %v12092_v5 }
 0x36f   :  { %9964 = vmatprep.mubr.msk.f32.mxu0 %vm10169_vm1, %v13031_v6 }
 0x375   :  { %8057 = vmatmul.mubr.bf16.vlgmr.msra.gmra.mrb[68].mxu1 %v6680_v13 }
 0x376   :  { %9889 = vmatpush3.bf16.msra.mxu1 %v10136_v43  ;;  %8064 = vmatprep.mubr.bf16.mxu1 %v6819_v7 }
 0x377   :  { %9890 = vmatprep.subr.bf16.mxu1 %v13031_v6 }
 0x37a   :  { %9891 = vmatpush3.bf16.msra.mxu1 %v10137_v57 }
 0x37b   :  { %9892 = vmatprep.subr.bf16.mxu1 %v13031_v6 }
 0x37d   :  { %8065 = vmatmul.mubr.bf16.gmra.mrb[72].mxu1 %v6815_v32 }
 0x37e   :  { %8072 = vmatprep.mubr.bf16.mxu1 %v6954_v17  ;;  %9893 = vmatpush3.bf16.msra.mxu1 %v10138_v48 }
 0x37f   :  { %9894 = vmatprep.subr.bf16.mxu1 %v13031_v6 }
 0x382   :  { %9895 = vmatpush3.bf16.msra.mxu1 %v10139_v56 }
 0x383   :  { %9896 = vmatprep.subr.bf16.mxu1 %v13031_v6 }
 0x385   :  { %8073 = vmatmul.mubr.bf16.gmra.mrb[76].mxu1 %v6950_v16 }
 0x386   :  { %8080 = vmatprep.mubr.bf16.mxu1 %v7089_v28  ;;  %9897 = vmatpush3.bf16.msra.mxu1 %v10140_v15 }
 0x387   :  { %9898 = vmatprep.subr.bf16.mxu1 %v13031_v6 }
 0x38a   :  { %9899 = vmatpush3.bf16.msra.mxu1 %v10141_v36 }
 0x38b   :  { %9900 = vmatprep.subr.bf16.mxu1 %v13031_v6 }
 0x38d   :  { %8081 = vmatmul.mubr.bf16.gmra.mrb[80].mxu1 %v7085_v49 }
 0x38e   :  { %8088 = vmatprep.mubr.bf16.mxu1 %v7224_v63  ;;  %9901 = vmatpush3.bf16.msra.mxu1 %v10142_v55 }
 0x38f   :  { %9902 = vmatprep.subr.bf16.mxu1 %v13031_v6 }
 0x392   :  { %9903 = vmatpush3.bf16.msra.mxu1 %v10143_v22 }
 0x395   :  { %8089 = vmatmul.mubr.bf16.gmra.mrb[84].mxu1 %v7220_v60 }
 0x396   :  { %8096 = vmatprep.mubr.bf16.mxu1 %v7359_v14  ;;  %v9625_v29 = vpop.f32.mrb[40].mxu1 }
 0x397   :  { %v9626_v0 = vpop.f32.mrb[41].mxu1 }
 0x398   :  { %v12523_v41 = vadd.f32 %v9626_v0, %v9625_v29  ;;  %v9628_v45 = vpop.f32.mrb[42].mxu1 }
 0x399   :  { %v9629_v25 = vpop.f32.mrb[43].mxu1 }
 0x39a   :  { %v12525_v40 = vadd.f32 %v9629_v25, %v9628_v45 }
 0x39d   :  { %8097 = vmatmul.mubr.bf16.gmra.mrb[88].mxu1 %v7355_v27 }
 0x39e   :  { %8104 = vmatprep.mubr.bf16.mxu1 %v7494_v18 }
 0x3a5   :  { %8105 = vmatmul.mubr.bf16.gmra.mrb[92].mxu1 %v7490_v62 }
 0x3a6   :  { %9904 = vmatprep.mubr.msk.bf16.mxu1 %vm10169_vm1, %v13031_v6 }
 0x3ad   :  { %9905 = vmatmul.mubr.bf16.vlgmr.msra.gmra.mrb[96].mxu1 %v6682_v54  ;;  %v9403_v54 = vld [vmem:[%s12930_s6] ss:$0 sm:$0xff] }
 0x3ae   :  { %9908 = vmatprep.mubr.msk.bf16.mxu1 %vm10169_vm1, %v13031_v6 }
 0x3b2   :  { %v9741_v4 = vpop.f32.mrb[92].mxu0 }
 0x3b3   :  { %v9742_v53 = vpop.f32.mrb[93].mxu0 }
 0x3b4   :  { %v12537_v50 = vadd.f32 %v9742_v53, %v9741_v4  ;;  %v9744_v8 = vpop.f32.mrb[94].mxu0  ;;  %v6534_v53 = vcombine.high %v9403_v54, %v9403_v54 }
 0x3b5   :  { %9909 = vmatmul.mubr.bf16.gmra.mrb[100].mxu1 %v6817_v23  ;;  %v9745_v21 = vpop.f32.mrb[95].mxu0 }
 0x3b6   :  { %9912 = vmatprep.mubr.msk.bf16.mxu1 %vm10169_vm1, %v13031_v6  ;;  %v12541_v19 = vadd.f32 %v9745_v21, %v9744_v8 }
 0x3bd   :  { %9913 = vmatmul.mubr.bf16.gmra.mrb[104].mxu1 %v6952_v10 }
 0x3be   :  { %9916 = vmatprep.mubr.msk.bf16.mxu1 %vm10169_vm1, %v13031_v6 }
 0x3c5   :  { %9917 = vmatmul.mubr.bf16.gmra.mrb[108].mxu1 %v7087_v34 }
 0x3c6   :  { %9920 = vmatprep.mubr.msk.bf16.mxu1 %vm10169_vm1, %v13031_v6 }
 0x3cd   :  { %9921 = vmatmul.mubr.bf16.gmra.mrb[112].mxu1 %v7222_v39 }
 0x3ce   :  { %9924 = vmatprep.mubr.msk.bf16.mxu1 %vm10169_vm1, %v13031_v6 }
 0x3d3   :  { %v9631_v5 = vpop.f32.mrb[44].mxu1 }
 0x3d4   :  { %v9632_v12 = vpop.f32.mrb[45].mxu1 }
 0x3d5   :  { %9925 = vmatmul.mubr.bf16.gmra.mrb[116].mxu1 %v7357_v20  ;;  %v12560_v9 = vadd.f32 %v9632_v12, %v9631_v5  ;;  %v9634_v47 = vpop.f32.mrb[46].mxu1 }
 0x3d6   :  { %9928 = vmatprep.mubr.msk.bf16.mxu1 %vm10169_vm1, %v13031_v6  ;;  %v9747_v51 = vpop.f32.mrb[96].mxu0  ;;  %v9635_v37 = vpop.f32.mrb[47].mxu1 }
 0x3d7   :  { %v9748_v38 = vpop.f32.mrb[97].mxu0  ;;  %v12564_v28 = vadd.f32 %v9635_v37, %v9634_v47  ;;  %v9055_v37 = vld [vmem:[%s12931_s7] sm:$0xff] }
 0x3d8   :  { %v12562_v52 = vadd.f32 %v9748_v38, %v9747_v51  ;;  %v9750_v44 = vpop.f32.mrb[98].mxu0  ;;  %v13039_v51 = vld [vmem:[#allocation5_spill] sm:$0xff] }
 0x3d9   :  { %v9751_v58 = vpop.f32.mrb[99].mxu0  ;;  %v6541_v12 = vrot.slane %v9403_v54, %v13039_v51  ;;  %v6548_v38 = vrot.slane %v6534_v53, %v13039_v51 }
 0x3da   :  { %v12566_v49 = vadd.f32 %v9751_v58, %v9750_v44  ;;  %v9056_v58 = vld [vmem:[%s12931_s7 + $0x8] sm:$0xff] }
 0x3dd   :  { %9929 = vmatmul.mubr.bf16.gmra.mrb[120].mxu1 %v7492_v46 }
 0x3eb   :  { %v9637_v61 = vpop.f32.mrb[48].mxu1 }
 0x3ec   :  { %v9638_v35 = vpop.f32.mrb[49].mxu1 }
 0x3ed   :  { %v12571_v63 = vadd.f32 %v9638_v35, %v9637_v61  ;;  %v9640_v60 = vpop.f32.mrb[50].mxu1  ;;  %v6549_v61 = vcombine.high %v6541_v12, %v6541_v12  ;;  %v6550_v35 = vcombine.high %v6548_v38, %v6548_v38 }
 0x3ee   :  { %v9753_v14 = vpop.f32.mrb[100].mxu0  ;;  %v9641_v27 = vpop.f32.mrb[51].mxu1 }
 0x3ef   :  { %v9754_v18 = vpop.f32.mrb[101].mxu0  ;;  %v12573_v31 = vadd.f32 %v9641_v27, %v9640_v60  ;;  %v10174_v60 = vmov 0.0|0.0   ;;  %v7881_v27 = vcombine.low %v6541_v12, %v6549_v61  ;;  %v7907_v53 = vcombine.low %v6549_v61, %v6548_v38 }
 0x3f0   :  { %v12575_v2 = vadd.f32 %v9754_v18, %v9753_v14  ;;  %v9756_v62 = vpop.f32.mrb[102].mxu0  ;;  %10002 = vmatprep.subr.bf16.mxu0 %v10174_v60  ;;  %v10003_v14 = vpack.c.bf16 %v9056_v58, %v9055_v37  ;;  %v7882_v18 = vcombine.low %v6548_v38, %v6550_v35 }
 0x3f1   :  { %v9757_v34 = vpop.f32.mrb[103].mxu0 }
 0x3f2   :  { %v12577_v39 = vadd.f32 %v9757_v34, %v9756_v62  ;;  %10004 = vmatpush3.bf16.msra.mxu0 %v10003_v14  ;;  %v9057_v62 = vld [vmem:[%s12931_s7 + $0x10] sm:$0xff]  ;;  %v9058_v34 = vld [vmem:[%s12931_s7 + $0x18] sm:$0xff] }
 0x3f3   :  { %10005 = vmatprep.subr.bf16.mxu0 %v10174_v60 }
 0x404   :  { %v9643_v20 = vpop.f32.mrb[52].mxu1 }
 0x405   :  { %v9644_v43 = vpop.f32.mrb[53].mxu1 }
 0x406   :  { %v12579_v59 = vadd.f32 %v9644_v43, %v9643_v20  ;;  %v9646_v42 = vpop.f32.mrb[54].mxu1  ;;  %v9059_v20 = vld [vmem:[%s12931_s7 + $0x20] sm:$0xff]  ;;  %v10006_v43 = vpack.c.bf16 %v9058_v34, %v9057_v62 }
 0x407   :  { %v9647_v46 = vpop.f32.mrb[55].mxu1 }
 0x408   :  { %v12581_v11 = vadd.f32 %v9647_v46, %v9646_v42  ;;  %v9060_v42 = vld [vmem:[%s12931_s7 + $0x28] sm:$0xff]  ;;  %v7898_v46 = vcombine.low %v6548_v38, %v6541_v12  ;;  %10007 = vmatpush3.bf16.msra.mxu0 %v10006_v43 }
 0x409   :  { %10008 = vmatprep.subr.bf16.mxu0 %v10174_v60 }
 0x40e   :  { %v9759_v1 = vpop.f32.mrb[104].mxu0 }
 0x40f   :  { %v9760_v13 = vpop.f32.mrb[105].mxu0 }
 0x410   :  { %v12583_v7 = vadd.f32 %v9760_v13, %v9759_v1  ;;  %v9762_v57 = vpop.f32.mrb[106].mxu0 }
 0x411   :  { %v9763_v48 = vpop.f32.mrb[107].mxu0 }
 0x412   :  { %v12585_v32 = vadd.f32 %v9763_v48, %v9762_v57  ;;  %v10009_v57 = vpack.c.bf16 %v9060_v42, %v9059_v20  ;;  %v7889_v48 = vrot.slane %v7881_v27, %v13039_v51 }
 0x414   :  { %10010 = vmatpush3.bf16.msra.mxu0 %v10009_v57  ;;  %v9063_v57 = vld [vmem:[%s12931_s7 + $0x40] sm:$0xff] }
 0x415   :  { %10011 = vmatprep.subr.bf16.mxu0 %v10174_v60 }
 0x41d   :  { %v9649_v17 = vpop.f32.mrb[56].mxu1 }
 0x41e   :  { %v9765_v56 = vpop.f32.mrb[108].mxu0  ;;  %v9650_v15 = vpop.f32.mrb[57].mxu1 }
 0x41f   :  { %v12587_v16 = vadd.f32 %v9650_v15, %v9649_v17  ;;  %v9766_v36 = vpop.f32.mrb[109].mxu0  ;;  %v9652_v55 = vpop.f32.mrb[58].mxu1  ;;  %v7896_v17 = vrot.slane %v7882_v18, %v13039_v51  ;;  %v7915_v18 = vrot.slane %v7907_v53, %v13039_v51 }
 0x420   :  { %v12589_v22 = vadd.f32 %v9766_v36, %v9765_v56  ;;  %v9768_v29 = vpop.f32.mrb[110].mxu0  ;;  %v9653_v0 = vpop.f32.mrb[59].mxu1 }
 0x421   :  { %v12591_v45 = vadd.f32 %v9653_v0, %v9652_v55  ;;  %v9769_v25 = vpop.f32.mrb[111].mxu0 }
 0x422   :  { %v12593_v33 = vadd.f32 %v9769_v25, %v9768_v29  ;;  %v7905_v29 = vrot.slane %v7898_v46, %v13039_v51 }
 0x424   :  { %v12649_v37 = vcombine.low %v7889_v48, %v7905_v29 }
 0x42b   :  { %v9655_v3 = vpop.f32.mrb[60].mxu1 }
 0x42c   :  { %v9656_v30 = vpop.f32.mrb[61].mxu1 }
 0x42d   :  { %v12598_v26 = vadd.f32 %v9656_v30, %v9655_v3  ;;  %v9658_v23 = vpop.f32.mrb[62].mxu1  ;;  %v9061_v30 = vld [vmem:[%s12931_s7 + $0x30] sm:$0xff] }
 0x42e   :  { %v9659_v4 = vpop.f32.mrb[63].mxu1 }
 0x42f   :  { %v12600_v8 = vadd.f32 %v9659_v4, %v9658_v23  ;;  %v9062_v23 = vld [vmem:[%s12931_s7 + $0x38] sm:$0xff]  ;;  %v12644_v4 = vcombine.low %v7889_v48, %v7896_v17 }
 0x431   :  { %v7970_v27 = vadd.f32 %v12523_v41, %v12644_v4  ;;  %v12663_v41 = vcombine.low %v7915_v18, %v7889_v48 }
 0x432   :  { %v9771_v21 = vpop.f32.mrb[112].mxu0 }
 0x433   :  { %v9772_v24 = vpop.f32.mrb[113].mxu0  ;;  %v7981_v53 = vadd.f32 %v12564_v28, %v12663_v41  ;;  %v7926_v28 = vcombine.low %v7905_v29, %v7915_v18 }
 0x434   :  { %v12602_v10 = vadd.f32 %v9772_v24, %v9771_v21  ;;  %v9774_v5 = vpop.f32.mrb[114].mxu0  ;;  %v7908_v21 = vcombine.low %v6550_v35, %v6541_v12  ;;  %v7973_v35 = vadd.f32 %v12525_v40, %v12649_v37  ;;  %v9064_v40 = vld [vmem:[%s12931_s7 + $0x48] sm:$0xff] }
 0x435   :  { %v9775_v47 = vpop.f32.mrb[115].mxu0 }
 0x436   :  { %v12606_v44 = vadd.f32 %v9775_v47, %v9774_v5  ;;  %v10012_v5 = vpack.c.bf16 %v9062_v23, %v9061_v30  ;;  %v7922_v62 = vrot.slane %v7908_v21, %v13039_v51 }
 0x438   :  { %10013 = vmatpush3.bf16.msra.mxu0 %v10012_v5  ;;  %v12658_v43 = vcombine.low %v7915_v18, %v7922_v62  ;;  %v9067_v5 = vld [vmem:[%s12931_s7 + $0x60] sm:$0xff] }
 0x439   :  { %10014 = vmatprep.subr.bf16.mxu0 %v10174_v60 }
 0x440   :  { %v9661_v1 = vpop.f32.mrb[64].mxu1 }
 0x441   :  { %v9662_v13 = vpop.f32.mrb[65].mxu1  ;;  %v9777_v36 = vpop.f32.mrb[116].mxu0 }
 0x442   :  { %v12630_v56 = vadd.f32 %v9662_v13, %v9661_v1  ;;  %v9664_v15 = vpop.f32.mrb[66].mxu1  ;;  %v9778_v0 = vpop.f32.mrb[117].mxu0 }
 0x443   :  { %v9665_v55 = vpop.f32.mrb[67].mxu1  ;;  %v12636_v3 = vadd.f32 %v9778_v0, %v9777_v36  ;;  %v9780_v54 = vpop.f32.mrb[118].mxu0  ;;  %v10015_v36 = vpack.c.bf16 %v9064_v40, %v9063_v57  ;;  %v7927_v40 = vcombine.low %v7922_v62, %v7915_v18  ;;  %v7997_v18 = vadd.f32 %v12581_v11, %v12644_v4 }
 0x444   :  { %v12634_v25 = vadd.f32 %v9665_v55, %v9664_v15  ;;  %v9781_v24 = vpop.f32.mrb[119].mxu0  ;;  %v9065_v15 = vld [vmem:[%s12931_s7 + $0x50] sm:$0xff]  ;;  %v9066_v55 = vld [vmem:[%s12931_s7 + $0x58] sm:$0xff]  ;;  %v8005_v11 = vadd.f32 %v12591_v45, %v12658_v43 }
 0x445   :  { %v12647_v47 = vadd.f32 %v9781_v24, %v9780_v54  ;;  %10016 = vmatpush3.bf16.msra.mxu0 %v10015_v36  ;;  %v10018_v23 = vpack.c.bf16 %v9066_v55, %v9065_v15 }
 0x446   :  { %10017 = vmatprep.subr.bf16.mxu0 %v10174_v60 }
 0x448   :  { %v9683_v58 = vpop.f32.mrb[68].mxu1 }
 0x449   :  { %v9684_v14 = vpop.f32.mrb[69].mxu1  ;;  %10019 = vmatpush3.bf16.msra.mxu0 %v10018_v23 }
 0x44a   :  { %v9685_v38 = vadd.f32 %v9684_v14, %v9683_v58  ;;  %v9686_v12 = vpop.f32.mrb[70].mxu1  ;;  %v7925_v58 = vcombine.low %v7896_v17, %v7889_v48  ;;  %10020 = vmatprep.subr.bf16.mxu0 %v10174_v60  ;;  %v9070_v48 = vld [vmem:[%s12931_s7 + $0x78] sm:$0xff] }
 0x44b   :  { %v9687_v61 = vpop.f32.mrb[71].mxu1 }
 0x44c   :  { %v8059_v34 = vadd.f32 %v9685_v38, %v7970_v27  ;;  %v9688_v20 = vadd.f32 %v9687_v61, %v9686_v12 }
 0x44e   :  { %v8062_v42 = vadd.f32 %v9688_v20, %v7973_v35  ;;  %v12661_v46 = vadd.f32 %v12537_v50, %v8059_v34  ;;  %v9069_v35 = vld [vmem:[%s12931_s7 + $0x70] sm:$0xff] }
 0x450   :  { %v9689_v1 = vpop.f32.mrb[72].mxu1  ;;  %v12666_v13 = vadd.f32 %v12541_v19, %v8062_v42  ;;  %v7978_v19 = vadd.f32 %v12560_v9, %v12658_v43  ;;  %v9068_v9 = vld [vmem:[%s12931_s7 + $0x68] sm:$0xff]  ;;  %v10024_v42 = vpack.c.bf16 %v9070_v48, %v9069_v35 }
 0x451   :  { %v9690_v50 = vpop.f32.mrb[73].mxu1  ;;  %v10021_v38 = vpack.c.bf16 %v9068_v9, %v9067_v5 }
 0x452   :  { %v9691_v0 = vadd.f32 %v9690_v50, %v9689_v1  ;;  %v9692_v54 = vpop.f32.mrb[74].mxu1 }
 0x453   :  { %v9693_v30 = vpop.f32.mrb[75].mxu1  ;;  %10022 = vmatpush3.bf16.msra.mxu0 %v10021_v38 }
 0x454   :  { %v8067_v21 = vadd.f32 %v9691_v0, %v7978_v19  ;;  %v9694_v24 = vadd.f32 %v9693_v30, %v9692_v54  ;;  %10023 = vmatprep.subr.bf16.mxu0 %v10174_v60  ;;  %v7994_v19 = vadd.f32 %v12579_v59, %v7927_v40  ;;  %v8002_v59 = vadd.f32 %v12587_v16, %v12649_v37 }
 0x455   :  { %v8010_v16 = vadd.f32 %v12598_v26, %v12663_v41 }
 0x456   :  { %v8070_v14 = vadd.f32 %v9694_v24, %v7981_v53  ;;  %v12692_v27 = vadd.f32 %v12562_v52, %v8067_v21  ;;  %v7986_v52 = vadd.f32 %v12571_v63, %v7925_v58 }
 0x457   :  { %10025 = vmatpush3.bf16.msra.mxu0 %v10024_v42  ;;  %v8018_v42 = vadd.f32 %v12630_v56, %v7926_v28 }
 0x458   :  { %v9695_v12 = vpop.f32.mrb[76].mxu1  ;;  %v12695_v61 = vadd.f32 %v12566_v49, %v8070_v14  ;;  %v7989_v49 = vadd.f32 %v12573_v31, %v7926_v28  ;;  %10026 = vmatprep.subr.bf16.mxu0 %v10174_v60 }
 0x459   :  { %v9696_v17 = vpop.f32.mrb[77].mxu1 }
 0x45a   :  { %v9697_v34 = vadd.f32 %v9696_v17, %v9695_v12  ;;  %v9698_v20 = vpop.f32.mrb[78].mxu1 }
 0x45b   :  { %v9699_v29 = vpop.f32.mrb[79].mxu1 }
 0x45c   :  { %v8075_v1 = vadd.f32 %v9697_v34, %v7986_v52  ;;  %v9700_v57 = vadd.f32 %v9699_v29, %v9698_v20  ;;  %v8013_v52 = vadd.f32 %v12600_v8, %v7925_v58 }
 0x45e   :  { %v8078_v15 = vadd.f32 %v9700_v57, %v7989_v49  ;;  %v12708_v50 = vadd.f32 %v12575_v2, %v8075_v1  ;;  %v8021_v1 = vadd.f32 %v12634_v25, %v7927_v40 }
 0x460   :  { %v9701_v36 = vpop.f32.mrb[80].mxu1  ;;  %v12711_v63 = vadd.f32 %v12577_v39, %v8078_v15 }
 0x461   :  { %v9702_v55 = vpop.f32.mrb[81].mxu1 }
 0x462   :  { %v9703_v31 = vadd.f32 %v9702_v55, %v9701_v36  ;;  %v9704_v0 = vpop.f32.mrb[82].mxu1 }
 0x463   :  { %v9705_v54 = vpop.f32.mrb[83].mxu1 }
 0x464   :  { %v8083_v62 = vadd.f32 %v9703_v31, %v7994_v19  ;;  %v9706_v30 = vadd.f32 %v9705_v54, %v9704_v0 }
 0x466   :  { %v8086_v2 = vadd.f32 %v9706_v30, %v7997_v18  ;;  %v12718_v23 = vadd.f32 %v12583_v7, %v8083_v62 }
 0x468   :  { %v9707_v53 = vpop.f32.mrb[84].mxu1  ;;  %v12721_v39 = vadd.f32 %v12585_v32, %v8086_v2 }
 0x469   :  { %v9708_v21 = vpop.f32.mrb[85].mxu1 }
 0x46a   :  { %v9709_v24 = vadd.f32 %v9708_v21, %v9707_v53  ;;  %v9710_v5 = vpop.f32.mrb[86].mxu1 }
 0x46b   :  { %v9711_v9 = vpop.f32.mrb[87].mxu1 }
 0x46c   :  { %v8091_v4 = vadd.f32 %v9709_v24, %v8002_v59  ;;  %v9712_v14 = vadd.f32 %v9711_v9, %v9710_v5 }
 0x46e   :  { %v8094_v38 = vadd.f32 %v9712_v14, %v8005_v11  ;;  %v12728_v7 = vadd.f32 %v12589_v22, %v8091_v4 }
 0x470   :  { %v9713_v12 = vpop.f32.mrb[88].mxu1  ;;  %v12731_v32 = vadd.f32 %v12593_v33, %v8094_v38 }
 0x471   :  { %v9714_v35 = vpop.f32.mrb[89].mxu1 }
 0x472   :  { %v9715_v37 = vadd.f32 %v9714_v35, %v9713_v12  ;;  %v9716_v48 = vpop.f32.mrb[90].mxu1 }
 0x473   :  { %v9717_v17 = vpop.f32.mrb[91].mxu1 }
 0x474   :  { %v8099_v45 = vadd.f32 %v9715_v37, %v8010_v16  ;;  %v9718_v43 = vadd.f32 %v9717_v17, %v9716_v48 }
 0x476   :  { %v8102_v34 = vadd.f32 %v9718_v43, %v8013_v52  ;;  %v12737_v20 = vadd.f32 %v12602_v10, %v8099_v45 }
 0x478   :  { %v9719_v22 = vpop.f32.mrb[92].mxu1  ;;  %v12740_v29 = vadd.f32 %v12606_v44, %v8102_v34 }
 0x479   :  { %v9720_v33 = vpop.f32.mrb[93].mxu1 }
 0x47a   :  { %v9721_v49 = vadd.f32 %v9720_v33, %v9719_v22  ;;  %v9722_v26 = vpop.f32.mrb[94].mxu1 }
 0x47b   :  { %v9723_v41 = vpop.f32.mrb[95].mxu1 }
 0x47c   :  { %v8107_v57 = vadd.f32 %v9721_v49, %v8018_v42  ;;  %v9724_v8 = vadd.f32 %v9723_v41, %v9722_v26 }
 0x47e   :  { %v8110_v58 = vadd.f32 %v9724_v8, %v8021_v1  ;;  %v12745_v15 = vadd.f32 %v12636_v3, %v8107_v57 }
 0x480   :  { %v8236_v10 = vpop.f32.mrb[96].mxu1  ;;  %v12748_v36 = vadd.f32 %v12647_v47, %v8110_v58 }
 0x481   :  { %v8237_v44 = vadd.f32 %v8236_v10, %v12661_v46  ;;  %v9906_v55 = vpop.f32.mrb[97].mxu1 }
 0x482   :  { %v8239_v19 = vpop.f32.mrb[98].mxu1 }
 0x483   :  { %v8305_v56 = vcombine.high %v8237_v44, %v8237_v44  ;;  %v8312_v28 = vrot.slane %v8237_v44, %v13039_v51  ;;  %v8240_v31 = vadd.f32 %v8239_v19, %v12666_v13  ;;  %v9907_v25 = vpop.f32.mrb[99].mxu1 }
 0x485   :  { %v8319_v40 = vrot.slane %v8305_v56, %v13039_v51  ;;  %v8320_v0 = vcombine.high %v8312_v28, %v8312_v28  ;;  %v8322_v54 = vcombine.high %v8240_v31, %v8240_v31  ;;  %v8329_v3 = vrot.slane %v8240_v31, %v13039_v51 }
 0x486   :  { %v8599_v62 = vmax.f32 %v8312_v28, 0.0 }
 0x487   :  { %v8321_v18 = vcombine.high %v8319_v40, %v8319_v40  ;;  %v8600_v47 = vmax.f32 %v8320_v0, 0.0  ;;  %v8336_v30 = vrot.slane %v8322_v54, %v13039_v51  ;;  %v8337_v46 = vcombine.high %v8329_v3, %v8329_v3 }
 0x488   :  { %v8244_v2 = vpop.f32.mrb[100].mxu1  ;;  %v8601_v53 = vmax.f32 %v8319_v40, 0.0  ;;  %v8603_v13 = vmax.f32 %v8329_v3, 0.0 }
 0x489   :  { %v8602_v21 = vmax.f32 %v8321_v18, 0.0  ;;  %v8711_v59 = vcombine.low %v8599_v62, %v8600_v47  ;;  %v8605_v24 = vmax.f32 %v8336_v30, 0.0  ;;  %v9910_v5 = vpop.f32.mrb[101].mxu1  ;;  %v8604_v9 = vmax.f32 %v8337_v46, 0.0 }
 0x48a   :  { %v8245_v11 = vadd.f32 %v8244_v2, %v12692_v27  ;;  %v8247_v4 = vpop.f32.mrb[102].mxu1  ;;  %v8338_v38 = vcombine.high %v8336_v30, %v8336_v30 }
 0x48b   :  { %v8712_v14 = vcombine.low %v8601_v53, %v8602_v21  ;;  %v9911_v12 = vpop.f32.mrb[103].mxu1  ;;  %v8728_v35 = vcombine.low %v8603_v13, %v8604_v9  ;;  %v8248_v48 = vadd.f32 %v8247_v4, %v12695_v61  ;;  %v8719_v17 = vrot.slane %v8711_v59, %v13039_v51 }
 0x48c   :  { %v8339_v16 = vcombine.high %v8245_v11, %v8245_v11  ;;  %v8346_v37 = vrot.slane %v8245_v11, %v13039_v51  ;;  %v8742_v45 = vrot.slane %v8605_v24, %v13039_v51  ;;  %v8606_v42 = vmax.f32 %v8338_v38, 0.0 }
 0x48d   :  { %v8726_v52 = vrot.slane %v8712_v14, %v13039_v51  ;;  %v8735_v43 = vrot.slane %v8728_v35, %v13039_v51  ;;  %v8356_v49 = vcombine.high %v8248_v48, %v8248_v48  ;;  %v8363_v26 = vrot.slane %v8248_v48, %v13039_v51 }
 0x48e   :  { %v8353_v27 = vrot.slane %v8339_v16, %v13039_v51  ;;  %v8354_v34 = vcombine.high %v8346_v37, %v8346_v37  ;;  %v8607_v22 = vmax.f32 %v8346_v37, 0.0 }
 0x48f   :  { %v8727_v33 = vcombine.low %v8719_v17, %v8726_v52  ;;  %v8743_v41 = vcombine.low %v8735_v43, %v8742_v45  ;;  %v8370_v10 = vrot.slane %v8356_v49, %v13039_v51  ;;  %v8371_v44 = vcombine.high %v8363_v26, %v8363_v26 }
 0x490   :  { %v8355_v1 = vcombine.high %v8353_v27, %v8353_v27  ;;  %v8608_v61 = vmax.f32 %v8354_v34, 0.0  ;;  %v8609_v57 = vmax.f32 %v8353_v27, 0.0  ;;  %v8252_v8 = vpop.f32.mrb[104].mxu1  ;;  %v8744_v58 = vcombine.low %v8606_v42, %v8607_v22 }
 0x491   :  { %v8611_v55 = vmax.f32 %v8363_v26, 0.0  ;;  %v9914_v19 = vpop.f32.mrb[105].mxu1  ;;  %v8991_v56 = vsel %vm1561_vm0, %v8743_v41, -inf  ;;  %v8253_v25 = vadd.f32 %v8252_v8, %v12708_v50  ;;  %v8372_v3 = vcombine.high %v8370_v10, %v8370_v10 }
 0x492   :  { %v8610_v28 = vmax.f32 %v8355_v1, 0.0  ;;  %v8745_v31 = vcombine.low %v8608_v61, %v8609_v57  ;;  %v8255_v40 = vpop.f32.mrb[106].mxu1  ;;  %v8992_v0 = vmax.f32 %v8727_v33, %v8991_v56  ;;  %v8752_v54 = vrot.slane %v8744_v58, %v13039_v51 }
 0x493   :  { %v8612_v18 = vmax.f32 %v8371_v44, 0.0  ;;  %v9915_v62 = vpop.f32.mrb[107].mxu1  ;;  %v8613_v30 = vmax.f32 %v8370_v10, 0.0  ;;  %v8373_v2 = vcombine.high %v8253_v25, %v8253_v25  ;;  %v8614_v21 = vmax.f32 %v8372_v3, 0.0 }
 0x494   :  { %v8759_v47 = vrot.slane %v8745_v31, %v13039_v51  ;;  %v8761_v46 = vcombine.low %v8610_v28, %v8611_v55  ;;  %v8993_v53 = vrot.slane %v8992_v0, 4  ;;  %v8380_v24 = vrot.slane %v8253_v25, %v13039_v51 }
 0x495   :  { %v8775_v59 = vrot.slane %v8612_v18, %v13039_v51  ;;  %v8387_v13 = vrot.slane %v8373_v2, %v13039_v51  ;;  %v8256_v9 = vadd.f32 %v8255_v40, %v12711_v63  ;;  %v8777_v4 = vcombine.low %v8613_v30, %v8614_v21 }
 0x496   :  { %v8760_v5 = vcombine.low %v8752_v54, %v8759_v47  ;;  %v8768_v50 = vrot.slane %v8761_v46, %v13039_v51  ;;  %v8994_v11 = vmax.f32 %v8992_v0, %v8993_v53  ;;  %v8388_v14 = vcombine.high %v8380_v24, %v8380_v24 }
 0x497   :  { %v8615_v38 = vmax.f32 %v8380_v24, 0.0  ;;  %v8389_v35 = vcombine.high %v8387_v13, %v8387_v13  ;;  %v8617_v16 = vmax.f32 %v8387_v13, 0.0  ;;  %v8390_v37 = vcombine.high %v8256_v9, %v8256_v9 }
 0x498   :  { %v8776_v12 = vcombine.low %v8768_v50, %v8775_v59  ;;  %v8260_v48 = vpop.f32.mrb[108].mxu1  ;;  %v8995_v17 = vrot.slane %v8994_v11, 2  ;;  %v8785_v52 = vrot.slane %v8777_v4, %v13039_v51  ;;  %v8616_v45 = vmax.f32 %v8388_v14, 0.0 }
 0x499   :  { %v8397_v43 = vrot.slane %v8256_v9, %v13039_v51  ;;  %v9918_v27 = vpop.f32.mrb[109].mxu1  ;;  %v8618_v22 = vmax.f32 %v8389_v35, 0.0  ;;  %v8404_v63 = vrot.slane %v8390_v37, %v13039_v51  ;;  %v8261_v33 = vadd.f32 %v8260_v48, %v12718_v23 }
 0x49a   :  { %v8999_v34 = vsel %vm1561_vm0, %v8776_v12, -inf  ;;  %v8263_v42 = vpop.f32.mrb[110].mxu1  ;;  %v8996_v49 = vmax.f32 %v8994_v11, %v8995_v17  ;;  %v8778_v41 = vcombine.low %v8615_v38, %v8616_v45 }
 0x49b   :  { %v9000_v26 = vmax.f32 %v8760_v5, %v8999_v34  ;;  %v8405_v1 = vcombine.high %v8397_v43, %v8397_v43  ;;  %v9919_v61 = vpop.f32.mrb[111].mxu1  ;;  %v8794_v57 = vcombine.low %v8617_v16, %v8618_v22  ;;  %v8406_v8 = vcombine.high %v8404_v63, %v8404_v63 }
 0x49c   :  { %v8619_v58 = vmax.f32 %v8397_v43, 0.0  ;;  %v8621_v10 = vmax.f32 %v8404_v63, 0.0  ;;  %v8997_v44 = vrot.slane %v8996_v49, 1  ;;  %v8792_v19 = vrot.slane %v8778_v41, %v13039_v51 }
 0x49d   :  { %v9001_v55 = vrot.slane %v9000_v26, 4  ;;  %v8620_v56 = vmax.f32 %v8405_v1, 0.0  ;;  %v8801_v28 = vrot.slane %v8794_v57, %v13039_v51  ;;  %v8407_v23 = vcombine.high %v8261_v33, %v8261_v33 }
 0x49e   :  { %v8808_v31 = vrot.slane %v8619_v58, %v13039_v51  ;;  %v8793_v40 = vcombine.low %v8785_v52, %v8792_v19  ;;  %v8622_v0 = vmax.f32 %v8406_v8, 0.0  ;;  %v8414_v3 = vrot.slane %v8261_v33, %v13039_v51 }
 0x49f   :  { %v9002_v25 = vmax.f32 %v9000_v26, %v9001_v55  ;;  %v8421_v18 = vrot.slane %v8407_v23, %v13039_v51  ;;  %v8264_v62 = vadd.f32 %v8263_v42, %v12721_v39  ;;  %v12786_v30 = vmax.f32 %v8996_v49, %v8997_v44 }
 0x4a0   :  { %v8809_v54 = vcombine.low %v8801_v28, %v8808_v31  ;;  %v8268_v47 = vpop.f32.mrb[112].mxu1  ;;  %v8810_v2 = vcombine.low %v8620_v56, %v8621_v10  ;;  %v8422_v24 = vcombine.high %v8414_v3, %v8414_v3  ;;  %v8623_v50 = vmax.f32 %v8414_v3, 0.0 }
 0x4a1   :  { %v9003_v46 = vrot.slane %v9002_v25, 2  ;;  %v8269_v53 = vadd.f32 %v8268_v47, %v12728_v7  ;;  %v9922_v21 = vpop.f32.mrb[113].mxu1  ;;  %v8423_v5 = vcombine.high %v8421_v18, %v8421_v18  ;;  %v8625_v4 = vmax.f32 %v8421_v18, 0.0 }
 0x4a2   :  { %v9007_v59 = vsel %vm1561_vm0, %v8809_v54, -inf  ;;  %v8271_v13 = vpop.f32.mrb[114].mxu1  ;;  %v8424_v14 = vcombine.high %v8264_v62, %v8264_v62  ;;  %v8624_v39 = vmax.f32 %v8422_v24, 0.0  ;;  %v8811_v35 = vcombine.low %v8622_v0, %v8623_v50 }
 0x4a3   :  { %v9004_v9 = vmax.f32 %v9002_v25, %v9003_v46  ;;  %v9008_v11 = vmax.f32 %v8793_v40, %v9007_v59  ;;  %v9923_v38 = vpop.f32.mrb[115].mxu1  ;;  %v8626_v12 = vmax.f32 %v8423_v5, 0.0  ;;  %v8431_v16 = vrot.slane %v8264_v62, %v13039_v51 }
 0x4a4   :  { %v8818_v37 = vrot.slane %v8810_v2, %v13039_v51  ;;  %v8438_v48 = vrot.slane %v8424_v14, %v13039_v51  ;;  %v8441_v17 = vcombine.high %v8269_v53, %v8269_v53  ;;  %v8825_v52 = vrot.slane %v8811_v35, %v13039_v51 }
 0x4a5   :  { %v9009_v7 = vrot.slane %v9008_v11, 4  ;;  %v8827_v45 = vcombine.low %v8624_v39, %v8625_v4  ;;  %v8841_v43 = vrot.slane %v8626_v12, %v13039_v51  ;;  %v8439_v27 = vcombine.high %v8431_v16, %v8431_v16 }
 0x4a6   :  { %v9005_v34 = vrot.slane %v9004_v9, 1  ;;  %v8440_v63 = vcombine.high %v8438_v48, %v8438_v48  ;;  %v8627_v33 = vmax.f32 %v8431_v16, 0.0  ;;  %v8826_v42 = vcombine.low %v8818_v37, %v8825_v52 }
 0x4a7   :  { %v9010_v22 = vmax.f32 %v9008_v11, %v9009_v7  ;;  %v8834_v49 = vrot.slane %v8827_v45, %v13039_v51  ;;  %v8628_v26 = vmax.f32 %v8439_v27, 0.0  ;;  %v8629_v41 = vmax.f32 %v8438_v48, 0.0 }
 0x4a8   :  { %v8276_v1 = vpop.f32.mrb[116].mxu1  ;;  %v8630_v57 = vmax.f32 %v8440_v63, 0.0  ;;  %v8448_v8 = vrot.slane %v8269_v53, %v13039_v51  ;;  %v8455_v58 = vrot.slane %v8441_v17, %v13039_v51  ;;  %v8272_v19 = vadd.f32 %v8271_v13, %v12731_v32 }
 0x4a9   :  { %v9011_v61 = vrot.slane %v9010_v22, 2  ;;  %v9926_v10 = vpop.f32.mrb[117].mxu1  ;;  %v8842_v44 = vcombine.low %v8834_v49, %v8841_v43  ;;  %v8843_v55 = vcombine.low %v8627_v33, %v8628_v26  ;;  %v8277_v56 = vadd.f32 %v8276_v1, %v12737_v20 }
 0x4aa   :  { %v8279_v28 = vpop.f32.mrb[118].mxu1  ;;  %v8844_v23 = vcombine.low %v8629_v41, %v8630_v57  ;;  %v8456_v25 = vcombine.high %v8448_v8, %v8448_v8  ;;  %v8457_v40 = vcombine.high %v8455_v58, %v8455_v58  ;;  %v12800_v54 = vmax.f32 %v9004_v9, %v9005_v34 }
 0x4ab   :  { %v9012_v31 = vmax.f32 %v9010_v22, %v9011_v61  ;;  %v9927_v0 = vpop.f32.mrb[119].mxu1  ;;  %v9015_v3 = vsel %vm1561_vm0, %v8842_v44, -inf  ;;  %v8851_v18 = vrot.slane %v8843_v55, %v13039_v51  ;;  %v8633_v62 = vmax.f32 %v8455_v58, 0.0 }
 0x4ac   :  { %v9016_v47 = vmax.f32 %v8826_v42, %v9015_v3  ;;  %v8858_v46 = vrot.slane %v8844_v23, %v13039_v51  ;;  %v8631_v2 = vmax.f32 %v8448_v8, 0.0  ;;  %v8632_v32 = vmax.f32 %v8456_v25, 0.0 }
 0x4ad   :  { %v9013_v53 = vrot.slane %v9012_v31, 1  ;;  %v8634_v20 = vmax.f32 %v8457_v40, 0.0  ;;  %v8458_v21 = vcombine.high %v8272_v19, %v8272_v19  ;;  %v8465_v59 = vrot.slane %v8272_v19, %v13039_v51 }
 0x4ae   :  { %v9017_v24 = vrot.slane %v9016_v47, 4  ;;  %v8859_v5 = vcombine.low %v8851_v18, %v8858_v46  ;;  %v8860_v50 = vcombine.low %v8631_v2, %v8632_v32  ;;  %v8874_v13 = vrot.slane %v8633_v62, %v13039_v51 }
 0x4af   :  { %v8472_v9 = vrot.slane %v8458_v21, %v13039_v51  ;;  %v8473_v11 = vcombine.high %v8465_v59, %v8465_v59  ;;  %v8635_v4 = vmax.f32 %v8465_v59, 0.0  ;;  %v8475_v14 = vcombine.high %v8277_v56, %v8277_v56 }
 0x4b0   :  { %v8284_v38 = vpop.f32.mrb[120].mxu1  ;;  %v9018_v39 = vmax.f32 %v9016_v47, %v9017_v24  ;;  %v8867_v12 = vrot.slane %v8860_v50, %v13039_v51  ;;  %v8482_v35 = vrot.slane %v8277_v56, %v13039_v51  ;;  %v8280_v16 = vadd.f32 %v8279_v28, %v12740_v29 }
 0x4b1   :  { %v9930_v37 = vpop.f32.mrb[121].mxu1  ;;  %v8474_v7 = vcombine.high %v8472_v9, %v8472_v9  ;;  %v8636_v48 = vmax.f32 %v8473_v11, 0.0  ;;  %v8637_v17 = vmax.f32 %v8472_v9, 0.0  ;;  %v8876_v52 = vcombine.low %v8634_v20, %v8635_v4 }
 0x4b2   :  { %v8287_v45 = vpop.f32.mrb[122].mxu1  ;;  %v9019_v43 = vrot.slane %v9018_v39, 2  ;;  %v8875_v27 = vcombine.low %v8867_v12, %v8874_v13  ;;  %v8489_v34 = vrot.slane %v8475_v14, %v13039_v51  ;;  %v8490_v22 = vcombine.high %v8482_v35, %v8482_v35 }
 0x4b3   :  { %v9931_v63 = vpop.f32.mrb[123].mxu1  ;;  %v8638_v33 = vmax.f32 %v8474_v7, 0.0  ;;  %v8877_v42 = vcombine.low %v8636_v48, %v8637_v17  ;;  %v8884_v49 = vrot.slane %v8876_v52, %v13039_v51  ;;  %v8639_v26 = vmax.f32 %v8482_v35, 0.0 }
 0x4b4   :  { %v12813_v41 = vmax.f32 %v9018_v39, %v9019_v43  ;;  %v9023_v29 = vsel %vm1561_vm0, %v8875_v27, -inf  ;;  %v8491_v1 = vcombine.high %v8489_v34, %v8489_v34  ;;  %v8640_v61 = vmax.f32 %v8490_v22, 0.0 }
 0x4b5   :  { %v12816_v57 = vmax.f32 %v9012_v31, %v9013_v53  ;;  %v9024_v8 = vmax.f32 %v8859_v5, %v9023_v29  ;;  %v8891_v58 = vrot.slane %v8877_v42, %v13039_v51  ;;  %v8893_v10 = vcombine.low %v8638_v33, %v8639_v26 }
 0x4b6   :  { %v8641_v44 = vmax.f32 %v8489_v34, 0.0  ;;  %v8642_v55 = vmax.f32 %v8491_v1, 0.0  ;;  %v8907_v19 = vrot.slane %v8640_v61, %v13039_v51  ;;  %v8492_v56 = vcombine.high %v8280_v16, %v8280_v16 }
 0x4b7   :  { %v9025_v28 = vrot.slane %v9024_v8, 4  ;;  %v8892_v23 = vcombine.low %v8884_v49, %v8891_v58  ;;  %v8900_v25 = vrot.slane %v8893_v10, %v13039_v51  ;;  %v8499_v40 = vrot.slane %v8280_v16, %v13039_v51 }
 0x4b8   :  { %v9021_v0 = vrot.slane %v12813_v41, 1  ;;  %v8909_v3 = vcombine.low %v8641_v44, %v8642_v55  ;;  %v8506_v31 = vrot.slane %v8492_v56, %v13039_v51  ;;  %v8285_v18 = vadd.f32 %v8284_v38, %v12745_v15 }
 0x4b9   :  { %v9026_v62 = vmax.f32 %v9024_v8, %v9025_v28  ;;  %v8908_v47 = vcombine.low %v8900_v25, %v8907_v19  ;;  %v8507_v46 = vcombine.high %v8499_v40, %v8499_v40  ;;  %v8643_v2 = vmax.f32 %v8499_v40, 0.0 }
 0x4ba   :  { %v8917_v32 = vrot.slane %v8909_v3, %v13039_v51  ;;  %v8508_v53 = vcombine.high %v8506_v31, %v8506_v31  ;;  %v8645_v20 = vmax.f32 %v8506_v31, 0.0  ;;  %v8509_v21 = vcombine.high %v8285_v18, %v8285_v18 }
 0x4bb   :  { %v9027_v59 = vrot.slane %v9026_v62, 2  ;;  %v9031_v24 = vsel %vm1561_vm0, %v8908_v47, -inf  ;;  %v8644_v5 = vmax.f32 %v8507_v46, 0.0  ;;  %v8516_v50 = vrot.slane %v8285_v18, %v13039_v51 }
 0x4bc   :  { %v9032_v13 = vmax.f32 %v8892_v23, %v9031_v24  ;;  %v8646_v9 = vmax.f32 %v8508_v53, 0.0  ;;  %v8523_v15 = vrot.slane %v8509_v21, %v13039_v51  ;;  %v8288_v11 = vadd.f32 %v8287_v45, %v12748_v36 }
 0x4bd   :  { %v9028_v4 = vmax.f32 %v9026_v62, %v9027_v59  ;;  %v8910_v14 = vcombine.low %v8643_v2, %v8644_v5  ;;  %v8524_v38 = vcombine.high %v8516_v50, %v8516_v50  ;;  %v8647_v39 = vmax.f32 %v8516_v50, 0.0 }
 0x4be   :  { %v9033_v12 = vrot.slane %v9032_v13, 4  ;;  %v8926_v35 = vcombine.low %v8645_v20, %v8646_v9  ;;  %v8525_v16 = vcombine.high %v8523_v15, %v8523_v15  ;;  %v8649_v37 = vmax.f32 %v8523_v15, 0.0 }
 0x4bf   :  { %v8924_v7 = vrot.slane %v8910_v14, %v13039_v51  ;;  %v8648_v48 = vmax.f32 %v8524_v38, 0.0  ;;  %v8940_v17 = vrot.slane %v8647_v39, %v13039_v51  ;;  %v8526_v52 = vcombine.high %v8288_v11, %v8288_v11 }
 0x4c0   :  { %v9034_v43 = vmax.f32 %v9032_v13, %v9033_v12  ;;  %v8650_v27 = vmax.f32 %v8525_v16, 0.0  ;;  %v8933_v36 = vrot.slane %v8926_v35, %v13039_v51  ;;  %v8533_v45 = vrot.slane %v8288_v11, %v13039_v51  ;;  %v9174_v12 = vld [vmem:[%s12933_s9 + $0x10] sm:$0xff]  ;;  %v9175_v35 = vld [vmem:[%s12933_s9 + $0x18] sm:$0xff] }
 0x4c1   :  { %v8925_v34 = vcombine.low %v8917_v32, %v8924_v7  ;;  %v8942_v22 = vcombine.low %v8648_v48, %v8649_v37  ;;  %v8540_v63 = vrot.slane %v8526_v52, %v13039_v51  ;;  %v9029_v33 = vrot.slane %v9028_v4, 1  ;;  %v9176_v7 = vld [vmem:[%s12933_s9 + $0x20] sm:$0xff]  ;;  %v9177_v48 = vld [vmem:[%s12933_s9 + $0x28] sm:$0xff]  ;;  %v9178_v52 = vld [vmem:[%s12933_s9 + $0x30] sm:$0xff] }
 0x4c2   :  { %v9035_v42 = vrot.slane %v9034_v43, 2  ;;  %v8941_v49 = vcombine.low %v8933_v36, %v8940_v17  ;;  %v8541_v26 = vcombine.high %v8533_v45, %v8533_v45  ;;  %v8651_v29 = vmax.f32 %v8533_v45, 0.0  ;;  %v9181_v36 = vld [vmem:[%s12933_s9 + $0x48] sm:$0xff] }
 0x4c3   :  { %v9022_v1 = vmax.f32 %v12813_v41, %v9021_v0  ;;  %v8542_v61 = vcombine.high %v8540_v63, %v8540_v63  ;;  %v8653_v8 = vmax.f32 %v8540_v63, 0.0  ;;  %v9030_v58 = vmax.f32 %v9028_v4, %v9029_v33  ;;  %v9173_v4 = vld [vmem:[%s12933_s9 + $0x8] sm:$0xff]  ;;  %v9184_v33 = vld [vmem:[%s12933_s9 + $0x60] sm:$0xff] }
 0x4c4   :  { %v9036_v10 = vmax.f32 %v9034_v43, %v9035_v42  ;;  %v9039_v44 = vsel %vm1561_vm0, %v8941_v49, -inf  ;;  %v8652_v55 = vmax.f32 %v8541_v26, 0.0  ;;  %v8943_v19 = vcombine.low %v8650_v27, %v8651_v29  ;;  %v9180_v27 = vld [vmem:[%s12933_s9 + $0x40] sm:$0xff]  ;;  %v9185_v42 = vld [vmem:[%s12933_s9 + $0x68] sm:$0xff]  ;;  %v9186_v26 = vld [vmem:[%s12933_s9 + $0x70] sm:$0xff] }
 0x4c5   :  { %v8950_v56 = vrot.slane %v8942_v22, %v13039_v51  ;;  %v9040_v28 = vmax.f32 %v8925_v34, %v9039_v44  ;;  %v8654_v23 = vmax.f32 %v8542_v61, 0.0  ;;  %v9087_v25 = vsel %vm9086_vm9, %v12800_v54, %v12786_v30  ;;  %v9182_v34 = vld [vmem:[%s12933_s9 + $0x50] sm:$0xff]  ;;  %v9183_v22 = vld [vmem:[%s12933_s9 + $0x58] sm:$0xff]  ;;  %v9516_v61 = vld [vmem:[%s12932_s8] ss:$0 sm:$0xff] }
 0x4c6   :  { %v8957_v40 = vrot.slane %v8943_v19, %v13039_v51  ;;  %v8959_v3 = vcombine.low %v8652_v55, %v8653_v8  ;;  %v9037_v41 = vrot.slane %v9036_v10, 1  ;;  %v9089_v0 = vsel %vm9088_vm10, %v12816_v57, %v9087_v25  ;;  %v9187_v29 = vld [vmem:[%s12933_s9 + $0x78] sm:$0xff] }
 0x4c7   :  { %v9041_v31 = vrot.slane %v9040_v28, 4  ;;  %v8973_v18 = vrot.slane %v8654_v23, %v13039_v51  ;;  %v9091_v62 = vsel %vm9090_vm11, %v9022_v1, %v9089_v0  ;;  %v10030_v37 = vpack.c.bf16 %v9175_v35, %v9174_v12 }
 0x4c8   :  { %v8958_v47 = vcombine.low %v8950_v56, %v8957_v40  ;;  %v8966_v46 = vrot.slane %v8959_v3, %v13039_v51  ;;  %v9038_v2 = vmax.f32 %v9036_v10, %v9037_v41  ;;  %v9093_v32 = vsel %vm9092_vm12, %v9030_v58, %v9091_v62  ;;  %v9172_v51 = vld [vmem:[%s12933_s9] sm:$0xff] }
 0x4c9   :  { %v9042_v30 = vmax.f32 %v9040_v28, %v9041_v31  ;;  %v10027_v39 = vpack.c.bf16 %v9173_v4, %v9172_v51  ;;  %v10033_v17 = vpack.c.bf16 %v9177_v48, %v9176_v7  ;;  %v10039_v45 = vpack.c.bf16 %v9181_v36, %v9180_v27 }
 0x4ca   :  { %v8974_v54 = vcombine.low %v8966_v46, %v8973_v18  ;;  %v9095_v53 = vsel %vm9094_vm13, %v9038_v2, %v9093_v32  ;;  %v10042_v63 = vpack.c.bf16 %v9183_v22, %v9182_v34  ;;  %v10045_v49 = vpack.c.bf16 %v9185_v42, %v9184_v33 }
 0x4cb   :  { %v9043_v20 = vrot.slane %v9042_v30, 2  ;;  %v10048_v1 = vpack.c.bf16 %v9187_v29, %v9186_v26 }
 0x4cc   :  { %v9047_v21 = vsel %vm1561_vm0, %v8974_v54, -inf }
 0x4cd   :  { %v9048_v59 = vmax.f32 %v8958_v47, %v9047_v21  ;;  %v9044_v57 = vmax.f32 %v9042_v30, %v9043_v20 }
 0x4cf   :  { %v9049_v24 = vrot.slane %v9048_v59, 4  ;;  %v9045_v5 = vrot.slane %v9044_v57, 1 }
 0x4d1   :  { %v9046_v50 = vmax.f32 %v9044_v57, %v9045_v5  ;;  %v9050_v13 = vmax.f32 %v9048_v59, %v9049_v24 }
 0x4d3   :  { %v9051_v9 = vrot.slane %v9050_v13, 2  ;;  %v9097_v15 = vsel %vm9096_vm14, %v9046_v50, %v9095_v53 }
 0x4d5   :  { %v9052_v11 = vmax.f32 %v9050_v13, %v9051_v9 }
 0x4d7   :  { %v9053_v14 = vrot.slane %v9052_v11, 1 }
 0x4d9   :  { %v9054_v38 = vmax.f32 %v9052_v11, %v9053_v14 }
 0x4db   :  { %v9099_v16 = vsel %vm9098_vm15, %v9054_v38, %v9097_v15 }
 0x4dc   :  { %9965 = vmatmul.mubr.f32.vlgmr.msra.gmra.mrb[120].mxu0 %v9099_v16 }
 0x4dd   :  { %10028 = vmatpush3.bf16.msra.mxu0 %v10027_v39  ;;  %9999 = vmatprep.mubr.msk.f32.mxu0 %vm10169_vm1, %v13031_v6  ;;  %v9179_v6 = vld [vmem:[%s12933_s9 + $0x38] sm:$0xff]  ;;  %s10144_s9 = scalar_lea.vmem %s9273_s2, 128 }
 0x4de   :  { %10029 = vmatprep.subr.bf16.mxu0 %v10174_v60  ;;  %v10036_v43 = vpack.c.bf16 %v9179_v6, %v9178_v52  ;;  %p10145_p0 = scmp.ne.s32.totalorder %s9273_s2, %s10144_s9  ;;  %p10150_p2 = scmp.lt.s32.totalorder %s10144_s9, %s10144_s9 }
 0x4e0   :  { %p10151_p3 = por %p10150_p2, %p10149_p1 }
 0x4e1   :  { %10031 = vmatpush3.bf16.msra.mxu0 %v10030_v37 }
 0x4e2   :  { %10032 = vmatprep.subr.bf16.mxu0 %v10174_v60  ;;  %p10152_p4 = pnand %p10151_p3, %p10145_p0 }
 0x4e5   :  { %10034 = vmatpush3.bf16.msra.mxu0 %v10033_v17 }
 0x4e6   :  { %10035 = vmatprep.subr.bf16.mxu0 %v10174_v60 }
 0x4e9   :  { %10037 = vmatpush3.bf16.msra.mxu0 %v10036_v43 }
 0x4ea   :  { %10038 = vmatprep.subr.bf16.mxu0 %v10174_v60 }
 0x4ed   :  { %10040 = vmatpush3.bf16.msra.mxu0 %v10039_v45 }
 0x4ee   :  { %10041 = vmatprep.subr.bf16.mxu0 %v10174_v60 }
 0x4f1   :  { %10043 = vmatpush3.bf16.msra.mxu0 %v10042_v63 }
 0x4f2   :  { %10044 = vmatprep.subr.bf16.mxu0 %v10174_v60 }
 0x4f5   :  { %10046 = vmatpush3.bf16.msra.mxu0 %v10045_v49 }
 0x4f6   :  { %10047 = vmatprep.subr.bf16.mxu0 %v10174_v60  ;;  %v9517_v60 = vld [vmem:[%s12934_s10] ss:$0 sm:$0xff] }
 0x4f9   :  { %10049 = vmatpush3.bf16.msra.mxu0 %v10048_v1 }
 0x5af   :  { %v9167_v8 = vpop.f32.mrb[120].mxu0 }
 0x5b0   :  { %v9168_v58 = vadd.f32 %v9516_v61, %v9167_v8  ;;  %v9966_v10 = vpop.f32.mrb[121].mxu0 }
 0x5b2   :  { %v9171_v44 = vmax.f32 %v9168_v58, 0.0 }
 0x5b4   :  { %10000 = vmatmul.mubr.f32.vlgmr.msra.gmra.mrb[122].mxu0 %v9171_v44 }
 0x687   :  { %v9261_v55 = vpop.f32.mrb[122].mxu0 }
 0x688   :  { %v9262_v19 = vadd.f32 %v9517_v60, %v9261_v55  ;;  %v10001_v56 = vpop.f32.mrb[123].mxu0 }
 0x68a   :  { %9265 = vst [vmem:[#allocation2] sm:$0xff] %v9262_v19 }
 0x68b   :  { %10155 = shalt.err (!%p10152_p4)
}
 0x68c   :  { %s10156_s28 = scalar_lea.hbm %s12935_s11, 128 }
 0x68d   :  { %p10157_p5 = scmp.ne.s32.totalorder %s12935_s11, %s10156_s28  ;;  %p10160_p6 = scmp.lt.u32.totalorder %s10156_s28, %s12935_s11 }
 0x68f   :  { %p10162_p7 = pnand %p10160_p6, %p10157_p5 }
 0x691   :  { %10165 = shalt.err (!%p10162_p7)
}
 0x692   :  { %9275 = dma.vmem_to_hbm [thread:$0]  %s9273_s2, 128, %s12935_s11, [#allocation3]  }
 0x693   :  { %10166 = dma.done.wait [#allocation3], 128  }
 0x694   :  { %10167 = vsyncadd [#allocation3], 4294967168 }
 0x695   :  { %9279 = vsyncpa [#allocation3], 1 }

</bundles_post_ra>
